<compile_context>
chip_gen: v7x
topology: tpu7x:2x2x1
jax: 0.10.0
libtpu: 0.0.40
codegen_flags: <defaults>
</compile_context>

<pallas_src>
import functools
import math

import jax
import jax.numpy as jnp
from jax import lax
from jax.experimental import pallas as pl
from jax.experimental.pallas import tpu as pltpu

LANE = 128


def _round_up(x, m):
    return ((x + m - 1) // m) * m


def _layer_norm(x, gamma, beta, eps=1e-5):
    mu = jnp.mean(x, axis=-1, keepdims=True)
    var = jnp.mean(jnp.square(x - mu), axis=-1, keepdims=True)
    return (x - mu) * lax.rsqrt(var + eps) * gamma + beta


# --------------------------------------------------------------------------
# Single fused kernel: embeddings -> n_layer encoder layers -> mean-pool ->
# classifier -> log_softmax.  One grid step handles a (BT, T, C) batch tile,
# laid out as a (BT*T, C) row slab so every big matmul uses all sublanes.
# --------------------------------------------------------------------------
def fused_forward_kernel(idx_ref, tok_ref, pos_ref,
                         g1_ref, be1_ref, wq_ref, wk_ref, wv_ref, wp_ref, bp_ref,
                         g2_ref, be2_ref, w1_ref, b1_ref, w2_ref, b2_ref,
                         cw1_ref, cb1_ref, cw2_ref, cb2_ref,
                         o_ref, *, n_layer, n_head, seq_len, n_output):
    T = seq_len
    idx_col = idx_ref[0]                              # (BT*T, 1) int32
    BTT = idx_col.shape[0]
    BT = BTT // T
    V, C = tok_ref.shape
    hs = C // n_head
    scale = 1.0 / math.sqrt(hs)

    # ---- embeddings: in-kernel gather as a one-hot matmul (MXU-friendly) ----
    tok_oh = (lax.broadcasted_iota(jnp.int32, (BTT, V), 1) == idx_col).astype(jnp.float32)
    x = jnp.dot(tok_oh, tok_ref[...], preferred_element_type=jnp.float32)      # (BTT, C)
    pos = pos_ref[...][:T]                                                     # (T, C)
    x = x + jnp.concatenate([pos] * BT, axis=0)                                # pos broadcast

    # ---- encoder layers (weights all VMEM-resident, static Python loop) ----
    for l in range(n_layer):
        xn = _layer_norm(x, g1_ref[l], be1_ref[l])
        # Per-head Q/K/V over the whole (BT*T, C) slab: batch folded into rows,
        # per-head weight blocks -> no in-kernel lane slicing.
        q_h = [jnp.dot(xn, wq_ref[l, h], preferred_element_type=jnp.float32)
               for h in range(n_head)]
        k_h = [jnp.dot(xn, wk_ref[l, h], preferred_element_type=jnp.float32)
               for h in range(n_head)]
        v_h = [jnp.dot(xn, wv_ref[l, h], preferred_element_type=jnp.float32)
               for h in range(n_head)]

        out_rows = []
        for b in range(BT):                           # (T x T) attention per batch elem
            r0, r1 = b * T, (b + 1) * T
            acc_b = None
            for h in range(n_head):
                qh, kh, vh = q_h[h][r0:r1], k_h[h][r0:r1], v_h[h][r0:r1]
                # q @ k^T (contract last dims, no explicit transpose), unmasked softmax.
                wei = lax.dot_general(qh, kh, (((1,), (1,)), ((), ())),
                                      preferred_element_type=jnp.float32) * scale
                wei = jnp.exp(wei - jnp.max(wei, axis=-1, keepdims=True))
                wei = wei * pl.reciprocal(jnp.sum(wei, axis=-1, keepdims=True), approx=True)
                hout = jnp.dot(wei, vh, preferred_element_type=jnp.float32)    # (T, hs)
                # Per-head output-projection accumulation (replaces concat + big dot).
                part = jnp.dot(hout, wp_ref[l, h], preferred_element_type=jnp.float32)
                acc_b = part if acc_b is None else acc_b + part
            out_rows.append(acc_b)
        attn = jnp.concatenate(out_rows, axis=0) + bp_ref[l]                   # (BTT, C)

        x = x + attn                                   # residual 1 (dropout p=0)
        x = _layer_norm(x, g2_ref[l], be2_ref[l])      # post-norm (module semantics)
        h1 = jnp.maximum(
            jnp.dot(x, w1_ref[l], preferred_element_type=jnp.float32) + b1_ref[l], 0.0)
        x = x + jnp.dot(h1, w2_ref[l], preferred_element_type=jnp.float32) + b2_ref[l]

    # ---- mean pool over the sequence (exact 1/T constant multiply) ----
    pooled = jnp.concatenate(
        [jnp.sum(x[b * T:(b + 1) * T], axis=0, keepdims=True) for b in range(BT)],
        axis=0) * (1.0 / T)                                                    # (BT, C)

    # ---- classifier on lane-padded (128) hidden/output dims ----
    h = jnp.dot(pooled, cw1_ref[...], preferred_element_type=jnp.float32) + cb1_ref[...]
    h = jnp.maximum(h, 0.0)                            # ReLU (dropout p=0)
    logits = jnp.dot(h, cw2_ref[...], preferred_element_type=jnp.float32) + cb2_ref[...]

    # Mask padded class columns, then numerically stable log_softmax(dim=1).
    col = lax.broadcasted_iota(jnp.int32, logits.shape, 1)
    logits = jnp.where(col < n_output, logits, -1e30)
    m = jnp.max(logits, axis=-1, keepdims=True)
    z = logits - m
    lse = jnp.log(jnp.sum(jnp.exp(z), axis=-1, keepdims=True))
    o_ref[0] = (z - lse).astype(o_ref.dtype)           # lane-dense (BT, 128) store


# --------------------------------------------------------------------------
# One-time parameter preparation (stacking, per-head splitting, lane padding).
# Done once at init — NOT in the per-call path.
# --------------------------------------------------------------------------
def prepare_params(params, *, n_head):
    C = params["tok_emb"].shape[1]
    hs = C // n_head
    layers = params["layers"]

    def stack(name):
        return jnp.stack([lp[name] for lp in layers], axis=0)

    def split_cols(w):   # (C, C), columns grouped per head -> (n_head, C, hs)
        return w.reshape(C, n_head, hs).transpose(1, 0, 2)

    def split_rows(w):   # (C, C), rows grouped per head -> (n_head, hs, C)
        return w.reshape(n_head, hs, C)

    cp = params["classifier"]
    n_input, n_hidden = cp["w1"].shape
    n_output = cp["w2"].shape[1]
    Hp = _round_up(n_hidden, LANE)
    Op = _round_up(n_output, LANE)

    return {
        "tok_emb": params["tok_emb"].astype(jnp.float32),
        "pos_emb": params["pos_emb"].astype(jnp.float32),
        "g1": stack("g1"), "be1": stack("be1"),
        "wq": jnp.stack([split_cols(lp["wq"]) for lp in layers]),
        "wk": jnp.stack([split_cols(lp["wk"]) for lp in layers]),
        "wv": jnp.stack([split_cols(lp["wv"]) for lp in layers]),
        "wp": jnp.stack([split_rows(lp["wp"]) for lp in layers]),
        "bp": stack("bp"),
        "g2": stack("g2"), "be2": stack("be2"),
        "w1": stack("w1"), "b1": stack("b1"),
        "w2": stack("w2"), "b2": stack("b2"),
        "cw1": jnp.pad(cp["w1"], ((0, 0), (0, Hp - n_hidden))),
        "cb1": jnp.pad(cp["b1"], ((0, 0), (0, Hp - n_hidden))),
        "cw2": jnp.pad(cp["w2"], ((0, Hp - n_hidden), (0, Op - n_output))),
        "cb2": jnp.pad(cp["b2"], ((0, 0), (0, Op - n_output))),
    }


# --------------------------------------------------------------------------
# Full model forward — a single pallas_call.
# --------------------------------------------------------------------------
def encoder_and_classifier_forward(idx, kparams, *, n_output, num_batch_tiles=None):
    B, T = idx.shape
    n_layer, n_head = kparams["wq"].shape[0], kparams["wq"].shape[1]
    Op = kparams["cw2"].shape[1]

    # >=2 "parallel" grid steps keep a v7x second TensorCore busy; on single-TC
    # v5e/v6e the extra step costs ~0.35 us, negligible.
    if num_batch_tiles is None:
        num_batch_tiles = 2 if (B % 2 == 0 and B >= 2) else 1
    BT = B // num_batch_tiles
    idx_in = idx.astype(jnp.int32).reshape(num_batch_tiles, BT * T, 1)

    def resident(arr):
        # Whole array VMEM-resident; constant block index so it is never re-DMA'd.
        # (pipeline_mode=pl.Buffered(1) would halve its buffers for large C on v7x;
        #  at this ~0.5 MiB resident set it is not worth the extra lowering risk.)
        zeros = (0,) * arr.ndim
        return pl.BlockSpec(arr.shape, lambda i, z=zeros: z)

    order = ["tok_emb", "pos_emb", "g1", "be1", "wq", "wk", "wv", "wp", "bp",
             "g2", "be2", "w1", "b1", "w2", "b2", "cw1", "cb1", "cw2", "cb2"]
    weights = [kparams[name] for name in order]

    kernel = functools.partial(fused_forward_kernel, n_layer=n_layer, n_head=n_head,
                               seq_len=T, n_output=n_output)
    out = pl.pallas_call(
        kernel,
        out_shape=jax.ShapeDtypeStruct((num_batch_tiles, BT, Op), jnp.float32),
        grid=(num_batch_tiles,),
        in_specs=[pl.BlockSpec((1, BT * T, 1), lambda i: (i, 0, 0))]     # idx tile
                 + [resident(a) for a in weights],                        # weights
        out_specs=pl.BlockSpec((1, BT, Op), lambda i: (i, 0, 0)),         # lane-dense
        compiler_params=pltpu.CompilerParams(
            dimension_semantics=("parallel",)),
    )(idx_in, *weights)

    return out.reshape(B, Op)[:, :n_output]


# --------------------------------------------------------------------------
# Parameter init (PyTorch-like) and pure-JAX reference
# --------------------------------------------------------------------------
def init_params(key, *, n_layer, n_embd, vocab_size, block_size,
                n_input, n_hidden, n_output):
    keys = iter(jax.random.split(key, 64))

    def linear(fan_in, shape):
        bound = 1.0 / math.sqrt(fan_in)
        return jax.random.uniform(next(keys), shape, jnp.float32, -bound, bound)

    params = {
        "tok_emb": 0.02 * jax.random.normal(next(keys), (vocab_size, n_embd), jnp.float32),
        "pos_emb": 0.02 * jax.random.normal(next(keys), (block_size, n_embd), jnp.float32),
        "layers": [],
    }
    for _ in range(n_layer):
        params["layers"].append({
            "g1": jnp.ones((1, n_embd), jnp.float32),
            "be1": jnp.zeros((1, n_embd), jnp.float32),
            "wq": linear(n_embd, (n_embd, n_embd)),
            "wk": linear(n_embd, (n_embd, n_embd)),
            "wv": linear(n_embd, (n_embd, n_embd)),
            "wp": linear(n_embd, (n_embd, n_embd)),
            "bp": linear(n_embd, (1, n_embd)),
            "g2": jnp.ones((1, n_embd), jnp.float32),
            "be2": jnp.zeros((1, n_embd), jnp.float32),
            "w1": linear(n_embd, (n_embd, 4 * n_embd)),
            "b1": linear(n_embd, (1, 4 * n_embd)),
            "w2": linear(4 * n_embd, (4 * n_embd, n_embd)),
            "b2": linear(4 * n_embd, (1, n_embd)),
        })
    params["classifier"] = {
        "w1": linear(n_input, (n_input, n_hidden)),
        "b1": linear(n_input, (1, n_hidden)),
        "w2": linear(n_hidden, (n_hidden, n_output)),
        "b2": linear(n_hidden, (1, n_output)),
    }
    return params


def reference_forward(idx, params, *, n_head):
    T = idx.shape[1]
    x = params["tok_emb"][idx] + params["pos_emb"][jnp.arange(T)][None, :, :]
    for lp in params["layers"]:
        xn = _layer_norm(x, lp["g1"], lp["be1"])
        q, k, v = xn @ lp["wq"], xn @ lp["wk"], xn @ lp["wv"]
        C = x.shape[-1]
        hs = C // n_head
        heads = []
        for h in range(n_head):
            sl = slice(h * hs, (h + 1) * hs)
            wei = (q[..., sl] @ jnp.swapaxes(k[..., sl], -1, -2)) / math.sqrt(hs)
            wei = jax.nn.softmax(wei, axis=-1)
            heads.append(wei @ v[..., sl])
        att = jnp.concatenate(heads, axis=-1)
        x = x + (att @ lp["wp"] + lp["bp"])
        x = _layer_norm(x, lp["g2"], lp["be2"])
        ffn = jnp.maximum(x @ lp["w1"] + lp["b1"], 0.0) @ lp["w2"] + lp["b2"]
        x = x + ffn
    pooled = jnp.mean(x, axis=1)
    cp = params["classifier"]
    h = jnp.maximum(pooled @ cp["w1"] + cp["b1"], 0.0)
    logits = h @ cp["w2"] + cp["b2"]
    return jax.nn.log_softmax(logits, axis=1)


if __name__ == "__main__":
    # Small shapes consistent with EncoderAndClassifier(idx:[B, T]).
    n_layer, n_embd, n_head = 2, 32, 4
    vocab_size, block_size = 64, 16
    B, T = 4, 16
    n_input, n_hidden, n_output = n_embd, 64, 10   # classifier eats mean over seq

    key = jax.random.PRNGKey(0)
    kidx, kp = jax.random.split(key)
    idx = jax.random.randint(kidx, (B, T), 0, vocab_size)
    params = init_params(kp, n_layer=n_layer, n_embd=n_embd, vocab_size=vocab_size,
                         block_size=block_size, n_input=n_input,
                         n_hidden=n_hidden, n_output=n_output)

    kparams = prepare_params(params, n_head=n_head)   # one-time stacking/splitting/padding
    out = encoder_and_classifier_forward(idx, kparams, n_output=n_output)
    out = jax.block_until_ready(out)

    ref = reference_forward(idx, params, n_head=n_head)
    assert out.shape == (B, n_output)
    max_err = float(jnp.max(jnp.abs(out - ref)))
    assert jnp.allclose(out, ref, atol=2e-3, rtol=2e-3), f"max_err={max_err}"

    print("KERNEL_OK")
</pallas_src>

<mosaic_0001>
module attributes {stable_mosaic.version = 11 : i64} {
  func.func @fused_forward_kernel(%arg0: i32, %arg1: memref<1x32x1xi32, #tpu.memory_space<vmem>>, %arg2: memref<64x32xf32, #tpu.memory_space<vmem>>, %arg3: memref<16x32xf32, #tpu.memory_space<vmem>>, %arg4: memref<2x1x32xf32, #tpu.memory_space<vmem>>, %arg5: memref<2x1x32xf32, #tpu.memory_space<vmem>>, %arg6: memref<2x4x32x8xf32, #tpu.memory_space<vmem>>, %arg7: memref<2x4x32x8xf32, #tpu.memory_space<vmem>>, %arg8: memref<2x4x32x8xf32, #tpu.memory_space<vmem>>, %arg9: memref<2x4x8x32xf32, #tpu.memory_space<vmem>>, %arg10: memref<2x1x32xf32, #tpu.memory_space<vmem>>, %arg11: memref<2x1x32xf32, #tpu.memory_space<vmem>>, %arg12: memref<2x1x32xf32, #tpu.memory_space<vmem>>, %arg13: memref<2x32x128xf32, #tpu.memory_space<vmem>>, %arg14: memref<2x1x128xf32, #tpu.memory_space<vmem>>, %arg15: memref<2x128x32xf32, #tpu.memory_space<vmem>>, %arg16: memref<2x1x32xf32, #tpu.memory_space<vmem>>, %arg17: memref<32x128xf32, #tpu.memory_space<vmem>>, %arg18: memref<1x128xf32, #tpu.memory_space<vmem>>, %arg19: memref<128x128xf32, #tpu.memory_space<vmem>>, %arg20: memref<1x128xf32, #tpu.memory_space<vmem>>, %arg21: memref<1x2x128xf32, #tpu.memory_space<vmem>>) attributes {dimension_semantics = [#tpu.dimension_semantics<parallel>], iteration_bounds = array<i64: 2>, scalar_prefetch = 0 : i64, scratch_operands = 0 : i64, tpu.core_type = #tpu.core_type<tc>, window_params = [{transform_indices = @transform_0, window_bounds = array<i64: 1, 32, 1>}, {pipeline_mode = #tpu.pipeline_mode<synchronous>, transform_indices = @transform_1, window_bounds = array<i64: 64, 32>}, {pipeline_mode = #tpu.pipeline_mode<synchronous>, transform_indices = @transform_2, window_bounds = array<i64: 16, 32>}, {pipeline_mode = #tpu.pipeline_mode<synchronous>, transform_indices = @transform_3, window_bounds = array<i64: 2, 1, 32>}, {pipeline_mode = #tpu.pipeline_mode<synchronous>, transform_indices = @transform_4, window_bounds = array<i64: 2, 1, 32>}, {pipeline_mode = #tpu.pipeline_mode<synchronous>, transform_indices = @transform_5, window_bounds = array<i64: 2, 4, 32, 8>}, {pipeline_mode = #tpu.pipeline_mode<synchronous>, transform_indices = @transform_6, window_bounds = array<i64: 2, 4, 32, 8>}, {pipeline_mode = #tpu.pipeline_mode<synchronous>, transform_indices = @transform_7, window_bounds = array<i64: 2, 4, 32, 8>}, {pipeline_mode = #tpu.pipeline_mode<synchronous>, transform_indices = @transform_8, window_bounds = array<i64: 2, 4, 8, 32>}, {pipeline_mode = #tpu.pipeline_mode<synchronous>, transform_indices = @transform_9, window_bounds = array<i64: 2, 1, 32>}, {pipeline_mode = #tpu.pipeline_mode<synchronous>, transform_indices = @transform_10, window_bounds = array<i64: 2, 1, 32>}, {pipeline_mode = #tpu.pipeline_mode<synchronous>, transform_indices = @transform_11, window_bounds = array<i64: 2, 1, 32>}, {pipeline_mode = #tpu.pipeline_mode<synchronous>, transform_indices = @transform_12, window_bounds = array<i64: 2, 32, 128>}, {pipeline_mode = #tpu.pipeline_mode<synchronous>, transform_indices = @transform_13, window_bounds = array<i64: 2, 1, 128>}, {pipeline_mode = #tpu.pipeline_mode<synchronous>, transform_indices = @transform_14, window_bounds = array<i64: 2, 128, 32>}, {pipeline_mode = #tpu.pipeline_mode<synchronous>, transform_indices = @transform_15, window_bounds = array<i64: 2, 1, 32>}, {pipeline_mode = #tpu.pipeline_mode<synchronous>, transform_indices = @transform_16, window_bounds = array<i64: 32, 128>}, {pipeline_mode = #tpu.pipeline_mode<synchronous>, transform_indices = @transform_17, window_bounds = array<i64: 1, 128>}, {pipeline_mode = #tpu.pipeline_mode<synchronous>, transform_indices = @transform_18, window_bounds = array<i64: 128, 128>}, {pipeline_mode = #tpu.pipeline_mode<synchronous>, transform_indices = @transform_19, window_bounds = array<i64: 1, 128>}, {transform_indices = @transform_20, window_bounds = array<i64: 1, 2, 128>}]} {
    %c0 = arith.constant 0 : index
    %c0_0 = arith.constant 0 : index
    %c0_1 = arith.constant 0 : index
    %0 = vector.load %arg1[%c0, %c0_0, %c0_1] : memref<1x32x1xi32, #tpu.memory_space<vmem>>, vector<1x32x1xi32>
    %1 = vector.shape_cast %0 : vector<1x32x1xi32> to vector<32x1xi32>
    %2 = tpu.iota {dimensions = array<i32: 1>} : vector<32x64xi32>
    %3 = vector.broadcast %1 : vector<32x1xi32> to vector<32x64xi32>
    %4 = arith.cmpi eq, %2, %3 : vector<32x64xi32>
    %5 = arith.extui %4 : vector<32x64xi1> to vector<32x64xi32>
    %6 = arith.sitofp %5 : vector<32x64xi32> to vector<32x64xf32>
    %c0_2 = arith.constant 0 : index
    %c0_3 = arith.constant 0 : index
    %7 = vector.load %arg2[%c0_2, %c0_3] : memref<64x32xf32, #tpu.memory_space<vmem>>, vector<64x32xf32>
    %cst = arith.constant dense<0.000000e+00> : vector<32x32xf32>
    %8 = tpu.matmul %6, %7, %cst {dimension_numbers = #tpu.dot_dimension_numbers<[1], [0], [0], [1], [0, 0, 1, 1], [], []>} : vector<32x64xf32>, vector<64x32xf32>, vector<32x32xf32> -> vector<32x32xf32>
    %c0_4 = arith.constant 0 : index
    %c0_5 = arith.constant 0 : index
    %9 = vector.load %arg3[%c0_4, %c0_5] : memref<16x32xf32, #tpu.memory_space<vmem>>, vector<16x32xf32>
    %10 = tpu.concatenate %9, %9 in 0 : vector<16x32xf32>, vector<16x32xf32> -> vector<32x32xf32>
    %11 = arith.addf %8, %10 : vector<32x32xf32>
    %c0_6 = arith.constant 0 : index
    %c0_7 = arith.constant 0 : index
    %c0_8 = arith.constant 0 : index
    %12 = vector.load %arg4[%c0_6, %c0_7, %c0_8] : memref<2x1x32xf32, #tpu.memory_space<vmem>>, vector<1x1x32xf32>
    %13 = vector.shape_cast %12 : vector<1x1x32xf32> to vector<1x32xf32>
    %c0_9 = arith.constant 0 : index
    %c0_10 = arith.constant 0 : index
    %c0_11 = arith.constant 0 : index
    %14 = vector.load %arg5[%c0_9, %c0_10, %c0_11] : memref<2x1x32xf32, #tpu.memory_space<vmem>>, vector<1x1x32xf32>
    %15 = vector.shape_cast %14 : vector<1x1x32xf32> to vector<1x32xf32>
    %cst_12 = arith.constant dense<0.000000e+00> : vector<32xf32>
    %16 = vector.multi_reduction <add>, %11, %cst_12 [1] : vector<32x32xf32> to vector<32xf32>
    %17 = vector.shape_cast %16 : vector<32xf32> to vector<32x1xf32>
    %cst_13 = arith.constant 3.200000e+01 : f32
    %18 = vector.broadcast %cst_13 : f32 to vector<32x1xf32>
    %19 = arith.divf %17, %18 : vector<32x1xf32>
    %20 = vector.broadcast %19 : vector<32x1xf32> to vector<32x32xf32>
    %21 = arith.subf %11, %20 : vector<32x32xf32>
    %22 = arith.mulf %21, %21 : vector<32x32xf32>
    %cst_14 = arith.constant dense<0.000000e+00> : vector<32xf32>
    %23 = vector.multi_reduction <add>, %22, %cst_14 [1] : vector<32x32xf32> to vector<32xf32>
    %24 = vector.shape_cast %23 : vector<32xf32> to vector<32x1xf32>
    %cst_15 = arith.constant 3.200000e+01 : f32
    %25 = vector.broadcast %cst_15 : f32 to vector<32x1xf32>
    %26 = arith.divf %24, %25 : vector<32x1xf32>
    %27 = vector.broadcast %19 : vector<32x1xf32> to vector<32x32xf32>
    %28 = arith.subf %11, %27 : vector<32x32xf32>
    %cst_16 = arith.constant 9.99999974E-6 : f32
    %29 = vector.broadcast %cst_16 : f32 to vector<32x1xf32>
    %30 = arith.addf %26, %29 : vector<32x1xf32>
    %31 = math.rsqrt %30 : vector<32x1xf32>
    %32 = vector.broadcast %31 : vector<32x1xf32> to vector<32x32xf32>
    %33 = arith.mulf %28, %32 : vector<32x32xf32>
    %34 = vector.broadcast %13 : vector<1x32xf32> to vector<32x32xf32>
    %35 = arith.mulf %33, %34 : vector<32x32xf32>
    %36 = vector.broadcast %15 : vector<1x32xf32> to vector<32x32xf32>
    %37 = arith.addf %35, %36 : vector<32x32xf32>
    %c0_17 = arith.constant 0 : index
    %c0_18 = arith.constant 0 : index
    %c0_19 = arith.constant 0 : index
    %c0_20 = arith.constant 0 : index
    %38 = vector.load %arg6[%c0_17, %c0_18, %c0_19, %c0_20] : memref<2x4x32x8xf32, #tpu.memory_space<vmem>>, vector<1x1x32x8xf32>
    %39 = vector.shape_cast %38 : vector<1x1x32x8xf32> to vector<32x8xf32>
    %cst_21 = arith.constant dense<0.000000e+00> : vector<32x8xf32>
    %40 = tpu.matmul %37, %39, %cst_21 {dimension_numbers = #tpu.dot_dimension_numbers<[1], [0], [0], [1], [0, 0, 1, 1], [], []>} : vector<32x32xf32>, vector<32x8xf32>, vector<32x8xf32> -> vector<32x8xf32>
    %c0_22 = arith.constant 0 : index
    %c1 = arith.constant 1 : index
    %c0_23 = arith.constant 0 : index
    %c0_24 = arith.constant 0 : index
    %41 = vector.load %arg6[%c0_22, %c1, %c0_23, %c0_24] : memref<2x4x32x8xf32, #tpu.memory_space<vmem>>, vector<1x1x32x8xf32>
    %42 = vector.shape_cast %41 : vector<1x1x32x8xf32> to vector<32x8xf32>
    %cst_25 = arith.constant dense<0.000000e+00> : vector<32x8xf32>
    %43 = tpu.matmul %37, %42, %cst_25 {dimension_numbers = #tpu.dot_dimension_numbers<[1], [0], [0], [1], [0, 0, 1, 1], [], []>} : vector<32x32xf32>, vector<32x8xf32>, vector<32x8xf32> -> vector<32x8xf32>
    %c0_26 = arith.constant 0 : index
    %c2 = arith.constant 2 : index
    %c0_27 = arith.constant 0 : index
    %c0_28 = arith.constant 0 : index
    %44 = vector.load %arg6[%c0_26, %c2, %c0_27, %c0_28] : memref<2x4x32x8xf32, #tpu.memory_space<vmem>>, vector<1x1x32x8xf32>
    %45 = vector.shape_cast %44 : vector<1x1x32x8xf32> to vector<32x8xf32>
    %cst_29 = arith.constant dense<0.000000e+00> : vector<32x8xf32>
    %46 = tpu.matmul %37, %45, %cst_29 {dimension_numbers = #tpu.dot_dimension_numbers<[1], [0], [0], [1], [0, 0, 1, 1], [], []>} : vector<32x32xf32>, vector<32x8xf32>, vector<32x8xf32> -> vector<32x8xf32>
    %c0_30 = arith.constant 0 : index
    %c3 = arith.constant 3 : index
    %c0_31 = arith.constant 0 : index
    %c0_32 = arith.constant 0 : index
    %47 = vector.load %arg6[%c0_30, %c3, %c0_31, %c0_32] : memref<2x4x32x8xf32, #tpu.memory_space<vmem>>, vector<1x1x32x8xf32>
    %48 = vector.shape_cast %47 : vector<1x1x32x8xf32> to vector<32x8xf32>
    %cst_33 = arith.constant dense<0.000000e+00> : vector<32x8xf32>
    %49 = tpu.matmul %37, %48, %cst_33 {dimension_numbers = #tpu.dot_dimension_numbers<[1], [0], [0], [1], [0, 0, 1, 1], [], []>} : vector<32x32xf32>, vector<32x8xf32>, vector<32x8xf32> -> vector<32x8xf32>
    %c0_34 = arith.constant 0 : index
    %c0_35 = arith.constant 0 : index
    %c0_36 = arith.constant 0 : index
    %c0_37 = arith.constant 0 : index
    %50 = vector.load %arg7[%c0_34, %c0_35, %c0_36, %c0_37] : memref<2x4x32x8xf32, #tpu.memory_space<vmem>>, vector<1x1x32x8xf32>
    %51 = vector.shape_cast %50 : vector<1x1x32x8xf32> to vector<32x8xf32>
    %cst_38 = arith.constant dense<0.000000e+00> : vector<32x8xf32>
    %52 = tpu.matmul %37, %51, %cst_38 {dimension_numbers = #tpu.dot_dimension_numbers<[1], [0], [0], [1], [0, 0, 1, 1], [], []>} : vector<32x32xf32>, vector<32x8xf32>, vector<32x8xf32> -> vector<32x8xf32>
    %c0_39 = arith.constant 0 : index
    %c1_40 = arith.constant 1 : index
    %c0_41 = arith.constant 0 : index
    %c0_42 = arith.constant 0 : index
    %53 = vector.load %arg7[%c0_39, %c1_40, %c0_41, %c0_42] : memref<2x4x32x8xf32, #tpu.memory_space<vmem>>, vector<1x1x32x8xf32>
    %54 = vector.shape_cast %53 : vector<1x1x32x8xf32> to vector<32x8xf32>
    %cst_43 = arith.constant dense<0.000000e+00> : vector<32x8xf32>
    %55 = tpu.matmul %37, %54, %cst_43 {dimension_numbers = #tpu.dot_dimension_numbers<[1], [0], [0], [1], [0, 0, 1, 1], [], []>} : vector<32x32xf32>, vector<32x8xf32>, vector<32x8xf32> -> vector<32x8xf32>
    %c0_44 = arith.constant 0 : index
    %c2_45 = arith.constant 2 : index
    %c0_46 = arith.constant 0 : index
    %c0_47 = arith.constant 0 : index
    %56 = vector.load %arg7[%c0_44, %c2_45, %c0_46, %c0_47] : memref<2x4x32x8xf32, #tpu.memory_space<vmem>>, vector<1x1x32x8xf32>
    %57 = vector.shape_cast %56 : vector<1x1x32x8xf32> to vector<32x8xf32>
    %cst_48 = arith.constant dense<0.000000e+00> : vector<32x8xf32>
    %58 = tpu.matmul %37, %57, %cst_48 {dimension_numbers = #tpu.dot_dimension_numbers<[1], [0], [0], [1], [0, 0, 1, 1], [], []>} : vector<32x32xf32>, vector<32x8xf32>, vector<32x8xf32> -> vector<32x8xf32>
    %c0_49 = arith.constant 0 : index
    %c3_50 = arith.constant 3 : index
    %c0_51 = arith.constant 0 : index
    %c0_52 = arith.constant 0 : index
    %59 = vector.load %arg7[%c0_49, %c3_50, %c0_51, %c0_52] : memref<2x4x32x8xf32, #tpu.memory_space<vmem>>, vector<1x1x32x8xf32>
    %60 = vector.shape_cast %59 : vector<1x1x32x8xf32> to vector<32x8xf32>
    %cst_53 = arith.constant dense<0.000000e+00> : vector<32x8xf32>
    %61 = tpu.matmul %37, %60, %cst_53 {dimension_numbers = #tpu.dot_dimension_numbers<[1], [0], [0], [1], [0, 0, 1, 1], [], []>} : vector<32x32xf32>, vector<32x8xf32>, vector<32x8xf32> -> vector<32x8xf32>
    %c0_54 = arith.constant 0 : index
    %c0_55 = arith.constant 0 : index
    %c0_56 = arith.constant 0 : index
    %c0_57 = arith.constant 0 : index
    %62 = vector.load %arg8[%c0_54, %c0_55, %c0_56, %c0_57] : memref<2x4x32x8xf32, #tpu.memory_space<vmem>>, vector<1x1x32x8xf32>
    %63 = vector.shape_cast %62 : vector<1x1x32x8xf32> to vector<32x8xf32>
    %cst_58 = arith.constant dense<0.000000e+00> : vector<32x8xf32>
    %64 = tpu.matmul %37, %63, %cst_58 {dimension_numbers = #tpu.dot_dimension_numbers<[1], [0], [0], [1], [0, 0, 1, 1], [], []>} : vector<32x32xf32>, vector<32x8xf32>, vector<32x8xf32> -> vector<32x8xf32>
    %c0_59 = arith.constant 0 : index
    %c1_60 = arith.constant 1 : index
    %c0_61 = arith.constant 0 : index
    %c0_62 = arith.constant 0 : index
    %65 = vector.load %arg8[%c0_59, %c1_60, %c0_61, %c0_62] : memref<2x4x32x8xf32, #tpu.memory_space<vmem>>, vector<1x1x32x8xf32>
    %66 = vector.shape_cast %65 : vector<1x1x32x8xf32> to vector<32x8xf32>
    %cst_63 = arith.constant dense<0.000000e+00> : vector<32x8xf32>
    %67 = tpu.matmul %37, %66, %cst_63 {dimension_numbers = #tpu.dot_dimension_numbers<[1], [0], [0], [1], [0, 0, 1, 1], [], []>} : vector<32x32xf32>, vector<32x8xf32>, vector<32x8xf32> -> vector<32x8xf32>
    %c0_64 = arith.constant 0 : index
    %c2_65 = arith.constant 2 : index
    %c0_66 = arith.constant 0 : index
    %c0_67 = arith.constant 0 : index
    %68 = vector.load %arg8[%c0_64, %c2_65, %c0_66, %c0_67] : memref<2x4x32x8xf32, #tpu.memory_space<vmem>>, vector<1x1x32x8xf32>
    %69 = vector.shape_cast %68 : vector<1x1x32x8xf32> to vector<32x8xf32>
    %cst_68 = arith.constant dense<0.000000e+00> : vector<32x8xf32>
    %70 = tpu.matmul %37, %69, %cst_68 {dimension_numbers = #tpu.dot_dimension_numbers<[1], [0], [0], [1], [0, 0, 1, 1], [], []>} : vector<32x32xf32>, vector<32x8xf32>, vector<32x8xf32> -> vector<32x8xf32>
    %c0_69 = arith.constant 0 : index
    %c3_70 = arith.constant 3 : index
    %c0_71 = arith.constant 0 : index
    %c0_72 = arith.constant 0 : index
    %71 = vector.load %arg8[%c0_69, %c3_70, %c0_71, %c0_72] : memref<2x4x32x8xf32, #tpu.memory_space<vmem>>, vector<1x1x32x8xf32>
    %72 = vector.shape_cast %71 : vector<1x1x32x8xf32> to vector<32x8xf32>
    %cst_73 = arith.constant dense<0.000000e+00> : vector<32x8xf32>
    %73 = tpu.matmul %37, %72, %cst_73 {dimension_numbers = #tpu.dot_dimension_numbers<[1], [0], [0], [1], [0, 0, 1, 1], [], []>} : vector<32x32xf32>, vector<32x8xf32>, vector<32x8xf32> -> vector<32x8xf32>
    %74 = vector.extract_strided_slice %40 {offsets = [0, 0], sizes = [16, 8], strides = [1, 1]} : vector<32x8xf32> to vector<16x8xf32>
    %75 = vector.extract_strided_slice %52 {offsets = [0, 0], sizes = [16, 8], strides = [1, 1]} : vector<32x8xf32> to vector<16x8xf32>
    %76 = vector.extract_strided_slice %64 {offsets = [0, 0], sizes = [16, 8], strides = [1, 1]} : vector<32x8xf32> to vector<16x8xf32>
    %cst_74 = arith.constant dense<0.000000e+00> : vector<16x16xf32>
    %77 = tpu.matmul %74, %75, %cst_74 {dimension_numbers = #tpu.dot_dimension_numbers<[1], [1], [0], [0], [0, 0, 1, 0], [], []>} : vector<16x8xf32>, vector<16x8xf32>, vector<16x16xf32> -> vector<16x16xf32>
    %cst_75 = arith.constant 0.353553385 : f32
    %78 = vector.broadcast %cst_75 : f32 to vector<16x16xf32>
    %79 = arith.mulf %77, %78 : vector<16x16xf32>
    %cst_76 = arith.constant dense<0xFF800000> : vector<16xf32>
    %80 = vector.multi_reduction <maximumf>, %79, %cst_76 [1] : vector<16x16xf32> to vector<16xf32>
    %81 = vector.shape_cast %80 : vector<16xf32> to vector<16x1xf32>
    %82 = vector.broadcast %81 : vector<16x1xf32> to vector<16x16xf32>
    %83 = arith.subf %79, %82 : vector<16x16xf32>
    %84 = math.exp %83 : vector<16x16xf32>
    %cst_77 = arith.constant dense<0.000000e+00> : vector<16xf32>
    %85 = vector.multi_reduction <add>, %84, %cst_77 [1] : vector<16x16xf32> to vector<16xf32>
    %86 = vector.shape_cast %85 : vector<16xf32> to vector<16x1xf32>
    %87 = tpu.reciprocal %86 {approx = true} : vector<16x1xf32> -> vector<16x1xf32>
    %88 = vector.broadcast %87 : vector<16x1xf32> to vector<16x16xf32>
    %89 = arith.mulf %84, %88 : vector<16x16xf32>
    %cst_78 = arith.constant dense<0.000000e+00> : vector<16x8xf32>
    %90 = tpu.matmul %89, %76, %cst_78 {dimension_numbers = #tpu.dot_dimension_numbers<[1], [0], [0], [1], [0, 0, 1, 1], [], []>} : vector<16x16xf32>, vector<16x8xf32>, vector<16x8xf32> -> vector<16x8xf32>
    %c0_79 = arith.constant 0 : index
    %c0_80 = arith.constant 0 : index
    %c0_81 = arith.constant 0 : index
    %c0_82 = arith.constant 0 : index
    %91 = vector.load %arg9[%c0_79, %c0_80, %c0_81, %c0_82] : memref<2x4x8x32xf32, #tpu.memory_space<vmem>>, vector<1x1x8x32xf32>
    %92 = vector.shape_cast %91 : vector<1x1x8x32xf32> to vector<8x32xf32>
    %cst_83 = arith.constant dense<0.000000e+00> : vector<16x32xf32>
    %93 = tpu.matmul %90, %92, %cst_83 {dimension_numbers = #tpu.dot_dimension_numbers<[1], [0], [0], [1], [0, 0, 1, 1], [], []>} : vector<16x8xf32>, vector<8x32xf32>, vector<16x32xf32> -> vector<16x32xf32>
    %94 = vector.extract_strided_slice %43 {offsets = [0, 0], sizes = [16, 8], strides = [1, 1]} : vector<32x8xf32> to vector<16x8xf32>
    %95 = vector.extract_strided_slice %55 {offsets = [0, 0], sizes = [16, 8], strides = [1, 1]} : vector<32x8xf32> to vector<16x8xf32>
    %96 = vector.extract_strided_slice %67 {offsets = [0, 0], sizes = [16, 8], strides = [1, 1]} : vector<32x8xf32> to vector<16x8xf32>
    %cst_84 = arith.constant dense<0.000000e+00> : vector<16x16xf32>
    %97 = tpu.matmul %94, %95, %cst_84 {dimension_numbers = #tpu.dot_dimension_numbers<[1], [1], [0], [0], [0, 0, 1, 0], [], []>} : vector<16x8xf32>, vector<16x8xf32>, vector<16x16xf32> -> vector<16x16xf32>
    %cst_85 = arith.constant 0.353553385 : f32
    %98 = vector.broadcast %cst_85 : f32 to vector<16x16xf32>
    %99 = arith.mulf %97, %98 : vector<16x16xf32>
    %cst_86 = arith.constant dense<0xFF800000> : vector<16xf32>
    %100 = vector.multi_reduction <maximumf>, %99, %cst_86 [1] : vector<16x16xf32> to vector<16xf32>
    %101 = vector.shape_cast %100 : vector<16xf32> to vector<16x1xf32>
    %102 = vector.broadcast %101 : vector<16x1xf32> to vector<16x16xf32>
    %103 = arith.subf %99, %102 : vector<16x16xf32>
    %104 = math.exp %103 : vector<16x16xf32>
    %cst_87 = arith.constant dense<0.000000e+00> : vector<16xf32>
    %105 = vector.multi_reduction <add>, %104, %cst_87 [1] : vector<16x16xf32> to vector<16xf32>
    %106 = vector.shape_cast %105 : vector<16xf32> to vector<16x1xf32>
    %107 = tpu.reciprocal %106 {approx = true} : vector<16x1xf32> -> vector<16x1xf32>
    %108 = vector.broadcast %107 : vector<16x1xf32> to vector<16x16xf32>
    %109 = arith.mulf %104, %108 : vector<16x16xf32>
    %cst_88 = arith.constant dense<0.000000e+00> : vector<16x8xf32>
    %110 = tpu.matmul %109, %96, %cst_88 {dimension_numbers = #tpu.dot_dimension_numbers<[1], [0], [0], [1], [0, 0, 1, 1], [], []>} : vector<16x16xf32>, vector<16x8xf32>, vector<16x8xf32> -> vector<16x8xf32>
    %c0_89 = arith.constant 0 : index
    %c1_90 = arith.constant 1 : index
    %c0_91 = arith.constant 0 : index
    %c0_92 = arith.constant 0 : index
    %111 = vector.load %arg9[%c0_89, %c1_90, %c0_91, %c0_92] : memref<2x4x8x32xf32, #tpu.memory_space<vmem>>, vector<1x1x8x32xf32>
    %112 = vector.shape_cast %111 : vector<1x1x8x32xf32> to vector<8x32xf32>
    %cst_93 = arith.constant dense<0.000000e+00> : vector<16x32xf32>
    %113 = tpu.matmul %110, %112, %cst_93 {dimension_numbers = #tpu.dot_dimension_numbers<[1], [0], [0], [1], [0, 0, 1, 1], [], []>} : vector<16x8xf32>, vector<8x32xf32>, vector<16x32xf32> -> vector<16x32xf32>
    %114 = arith.addf %93, %113 : vector<16x32xf32>
    %115 = vector.extract_strided_slice %46 {offsets = [0, 0], sizes = [16, 8], strides = [1, 1]} : vector<32x8xf32> to vector<16x8xf32>
    %116 = vector.extract_strided_slice %58 {offsets = [0, 0], sizes = [16, 8], strides = [1, 1]} : vector<32x8xf32> to vector<16x8xf32>
    %117 = vector.extract_strided_slice %70 {offsets = [0, 0], sizes = [16, 8], strides = [1, 1]} : vector<32x8xf32> to vector<16x8xf32>
    %cst_94 = arith.constant dense<0.000000e+00> : vector<16x16xf32>
    %118 = tpu.matmul %115, %116, %cst_94 {dimension_numbers = #tpu.dot_dimension_numbers<[1], [1], [0], [0], [0, 0, 1, 0], [], []>} : vector<16x8xf32>, vector<16x8xf32>, vector<16x16xf32> -> vector<16x16xf32>
    %cst_95 = arith.constant 0.353553385 : f32
    %119 = vector.broadcast %cst_95 : f32 to vector<16x16xf32>
    %120 = arith.mulf %118, %119 : vector<16x16xf32>
    %cst_96 = arith.constant dense<0xFF800000> : vector<16xf32>
    %121 = vector.multi_reduction <maximumf>, %120, %cst_96 [1] : vector<16x16xf32> to vector<16xf32>
    %122 = vector.shape_cast %121 : vector<16xf32> to vector<16x1xf32>
    %123 = vector.broadcast %122 : vector<16x1xf32> to vector<16x16xf32>
    %124 = arith.subf %120, %123 : vector<16x16xf32>
    %125 = math.exp %124 : vector<16x16xf32>
    %cst_97 = arith.constant dense<0.000000e+00> : vector<16xf32>
    %126 = vector.multi_reduction <add>, %125, %cst_97 [1] : vector<16x16xf32> to vector<16xf32>
    %127 = vector.shape_cast %126 : vector<16xf32> to vector<16x1xf32>
    %128 = tpu.reciprocal %127 {approx = true} : vector<16x1xf32> -> vector<16x1xf32>
    %129 = vector.broadcast %128 : vector<16x1xf32> to vector<16x16xf32>
    %130 = arith.mulf %125, %129 : vector<16x16xf32>
    %cst_98 = arith.constant dense<0.000000e+00> : vector<16x8xf32>
    %131 = tpu.matmul %130, %117, %cst_98 {dimension_numbers = #tpu.dot_dimension_numbers<[1], [0], [0], [1], [0, 0, 1, 1], [], []>} : vector<16x16xf32>, vector<16x8xf32>, vector<16x8xf32> -> vector<16x8xf32>
    %c0_99 = arith.constant 0 : index
    %c2_100 = arith.constant 2 : index
    %c0_101 = arith.constant 0 : index
    %c0_102 = arith.constant 0 : index
    %132 = vector.load %arg9[%c0_99, %c2_100, %c0_101, %c0_102] : memref<2x4x8x32xf32, #tpu.memory_space<vmem>>, vector<1x1x8x32xf32>
    %133 = vector.shape_cast %132 : vector<1x1x8x32xf32> to vector<8x32xf32>
    %cst_103 = arith.constant dense<0.000000e+00> : vector<16x32xf32>
    %134 = tpu.matmul %131, %133, %cst_103 {dimension_numbers = #tpu.dot_dimension_numbers<[1], [0], [0], [1], [0, 0, 1, 1], [], []>} : vector<16x8xf32>, vector<8x32xf32>, vector<16x32xf32> -> vector<16x32xf32>
    %135 = arith.addf %114, %134 : vector<16x32xf32>
    %136 = vector.extract_strided_slice %49 {offsets = [0, 0], sizes = [16, 8], strides = [1, 1]} : vector<32x8xf32> to vector<16x8xf32>
    %137 = vector.extract_strided_slice %61 {offsets = [0, 0], sizes = [16, 8], strides = [1, 1]} : vector<32x8xf32> to vector<16x8xf32>
    %138 = vector.extract_strided_slice %73 {offsets = [0, 0], sizes = [16, 8], strides = [1, 1]} : vector<32x8xf32> to vector<16x8xf32>
    %cst_104 = arith.constant dense<0.000000e+00> : vector<16x16xf32>
    %139 = tpu.matmul %136, %137, %cst_104 {dimension_numbers = #tpu.dot_dimension_numbers<[1], [1], [0], [0], [0, 0, 1, 0], [], []>} : vector<16x8xf32>, vector<16x8xf32>, vector<16x16xf32> -> vector<16x16xf32>
    %cst_105 = arith.constant 0.353553385 : f32
    %140 = vector.broadcast %cst_105 : f32 to vector<16x16xf32>
    %141 = arith.mulf %139, %140 : vector<16x16xf32>
    %cst_106 = arith.constant dense<0xFF800000> : vector<16xf32>
    %142 = vector.multi_reduction <maximumf>, %141, %cst_106 [1] : vector<16x16xf32> to vector<16xf32>
    %143 = vector.shape_cast %142 : vector<16xf32> to vector<16x1xf32>
    %144 = vector.broadcast %143 : vector<16x1xf32> to vector<16x16xf32>
    %145 = arith.subf %141, %144 : vector<16x16xf32>
    %146 = math.exp %145 : vector<16x16xf32>
    %cst_107 = arith.constant dense<0.000000e+00> : vector<16xf32>
    %147 = vector.multi_reduction <add>, %146, %cst_107 [1] : vector<16x16xf32> to vector<16xf32>
    %148 = vector.shape_cast %147 : vector<16xf32> to vector<16x1xf32>
    %149 = tpu.reciprocal %148 {approx = true} : vector<16x1xf32> -> vector<16x1xf32>
    %150 = vector.broadcast %149 : vector<16x1xf32> to vector<16x16xf32>
    %151 = arith.mulf %146, %150 : vector<16x16xf32>
    %cst_108 = arith.constant dense<0.000000e+00> : vector<16x8xf32>
    %152 = tpu.matmul %151, %138, %cst_108 {dimension_numbers = #tpu.dot_dimension_numbers<[1], [0], [0], [1], [0, 0, 1, 1], [], []>} : vector<16x16xf32>, vector<16x8xf32>, vector<16x8xf32> -> vector<16x8xf32>
    %c0_109 = arith.constant 0 : index
    %c3_110 = arith.constant 3 : index
    %c0_111 = arith.constant 0 : index
    %c0_112 = arith.constant 0 : index
    %153 = vector.load %arg9[%c0_109, %c3_110, %c0_111, %c0_112] : memref<2x4x8x32xf32, #tpu.memory_space<vmem>>, vector<1x1x8x32xf32>
    %154 = vector.shape_cast %153 : vector<1x1x8x32xf32> to vector<8x32xf32>
    %cst_113 = arith.constant dense<0.000000e+00> : vector<16x32xf32>
    %155 = tpu.matmul %152, %154, %cst_113 {dimension_numbers = #tpu.dot_dimension_numbers<[1], [0], [0], [1], [0, 0, 1, 1], [], []>} : vector<16x8xf32>, vector<8x32xf32>, vector<16x32xf32> -> vector<16x32xf32>
    %156 = arith.addf %135, %155 : vector<16x32xf32>
    %157 = vector.extract_strided_slice %40 {offsets = [16, 0], sizes = [16, 8], strides = [1, 1]} : vector<32x8xf32> to vector<16x8xf32>
    %158 = vector.extract_strided_slice %52 {offsets = [16, 0], sizes = [16, 8], strides = [1, 1]} : vector<32x8xf32> to vector<16x8xf32>
    %159 = vector.extract_strided_slice %64 {offsets = [16, 0], sizes = [16, 8], strides = [1, 1]} : vector<32x8xf32> to vector<16x8xf32>
    %cst_114 = arith.constant dense<0.000000e+00> : vector<16x16xf32>
    %160 = tpu.matmul %157, %158, %cst_114 {dimension_numbers = #tpu.dot_dimension_numbers<[1], [1], [0], [0], [0, 0, 1, 0], [], []>} : vector<16x8xf32>, vector<16x8xf32>, vector<16x16xf32> -> vector<16x16xf32>
    %cst_115 = arith.constant 0.353553385 : f32
    %161 = vector.broadcast %cst_115 : f32 to vector<16x16xf32>
    %162 = arith.mulf %160, %161 : vector<16x16xf32>
    %cst_116 = arith.constant dense<0xFF800000> : vector<16xf32>
    %163 = vector.multi_reduction <maximumf>, %162, %cst_116 [1] : vector<16x16xf32> to vector<16xf32>
    %164 = vector.shape_cast %163 : vector<16xf32> to vector<16x1xf32>
    %165 = vector.broadcast %164 : vector<16x1xf32> to vector<16x16xf32>
    %166 = arith.subf %162, %165 : vector<16x16xf32>
    %167 = math.exp %166 : vector<16x16xf32>
    %cst_117 = arith.constant dense<0.000000e+00> : vector<16xf32>
    %168 = vector.multi_reduction <add>, %167, %cst_117 [1] : vector<16x16xf32> to vector<16xf32>
    %169 = vector.shape_cast %168 : vector<16xf32> to vector<16x1xf32>
    %170 = tpu.reciprocal %169 {approx = true} : vector<16x1xf32> -> vector<16x1xf32>
    %171 = vector.broadcast %170 : vector<16x1xf32> to vector<16x16xf32>
    %172 = arith.mulf %167, %171 : vector<16x16xf32>
    %cst_118 = arith.constant dense<0.000000e+00> : vector<16x8xf32>
    %173 = tpu.matmul %172, %159, %cst_118 {dimension_numbers = #tpu.dot_dimension_numbers<[1], [0], [0], [1], [0, 0, 1, 1], [], []>} : vector<16x16xf32>, vector<16x8xf32>, vector<16x8xf32> -> vector<16x8xf32>
    %c0_119 = arith.constant 0 : index
    %c0_120 = arith.constant 0 : index
    %c0_121 = arith.constant 0 : index
    %c0_122 = arith.constant 0 : index
    %174 = vector.load %arg9[%c0_119, %c0_120, %c0_121, %c0_122] : memref<2x4x8x32xf32, #tpu.memory_space<vmem>>, vector<1x1x8x32xf32>
    %175 = vector.shape_cast %174 : vector<1x1x8x32xf32> to vector<8x32xf32>
    %cst_123 = arith.constant dense<0.000000e+00> : vector<16x32xf32>
    %176 = tpu.matmul %173, %175, %cst_123 {dimension_numbers = #tpu.dot_dimension_numbers<[1], [0], [0], [1], [0, 0, 1, 1], [], []>} : vector<16x8xf32>, vector<8x32xf32>, vector<16x32xf32> -> vector<16x32xf32>
    %177 = vector.extract_strided_slice %43 {offsets = [16, 0], sizes = [16, 8], strides = [1, 1]} : vector<32x8xf32> to vector<16x8xf32>
    %178 = vector.extract_strided_slice %55 {offsets = [16, 0], sizes = [16, 8], strides = [1, 1]} : vector<32x8xf32> to vector<16x8xf32>
    %179 = vector.extract_strided_slice %67 {offsets = [16, 0], sizes = [16, 8], strides = [1, 1]} : vector<32x8xf32> to vector<16x8xf32>
    %cst_124 = arith.constant dense<0.000000e+00> : vector<16x16xf32>
    %180 = tpu.matmul %177, %178, %cst_124 {dimension_numbers = #tpu.dot_dimension_numbers<[1], [1], [0], [0], [0, 0, 1, 0], [], []>} : vector<16x8xf32>, vector<16x8xf32>, vector<16x16xf32> -> vector<16x16xf32>
    %cst_125 = arith.constant 0.353553385 : f32
    %181 = vector.broadcast %cst_125 : f32 to vector<16x16xf32>
    %182 = arith.mulf %180, %181 : vector<16x16xf32>
    %cst_126 = arith.constant dense<0xFF800000> : vector<16xf32>
    %183 = vector.multi_reduction <maximumf>, %182, %cst_126 [1] : vector<16x16xf32> to vector<16xf32>
    %184 = vector.shape_cast %183 : vector<16xf32> to vector<16x1xf32>
    %185 = vector.broadcast %184 : vector<16x1xf32> to vector<16x16xf32>
    %186 = arith.subf %182, %185 : vector<16x16xf32>
    %187 = math.exp %186 : vector<16x16xf32>
    %cst_127 = arith.constant dense<0.000000e+00> : vector<16xf32>
    %188 = vector.multi_reduction <add>, %187, %cst_127 [1] : vector<16x16xf32> to vector<16xf32>
    %189 = vector.shape_cast %188 : vector<16xf32> to vector<16x1xf32>
    %190 = tpu.reciprocal %189 {approx = true} : vector<16x1xf32> -> vector<16x1xf32>
    %191 = vector.broadcast %190 : vector<16x1xf32> to vector<16x16xf32>
    %192 = arith.mulf %187, %191 : vector<16x16xf32>
    %cst_128 = arith.constant dense<0.000000e+00> : vector<16x8xf32>
    %193 = tpu.matmul %192, %179, %cst_128 {dimension_numbers = #tpu.dot_dimension_numbers<[1], [0], [0], [1], [0, 0, 1, 1], [], []>} : vector<16x16xf32>, vector<16x8xf32>, vector<16x8xf32> -> vector<16x8xf32>
    %c0_129 = arith.constant 0 : index
    %c1_130 = arith.constant 1 : index
    %c0_131 = arith.constant 0 : index
    %c0_132 = arith.constant 0 : index
    %194 = vector.load %arg9[%c0_129, %c1_130, %c0_131, %c0_132] : memref<2x4x8x32xf32, #tpu.memory_space<vmem>>, vector<1x1x8x32xf32>
    %195 = vector.shape_cast %194 : vector<1x1x8x32xf32> to vector<8x32xf32>
    %cst_133 = arith.constant dense<0.000000e+00> : vector<16x32xf32>
    %196 = tpu.matmul %193, %195, %cst_133 {dimension_numbers = #tpu.dot_dimension_numbers<[1], [0], [0], [1], [0, 0, 1, 1], [], []>} : vector<16x8xf32>, vector<8x32xf32>, vector<16x32xf32> -> vector<16x32xf32>
    %197 = arith.addf %176, %196 : vector<16x32xf32>
    %198 = vector.extract_strided_slice %46 {offsets = [16, 0], sizes = [16, 8], strides = [1, 1]} : vector<32x8xf32> to vector<16x8xf32>
    %199 = vector.extract_strided_slice %58 {offsets = [16, 0], sizes = [16, 8], strides = [1, 1]} : vector<32x8xf32> to vector<16x8xf32>
    %200 = vector.extract_strided_slice %70 {offsets = [16, 0], sizes = [16, 8], strides = [1, 1]} : vector<32x8xf32> to vector<16x8xf32>
    %cst_134 = arith.constant dense<0.000000e+00> : vector<16x16xf32>
    %201 = tpu.matmul %198, %199, %cst_134 {dimension_numbers = #tpu.dot_dimension_numbers<[1], [1], [0], [0], [0, 0, 1, 0], [], []>} : vector<16x8xf32>, vector<16x8xf32>, vector<16x16xf32> -> vector<16x16xf32>
    %cst_135 = arith.constant 0.353553385 : f32
    %202 = vector.broadcast %cst_135 : f32 to vector<16x16xf32>
    %203 = arith.mulf %201, %202 : vector<16x16xf32>
    %cst_136 = arith.constant dense<0xFF800000> : vector<16xf32>
    %204 = vector.multi_reduction <maximumf>, %203, %cst_136 [1] : vector<16x16xf32> to vector<16xf32>
    %205 = vector.shape_cast %204 : vector<16xf32> to vector<16x1xf32>
    %206 = vector.broadcast %205 : vector<16x1xf32> to vector<16x16xf32>
    %207 = arith.subf %203, %206 : vector<16x16xf32>
    %208 = math.exp %207 : vector<16x16xf32>
    %cst_137 = arith.constant dense<0.000000e+00> : vector<16xf32>
    %209 = vector.multi_reduction <add>, %208, %cst_137 [1] : vector<16x16xf32> to vector<16xf32>
    %210 = vector.shape_cast %209 : vector<16xf32> to vector<16x1xf32>
    %211 = tpu.reciprocal %210 {approx = true} : vector<16x1xf32> -> vector<16x1xf32>
    %212 = vector.broadcast %211 : vector<16x1xf32> to vector<16x16xf32>
    %213 = arith.mulf %208, %212 : vector<16x16xf32>
    %cst_138 = arith.constant dense<0.000000e+00> : vector<16x8xf32>
    %214 = tpu.matmul %213, %200, %cst_138 {dimension_numbers = #tpu.dot_dimension_numbers<[1], [0], [0], [1], [0, 0, 1, 1], [], []>} : vector<16x16xf32>, vector<16x8xf32>, vector<16x8xf32> -> vector<16x8xf32>
    %c0_139 = arith.constant 0 : index
    %c2_140 = arith.constant 2 : index
    %c0_141 = arith.constant 0 : index
    %c0_142 = arith.constant 0 : index
    %215 = vector.load %arg9[%c0_139, %c2_140, %c0_141, %c0_142] : memref<2x4x8x32xf32, #tpu.memory_space<vmem>>, vector<1x1x8x32xf32>
    %216 = vector.shape_cast %215 : vector<1x1x8x32xf32> to vector<8x32xf32>
    %cst_143 = arith.constant dense<0.000000e+00> : vector<16x32xf32>
    %217 = tpu.matmul %214, %216, %cst_143 {dimension_numbers = #tpu.dot_dimension_numbers<[1], [0], [0], [1], [0, 0, 1, 1], [], []>} : vector<16x8xf32>, vector<8x32xf32>, vector<16x32xf32> -> vector<16x32xf32>
    %218 = arith.addf %197, %217 : vector<16x32xf32>
    %219 = vector.extract_strided_slice %49 {offsets = [16, 0], sizes = [16, 8], strides = [1, 1]} : vector<32x8xf32> to vector<16x8xf32>
    %220 = vector.extract_strided_slice %61 {offsets = [16, 0], sizes = [16, 8], strides = [1, 1]} : vector<32x8xf32> to vector<16x8xf32>
    %221 = vector.extract_strided_slice %73 {offsets = [16, 0], sizes = [16, 8], strides = [1, 1]} : vector<32x8xf32> to vector<16x8xf32>
    %cst_144 = arith.constant dense<0.000000e+00> : vector<16x16xf32>
    %222 = tpu.matmul %219, %220, %cst_144 {dimension_numbers = #tpu.dot_dimension_numbers<[1], [1], [0], [0], [0, 0, 1, 0], [], []>} : vector<16x8xf32>, vector<16x8xf32>, vector<16x16xf32> -> vector<16x16xf32>
    %cst_145 = arith.constant 0.353553385 : f32
    %223 = vector.broadcast %cst_145 : f32 to vector<16x16xf32>
    %224 = arith.mulf %222, %223 : vector<16x16xf32>
    %cst_146 = arith.constant dense<0xFF800000> : vector<16xf32>
    %225 = vector.multi_reduction <maximumf>, %224, %cst_146 [1] : vector<16x16xf32> to vector<16xf32>
    %226 = vector.shape_cast %225 : vector<16xf32> to vector<16x1xf32>
    %227 = vector.broadcast %226 : vector<16x1xf32> to vector<16x16xf32>
    %228 = arith.subf %224, %227 : vector<16x16xf32>
    %229 = math.exp %228 : vector<16x16xf32>
    %cst_147 = arith.constant dense<0.000000e+00> : vector<16xf32>
    %230 = vector.multi_reduction <add>, %229, %cst_147 [1] : vector<16x16xf32> to vector<16xf32>
    %231 = vector.shape_cast %230 : vector<16xf32> to vector<16x1xf32>
    %232 = tpu.reciprocal %231 {approx = true} : vector<16x1xf32> -> vector<16x1xf32>
    %233 = vector.broadcast %232 : vector<16x1xf32> to vector<16x16xf32>
    %234 = arith.mulf %229, %233 : vector<16x16xf32>
    %cst_148 = arith.constant dense<0.000000e+00> : vector<16x8xf32>
    %235 = tpu.matmul %234, %221, %cst_148 {dimension_numbers = #tpu.dot_dimension_numbers<[1], [0], [0], [1], [0, 0, 1, 1], [], []>} : vector<16x16xf32>, vector<16x8xf32>, vector<16x8xf32> -> vector<16x8xf32>
    %c0_149 = arith.constant 0 : index
    %c3_150 = arith.constant 3 : index
    %c0_151 = arith.constant 0 : index
    %c0_152 = arith.constant 0 : index
    %236 = vector.load %arg9[%c0_149, %c3_150, %c0_151, %c0_152] : memref<2x4x8x32xf32, #tpu.memory_space<vmem>>, vector<1x1x8x32xf32>
    %237 = vector.shape_cast %236 : vector<1x1x8x32xf32> to vector<8x32xf32>
    %cst_153 = arith.constant dense<0.000000e+00> : vector<16x32xf32>
    %238 = tpu.matmul %235, %237, %cst_153 {dimension_numbers = #tpu.dot_dimension_numbers<[1], [0], [0], [1], [0, 0, 1, 1], [], []>} : vector<16x8xf32>, vector<8x32xf32>, vector<16x32xf32> -> vector<16x32xf32>
    %239 = arith.addf %218, %238 : vector<16x32xf32>
    %240 = tpu.concatenate %156, %239 in 0 : vector<16x32xf32>, vector<16x32xf32> -> vector<32x32xf32>
    %c0_154 = arith.constant 0 : index
    %c0_155 = arith.constant 0 : index
    %c0_156 = arith.constant 0 : index
    %241 = vector.load %arg10[%c0_154, %c0_155, %c0_156] : memref<2x1x32xf32, #tpu.memory_space<vmem>>, vector<1x1x32xf32>
    %242 = vector.shape_cast %241 : vector<1x1x32xf32> to vector<1x32xf32>
    %243 = vector.broadcast %242 : vector<1x32xf32> to vector<32x32xf32>
    %244 = arith.addf %240, %243 : vector<32x32xf32>
    %245 = arith.addf %11, %244 : vector<32x32xf32>
    %c0_157 = arith.constant 0 : index
    %c0_158 = arith.constant 0 : index
    %c0_159 = arith.constant 0 : index
    %246 = vector.load %arg11[%c0_157, %c0_158, %c0_159] : memref<2x1x32xf32, #tpu.memory_space<vmem>>, vector<1x1x32xf32>
    %247 = vector.shape_cast %246 : vector<1x1x32xf32> to vector<1x32xf32>
    %c0_160 = arith.constant 0 : index
    %c0_161 = arith.constant 0 : index
    %c0_162 = arith.constant 0 : index
    %248 = vector.load %arg12[%c0_160, %c0_161, %c0_162] : memref<2x1x32xf32, #tpu.memory_space<vmem>>, vector<1x1x32xf32>
    %249 = vector.shape_cast %248 : vector<1x1x32xf32> to vector<1x32xf32>
    %cst_163 = arith.constant dense<0.000000e+00> : vector<32xf32>
    %250 = vector.multi_reduction <add>, %245, %cst_163 [1] : vector<32x32xf32> to vector<32xf32>
    %251 = vector.shape_cast %250 : vector<32xf32> to vector<32x1xf32>
    %cst_164 = arith.constant 3.200000e+01 : f32
    %252 = vector.broadcast %cst_164 : f32 to vector<32x1xf32>
    %253 = arith.divf %251, %252 : vector<32x1xf32>
    %254 = vector.broadcast %253 : vector<32x1xf32> to vector<32x32xf32>
    %255 = arith.subf %245, %254 : vector<32x32xf32>
    %256 = arith.mulf %255, %255 : vector<32x32xf32>
    %cst_165 = arith.constant dense<0.000000e+00> : vector<32xf32>
    %257 = vector.multi_reduction <add>, %256, %cst_165 [1] : vector<32x32xf32> to vector<32xf32>
    %258 = vector.shape_cast %257 : vector<32xf32> to vector<32x1xf32>
    %cst_166 = arith.constant 3.200000e+01 : f32
    %259 = vector.broadcast %cst_166 : f32 to vector<32x1xf32>
    %260 = arith.divf %258, %259 : vector<32x1xf32>
    %261 = vector.broadcast %253 : vector<32x1xf32> to vector<32x32xf32>
    %262 = arith.subf %245, %261 : vector<32x32xf32>
    %cst_167 = arith.constant 9.99999974E-6 : f32
    %263 = vector.broadcast %cst_167 : f32 to vector<32x1xf32>
    %264 = arith.addf %260, %263 : vector<32x1xf32>
    %265 = math.rsqrt %264 : vector<32x1xf32>
    %266 = vector.broadcast %265 : vector<32x1xf32> to vector<32x32xf32>
    %267 = arith.mulf %262, %266 : vector<32x32xf32>
    %268 = vector.broadcast %247 : vector<1x32xf32> to vector<32x32xf32>
    %269 = arith.mulf %267, %268 : vector<32x32xf32>
    %270 = vector.broadcast %249 : vector<1x32xf32> to vector<32x32xf32>
    %271 = arith.addf %269, %270 : vector<32x32xf32>
    %c0_168 = arith.constant 0 : index
    %c0_169 = arith.constant 0 : index
    %c0_170 = arith.constant 0 : index
    %272 = vector.load %arg13[%c0_168, %c0_169, %c0_170] : memref<2x32x128xf32, #tpu.memory_space<vmem>>, vector<1x32x128xf32>
    %273 = vector.shape_cast %272 : vector<1x32x128xf32> to vector<32x128xf32>
    %cst_171 = arith.constant dense<0.000000e+00> : vector<32x128xf32>
    %274 = tpu.matmul %271, %273, %cst_171 {dimension_numbers = #tpu.dot_dimension_numbers<[1], [0], [0], [1], [0, 0, 1, 1], [], []>} : vector<32x32xf32>, vector<32x128xf32>, vector<32x128xf32> -> vector<32x128xf32>
    %c0_172 = arith.constant 0 : index
    %c0_173 = arith.constant 0 : index
    %c0_174 = arith.constant 0 : index
    %275 = vector.load %arg14[%c0_172, %c0_173, %c0_174] : memref<2x1x128xf32, #tpu.memory_space<vmem>>, vector<1x1x128xf32>
    %276 = vector.shape_cast %275 : vector<1x1x128xf32> to vector<1x128xf32>
    %277 = vector.broadcast %276 : vector<1x128xf32> to vector<32x128xf32>
    %278 = arith.addf %274, %277 : vector<32x128xf32>
    %cst_175 = arith.constant 0.000000e+00 : f32
    %279 = vector.broadcast %cst_175 : f32 to vector<32x128xf32>
    %280 = arith.maximumf %278, %279 : vector<32x128xf32>
    %c0_176 = arith.constant 0 : index
    %c0_177 = arith.constant 0 : index
    %c0_178 = arith.constant 0 : index
    %281 = vector.load %arg15[%c0_176, %c0_177, %c0_178] : memref<2x128x32xf32, #tpu.memory_space<vmem>>, vector<1x128x32xf32>
    %282 = vector.shape_cast %281 : vector<1x128x32xf32> to vector<128x32xf32>
    %cst_179 = arith.constant dense<0.000000e+00> : vector<32x32xf32>
    %283 = tpu.matmul %280, %282, %cst_179 {dimension_numbers = #tpu.dot_dimension_numbers<[1], [0], [0], [1], [0, 0, 1, 1], [], []>} : vector<32x128xf32>, vector<128x32xf32>, vector<32x32xf32> -> vector<32x32xf32>
    %284 = arith.addf %271, %283 : vector<32x32xf32>
    %c0_180 = arith.constant 0 : index
    %c0_181 = arith.constant 0 : index
    %c0_182 = arith.constant 0 : index
    %285 = vector.load %arg16[%c0_180, %c0_181, %c0_182] : memref<2x1x32xf32, #tpu.memory_space<vmem>>, vector<1x1x32xf32>
    %286 = vector.shape_cast %285 : vector<1x1x32xf32> to vector<1x32xf32>
    %287 = vector.broadcast %286 : vector<1x32xf32> to vector<32x32xf32>
    %288 = arith.addf %284, %287 : vector<32x32xf32>
    %c1_183 = arith.constant 1 : index
    %c0_184 = arith.constant 0 : index
    %c0_185 = arith.constant 0 : index
    %289 = vector.load %arg4[%c1_183, %c0_184, %c0_185] : memref<2x1x32xf32, #tpu.memory_space<vmem>>, vector<1x1x32xf32>
    %290 = vector.shape_cast %289 : vector<1x1x32xf32> to vector<1x32xf32>
    %c1_186 = arith.constant 1 : index
    %c0_187 = arith.constant 0 : index
    %c0_188 = arith.constant 0 : index
    %291 = vector.load %arg5[%c1_186, %c0_187, %c0_188] : memref<2x1x32xf32, #tpu.memory_space<vmem>>, vector<1x1x32xf32>
    %292 = vector.shape_cast %291 : vector<1x1x32xf32> to vector<1x32xf32>
    %cst_189 = arith.constant dense<0.000000e+00> : vector<32xf32>
    %293 = vector.multi_reduction <add>, %288, %cst_189 [1] : vector<32x32xf32> to vector<32xf32>
    %294 = vector.shape_cast %293 : vector<32xf32> to vector<32x1xf32>
    %cst_190 = arith.constant 3.200000e+01 : f32
    %295 = vector.broadcast %cst_190 : f32 to vector<32x1xf32>
    %296 = arith.divf %294, %295 : vector<32x1xf32>
    %297 = vector.broadcast %296 : vector<32x1xf32> to vector<32x32xf32>
    %298 = arith.subf %288, %297 : vector<32x32xf32>
    %299 = arith.mulf %298, %298 : vector<32x32xf32>
    %cst_191 = arith.constant dense<0.000000e+00> : vector<32xf32>
    %300 = vector.multi_reduction <add>, %299, %cst_191 [1] : vector<32x32xf32> to vector<32xf32>
    %301 = vector.shape_cast %300 : vector<32xf32> to vector<32x1xf32>
    %cst_192 = arith.constant 3.200000e+01 : f32
    %302 = vector.broadcast %cst_192 : f32 to vector<32x1xf32>
    %303 = arith.divf %301, %302 : vector<32x1xf32>
    %304 = vector.broadcast %296 : vector<32x1xf32> to vector<32x32xf32>
    %305 = arith.subf %288, %304 : vector<32x32xf32>
    %cst_193 = arith.constant 9.99999974E-6 : f32
    %306 = vector.broadcast %cst_193 : f32 to vector<32x1xf32>
    %307 = arith.addf %303, %306 : vector<32x1xf32>
    %308 = math.rsqrt %307 : vector<32x1xf32>
    %309 = vector.broadcast %308 : vector<32x1xf32> to vector<32x32xf32>
    %310 = arith.mulf %305, %309 : vector<32x32xf32>
    %311 = vector.broadcast %290 : vector<1x32xf32> to vector<32x32xf32>
    %312 = arith.mulf %310, %311 : vector<32x32xf32>
    %313 = vector.broadcast %292 : vector<1x32xf32> to vector<32x32xf32>
    %314 = arith.addf %312, %313 : vector<32x32xf32>
    %c1_194 = arith.constant 1 : index
    %c0_195 = arith.constant 0 : index
    %c0_196 = arith.constant 0 : index
    %c0_197 = arith.constant 0 : index
    %315 = vector.load %arg6[%c1_194, %c0_195, %c0_196, %c0_197] : memref<2x4x32x8xf32, #tpu.memory_space<vmem>>, vector<1x1x32x8xf32>
    %316 = vector.shape_cast %315 : vector<1x1x32x8xf32> to vector<32x8xf32>
    %cst_198 = arith.constant dense<0.000000e+00> : vector<32x8xf32>
    %317 = tpu.matmul %314, %316, %cst_198 {dimension_numbers = #tpu.dot_dimension_numbers<[1], [0], [0], [1], [0, 0, 1, 1], [], []>} : vector<32x32xf32>, vector<32x8xf32>, vector<32x8xf32> -> vector<32x8xf32>
    %c1_199 = arith.constant 1 : index
    %c1_200 = arith.constant 1 : index
    %c0_201 = arith.constant 0 : index
    %c0_202 = arith.constant 0 : index
    %318 = vector.load %arg6[%c1_199, %c1_200, %c0_201, %c0_202] : memref<2x4x32x8xf32, #tpu.memory_space<vmem>>, vector<1x1x32x8xf32>
    %319 = vector.shape_cast %318 : vector<1x1x32x8xf32> to vector<32x8xf32>
    %cst_203 = arith.constant dense<0.000000e+00> : vector<32x8xf32>
    %320 = tpu.matmul %314, %319, %cst_203 {dimension_numbers = #tpu.dot_dimension_numbers<[1], [0], [0], [1], [0, 0, 1, 1], [], []>} : vector<32x32xf32>, vector<32x8xf32>, vector<32x8xf32> -> vector<32x8xf32>
    %c1_204 = arith.constant 1 : index
    %c2_205 = arith.constant 2 : index
    %c0_206 = arith.constant 0 : index
    %c0_207 = arith.constant 0 : index
    %321 = vector.load %arg6[%c1_204, %c2_205, %c0_206, %c0_207] : memref<2x4x32x8xf32, #tpu.memory_space<vmem>>, vector<1x1x32x8xf32>
    %322 = vector.shape_cast %321 : vector<1x1x32x8xf32> to vector<32x8xf32>
    %cst_208 = arith.constant dense<0.000000e+00> : vector<32x8xf32>
    %323 = tpu.matmul %314, %322, %cst_208 {dimension_numbers = #tpu.dot_dimension_numbers<[1], [0], [0], [1], [0, 0, 1, 1], [], []>} : vector<32x32xf32>, vector<32x8xf32>, vector<32x8xf32> -> vector<32x8xf32>
    %c1_209 = arith.constant 1 : index
    %c3_210 = arith.constant 3 : index
    %c0_211 = arith.constant 0 : index
    %c0_212 = arith.constant 0 : index
    %324 = vector.load %arg6[%c1_209, %c3_210, %c0_211, %c0_212] : memref<2x4x32x8xf32, #tpu.memory_space<vmem>>, vector<1x1x32x8xf32>
    %325 = vector.shape_cast %324 : vector<1x1x32x8xf32> to vector<32x8xf32>
    %cst_213 = arith.constant dense<0.000000e+00> : vector<32x8xf32>
    %326 = tpu.matmul %314, %325, %cst_213 {dimension_numbers = #tpu.dot_dimension_numbers<[1], [0], [0], [1], [0, 0, 1, 1], [], []>} : vector<32x32xf32>, vector<32x8xf32>, vector<32x8xf32> -> vector<32x8xf32>
    %c1_214 = arith.constant 1 : index
    %c0_215 = arith.constant 0 : index
    %c0_216 = arith.constant 0 : index
    %c0_217 = arith.constant 0 : index
    %327 = vector.load %arg7[%c1_214, %c0_215, %c0_216, %c0_217] : memref<2x4x32x8xf32, #tpu.memory_space<vmem>>, vector<1x1x32x8xf32>
    %328 = vector.shape_cast %327 : vector<1x1x32x8xf32> to vector<32x8xf32>
    %cst_218 = arith.constant dense<0.000000e+00> : vector<32x8xf32>
    %329 = tpu.matmul %314, %328, %cst_218 {dimension_numbers = #tpu.dot_dimension_numbers<[1], [0], [0], [1], [0, 0, 1, 1], [], []>} : vector<32x32xf32>, vector<32x8xf32>, vector<32x8xf32> -> vector<32x8xf32>
    %c1_219 = arith.constant 1 : index
    %c1_220 = arith.constant 1 : index
    %c0_221 = arith.constant 0 : index
    %c0_222 = arith.constant 0 : index
    %330 = vector.load %arg7[%c1_219, %c1_220, %c0_221, %c0_222] : memref<2x4x32x8xf32, #tpu.memory_space<vmem>>, vector<1x1x32x8xf32>
    %331 = vector.shape_cast %330 : vector<1x1x32x8xf32> to vector<32x8xf32>
    %cst_223 = arith.constant dense<0.000000e+00> : vector<32x8xf32>
    %332 = tpu.matmul %314, %331, %cst_223 {dimension_numbers = #tpu.dot_dimension_numbers<[1], [0], [0], [1], [0, 0, 1, 1], [], []>} : vector<32x32xf32>, vector<32x8xf32>, vector<32x8xf32> -> vector<32x8xf32>
    %c1_224 = arith.constant 1 : index
    %c2_225 = arith.constant 2 : index
    %c0_226 = arith.constant 0 : index
    %c0_227 = arith.constant 0 : index
    %333 = vector.load %arg7[%c1_224, %c2_225, %c0_226, %c0_227] : memref<2x4x32x8xf32, #tpu.memory_space<vmem>>, vector<1x1x32x8xf32>
    %334 = vector.shape_cast %333 : vector<1x1x32x8xf32> to vector<32x8xf32>
    %cst_228 = arith.constant dense<0.000000e+00> : vector<32x8xf32>
    %335 = tpu.matmul %314, %334, %cst_228 {dimension_numbers = #tpu.dot_dimension_numbers<[1], [0], [0], [1], [0, 0, 1, 1], [], []>} : vector<32x32xf32>, vector<32x8xf32>, vector<32x8xf32> -> vector<32x8xf32>
    %c1_229 = arith.constant 1 : index
    %c3_230 = arith.constant 3 : index
    %c0_231 = arith.constant 0 : index
    %c0_232 = arith.constant 0 : index
    %336 = vector.load %arg7[%c1_229, %c3_230, %c0_231, %c0_232] : memref<2x4x32x8xf32, #tpu.memory_space<vmem>>, vector<1x1x32x8xf32>
    %337 = vector.shape_cast %336 : vector<1x1x32x8xf32> to vector<32x8xf32>
    %cst_233 = arith.constant dense<0.000000e+00> : vector<32x8xf32>
    %338 = tpu.matmul %314, %337, %cst_233 {dimension_numbers = #tpu.dot_dimension_numbers<[1], [0], [0], [1], [0, 0, 1, 1], [], []>} : vector<32x32xf32>, vector<32x8xf32>, vector<32x8xf32> -> vector<32x8xf32>
    %c1_234 = arith.constant 1 : index
    %c0_235 = arith.constant 0 : index
    %c0_236 = arith.constant 0 : index
    %c0_237 = arith.constant 0 : index
    %339 = vector.load %arg8[%c1_234, %c0_235, %c0_236, %c0_237] : memref<2x4x32x8xf32, #tpu.memory_space<vmem>>, vector<1x1x32x8xf32>
    %340 = vector.shape_cast %339 : vector<1x1x32x8xf32> to vector<32x8xf32>
    %cst_238 = arith.constant dense<0.000000e+00> : vector<32x8xf32>
    %341 = tpu.matmul %314, %340, %cst_238 {dimension_numbers = #tpu.dot_dimension_numbers<[1], [0], [0], [1], [0, 0, 1, 1], [], []>} : vector<32x32xf32>, vector<32x8xf32>, vector<32x8xf32> -> vector<32x8xf32>
    %c1_239 = arith.constant 1 : index
    %c1_240 = arith.constant 1 : index
    %c0_241 = arith.constant 0 : index
    %c0_242 = arith.constant 0 : index
    %342 = vector.load %arg8[%c1_239, %c1_240, %c0_241, %c0_242] : memref<2x4x32x8xf32, #tpu.memory_space<vmem>>, vector<1x1x32x8xf32>
    %343 = vector.shape_cast %342 : vector<1x1x32x8xf32> to vector<32x8xf32>
    %cst_243 = arith.constant dense<0.000000e+00> : vector<32x8xf32>
    %344 = tpu.matmul %314, %343, %cst_243 {dimension_numbers = #tpu.dot_dimension_numbers<[1], [0], [0], [1], [0, 0, 1, 1], [], []>} : vector<32x32xf32>, vector<32x8xf32>, vector<32x8xf32> -> vector<32x8xf32>
    %c1_244 = arith.constant 1 : index
    %c2_245 = arith.constant 2 : index
    %c0_246 = arith.constant 0 : index
    %c0_247 = arith.constant 0 : index
    %345 = vector.load %arg8[%c1_244, %c2_245, %c0_246, %c0_247] : memref<2x4x32x8xf32, #tpu.memory_space<vmem>>, vector<1x1x32x8xf32>
    %346 = vector.shape_cast %345 : vector<1x1x32x8xf32> to vector<32x8xf32>
    %cst_248 = arith.constant dense<0.000000e+00> : vector<32x8xf32>
    %347 = tpu.matmul %314, %346, %cst_248 {dimension_numbers = #tpu.dot_dimension_numbers<[1], [0], [0], [1], [0, 0, 1, 1], [], []>} : vector<32x32xf32>, vector<32x8xf32>, vector<32x8xf32> -> vector<32x8xf32>
    %c1_249 = arith.constant 1 : index
    %c3_250 = arith.constant 3 : index
    %c0_251 = arith.constant 0 : index
    %c0_252 = arith.constant 0 : index
    %348 = vector.load %arg8[%c1_249, %c3_250, %c0_251, %c0_252] : memref<2x4x32x8xf32, #tpu.memory_space<vmem>>, vector<1x1x32x8xf32>
    %349 = vector.shape_cast %348 : vector<1x1x32x8xf32> to vector<32x8xf32>
    %cst_253 = arith.constant dense<0.000000e+00> : vector<32x8xf32>
    %350 = tpu.matmul %314, %349, %cst_253 {dimension_numbers = #tpu.dot_dimension_numbers<[1], [0], [0], [1], [0, 0, 1, 1], [], []>} : vector<32x32xf32>, vector<32x8xf32>, vector<32x8xf32> -> vector<32x8xf32>
    %351 = vector.extract_strided_slice %317 {offsets = [0, 0], sizes = [16, 8], strides = [1, 1]} : vector<32x8xf32> to vector<16x8xf32>
    %352 = vector.extract_strided_slice %329 {offsets = [0, 0], sizes = [16, 8], strides = [1, 1]} : vector<32x8xf32> to vector<16x8xf32>
    %353 = vector.extract_strided_slice %341 {offsets = [0, 0], sizes = [16, 8], strides = [1, 1]} : vector<32x8xf32> to vector<16x8xf32>
    %cst_254 = arith.constant dense<0.000000e+00> : vector<16x16xf32>
    %354 = tpu.matmul %351, %352, %cst_254 {dimension_numbers = #tpu.dot_dimension_numbers<[1], [1], [0], [0], [0, 0, 1, 0], [], []>} : vector<16x8xf32>, vector<16x8xf32>, vector<16x16xf32> -> vector<16x16xf32>
    %cst_255 = arith.constant 0.353553385 : f32
    %355 = vector.broadcast %cst_255 : f32 to vector<16x16xf32>
    %356 = arith.mulf %354, %355 : vector<16x16xf32>
    %cst_256 = arith.constant dense<0xFF800000> : vector<16xf32>
    %357 = vector.multi_reduction <maximumf>, %356, %cst_256 [1] : vector<16x16xf32> to vector<16xf32>
    %358 = vector.shape_cast %357 : vector<16xf32> to vector<16x1xf32>
    %359 = vector.broadcast %358 : vector<16x1xf32> to vector<16x16xf32>
    %360 = arith.subf %356, %359 : vector<16x16xf32>
    %361 = math.exp %360 : vector<16x16xf32>
    %cst_257 = arith.constant dense<0.000000e+00> : vector<16xf32>
    %362 = vector.multi_reduction <add>, %361, %cst_257 [1] : vector<16x16xf32> to vector<16xf32>
    %363 = vector.shape_cast %362 : vector<16xf32> to vector<16x1xf32>
    %364 = tpu.reciprocal %363 {approx = true} : vector<16x1xf32> -> vector<16x1xf32>
    %365 = vector.broadcast %364 : vector<16x1xf32> to vector<16x16xf32>
    %366 = arith.mulf %361, %365 : vector<16x16xf32>
    %cst_258 = arith.constant dense<0.000000e+00> : vector<16x8xf32>
    %367 = tpu.matmul %366, %353, %cst_258 {dimension_numbers = #tpu.dot_dimension_numbers<[1], [0], [0], [1], [0, 0, 1, 1], [], []>} : vector<16x16xf32>, vector<16x8xf32>, vector<16x8xf32> -> vector<16x8xf32>
    %c1_259 = arith.constant 1 : index
    %c0_260 = arith.constant 0 : index
    %c0_261 = arith.constant 0 : index
    %c0_262 = arith.constant 0 : index
    %368 = vector.load %arg9[%c1_259, %c0_260, %c0_261, %c0_262] : memref<2x4x8x32xf32, #tpu.memory_space<vmem>>, vector<1x1x8x32xf32>
    %369 = vector.shape_cast %368 : vector<1x1x8x32xf32> to vector<8x32xf32>
    %cst_263 = arith.constant dense<0.000000e+00> : vector<16x32xf32>
    %370 = tpu.matmul %367, %369, %cst_263 {dimension_numbers = #tpu.dot_dimension_numbers<[1], [0], [0], [1], [0, 0, 1, 1], [], []>} : vector<16x8xf32>, vector<8x32xf32>, vector<16x32xf32> -> vector<16x32xf32>
    %371 = vector.extract_strided_slice %320 {offsets = [0, 0], sizes = [16, 8], strides = [1, 1]} : vector<32x8xf32> to vector<16x8xf32>
    %372 = vector.extract_strided_slice %332 {offsets = [0, 0], sizes = [16, 8], strides = [1, 1]} : vector<32x8xf32> to vector<16x8xf32>
    %373 = vector.extract_strided_slice %344 {offsets = [0, 0], sizes = [16, 8], strides = [1, 1]} : vector<32x8xf32> to vector<16x8xf32>
    %cst_264 = arith.constant dense<0.000000e+00> : vector<16x16xf32>
    %374 = tpu.matmul %371, %372, %cst_264 {dimension_numbers = #tpu.dot_dimension_numbers<[1], [1], [0], [0], [0, 0, 1, 0], [], []>} : vector<16x8xf32>, vector<16x8xf32>, vector<16x16xf32> -> vector<16x16xf32>
    %cst_265 = arith.constant 0.353553385 : f32
    %375 = vector.broadcast %cst_265 : f32 to vector<16x16xf32>
    %376 = arith.mulf %374, %375 : vector<16x16xf32>
    %cst_266 = arith.constant dense<0xFF800000> : vector<16xf32>
    %377 = vector.multi_reduction <maximumf>, %376, %cst_266 [1] : vector<16x16xf32> to vector<16xf32>
    %378 = vector.shape_cast %377 : vector<16xf32> to vector<16x1xf32>
    %379 = vector.broadcast %378 : vector<16x1xf32> to vector<16x16xf32>
    %380 = arith.subf %376, %379 : vector<16x16xf32>
    %381 = math.exp %380 : vector<16x16xf32>
    %cst_267 = arith.constant dense<0.000000e+00> : vector<16xf32>
    %382 = vector.multi_reduction <add>, %381, %cst_267 [1] : vector<16x16xf32> to vector<16xf32>
    %383 = vector.shape_cast %382 : vector<16xf32> to vector<16x1xf32>
    %384 = tpu.reciprocal %383 {approx = true} : vector<16x1xf32> -> vector<16x1xf32>
    %385 = vector.broadcast %384 : vector<16x1xf32> to vector<16x16xf32>
    %386 = arith.mulf %381, %385 : vector<16x16xf32>
    %cst_268 = arith.constant dense<0.000000e+00> : vector<16x8xf32>
    %387 = tpu.matmul %386, %373, %cst_268 {dimension_numbers = #tpu.dot_dimension_numbers<[1], [0], [0], [1], [0, 0, 1, 1], [], []>} : vector<16x16xf32>, vector<16x8xf32>, vector<16x8xf32> -> vector<16x8xf32>
    %c1_269 = arith.constant 1 : index
    %c1_270 = arith.constant 1 : index
    %c0_271 = arith.constant 0 : index
    %c0_272 = arith.constant 0 : index
    %388 = vector.load %arg9[%c1_269, %c1_270, %c0_271, %c0_272] : memref<2x4x8x32xf32, #tpu.memory_space<vmem>>, vector<1x1x8x32xf32>
    %389 = vector.shape_cast %388 : vector<1x1x8x32xf32> to vector<8x32xf32>
    %cst_273 = arith.constant dense<0.000000e+00> : vector<16x32xf32>
    %390 = tpu.matmul %387, %389, %cst_273 {dimension_numbers = #tpu.dot_dimension_numbers<[1], [0], [0], [1], [0, 0, 1, 1], [], []>} : vector<16x8xf32>, vector<8x32xf32>, vector<16x32xf32> -> vector<16x32xf32>
    %391 = arith.addf %370, %390 : vector<16x32xf32>
    %392 = vector.extract_strided_slice %323 {offsets = [0, 0], sizes = [16, 8], strides = [1, 1]} : vector<32x8xf32> to vector<16x8xf32>
    %393 = vector.extract_strided_slice %335 {offsets = [0, 0], sizes = [16, 8], strides = [1, 1]} : vector<32x8xf32> to vector<16x8xf32>
    %394 = vector.extract_strided_slice %347 {offsets = [0, 0], sizes = [16, 8], strides = [1, 1]} : vector<32x8xf32> to vector<16x8xf32>
    %cst_274 = arith.constant dense<0.000000e+00> : vector<16x16xf32>
    %395 = tpu.matmul %392, %393, %cst_274 {dimension_numbers = #tpu.dot_dimension_numbers<[1], [1], [0], [0], [0, 0, 1, 0], [], []>} : vector<16x8xf32>, vector<16x8xf32>, vector<16x16xf32> -> vector<16x16xf32>
    %cst_275 = arith.constant 0.353553385 : f32
    %396 = vector.broadcast %cst_275 : f32 to vector<16x16xf32>
    %397 = arith.mulf %395, %396 : vector<16x16xf32>
    %cst_276 = arith.constant dense<0xFF800000> : vector<16xf32>
    %398 = vector.multi_reduction <maximumf>, %397, %cst_276 [1] : vector<16x16xf32> to vector<16xf32>
    %399 = vector.shape_cast %398 : vector<16xf32> to vector<16x1xf32>
    %400 = vector.broadcast %399 : vector<16x1xf32> to vector<16x16xf32>
    %401 = arith.subf %397, %400 : vector<16x16xf32>
    %402 = math.exp %401 : vector<16x16xf32>
    %cst_277 = arith.constant dense<0.000000e+00> : vector<16xf32>
    %403 = vector.multi_reduction <add>, %402, %cst_277 [1] : vector<16x16xf32> to vector<16xf32>
    %404 = vector.shape_cast %403 : vector<16xf32> to vector<16x1xf32>
    %405 = tpu.reciprocal %404 {approx = true} : vector<16x1xf32> -> vector<16x1xf32>
    %406 = vector.broadcast %405 : vector<16x1xf32> to vector<16x16xf32>
    %407 = arith.mulf %402, %406 : vector<16x16xf32>
    %cst_278 = arith.constant dense<0.000000e+00> : vector<16x8xf32>
    %408 = tpu.matmul %407, %394, %cst_278 {dimension_numbers = #tpu.dot_dimension_numbers<[1], [0], [0], [1], [0, 0, 1, 1], [], []>} : vector<16x16xf32>, vector<16x8xf32>, vector<16x8xf32> -> vector<16x8xf32>
    %c1_279 = arith.constant 1 : index
    %c2_280 = arith.constant 2 : index
    %c0_281 = arith.constant 0 : index
    %c0_282 = arith.constant 0 : index
    %409 = vector.load %arg9[%c1_279, %c2_280, %c0_281, %c0_282] : memref<2x4x8x32xf32, #tpu.memory_space<vmem>>, vector<1x1x8x32xf32>
    %410 = vector.shape_cast %409 : vector<1x1x8x32xf32> to vector<8x32xf32>
    %cst_283 = arith.constant dense<0.000000e+00> : vector<16x32xf32>
    %411 = tpu.matmul %408, %410, %cst_283 {dimension_numbers = #tpu.dot_dimension_numbers<[1], [0], [0], [1], [0, 0, 1, 1], [], []>} : vector<16x8xf32>, vector<8x32xf32>, vector<16x32xf32> -> vector<16x32xf32>
    %412 = arith.addf %391, %411 : vector<16x32xf32>
    %413 = vector.extract_strided_slice %326 {offsets = [0, 0], sizes = [16, 8], strides = [1, 1]} : vector<32x8xf32> to vector<16x8xf32>
    %414 = vector.extract_strided_slice %338 {offsets = [0, 0], sizes = [16, 8], strides = [1, 1]} : vector<32x8xf32> to vector<16x8xf32>
    %415 = vector.extract_strided_slice %350 {offsets = [0, 0], sizes = [16, 8], strides = [1, 1]} : vector<32x8xf32> to vector<16x8xf32>
    %cst_284 = arith.constant dense<0.000000e+00> : vector<16x16xf32>
    %416 = tpu.matmul %413, %414, %cst_284 {dimension_numbers = #tpu.dot_dimension_numbers<[1], [1], [0], [0], [0, 0, 1, 0], [], []>} : vector<16x8xf32>, vector<16x8xf32>, vector<16x16xf32> -> vector<16x16xf32>
    %cst_285 = arith.constant 0.353553385 : f32
    %417 = vector.broadcast %cst_285 : f32 to vector<16x16xf32>
    %418 = arith.mulf %416, %417 : vector<16x16xf32>
    %cst_286 = arith.constant dense<0xFF800000> : vector<16xf32>
    %419 = vector.multi_reduction <maximumf>, %418, %cst_286 [1] : vector<16x16xf32> to vector<16xf32>
    %420 = vector.shape_cast %419 : vector<16xf32> to vector<16x1xf32>
    %421 = vector.broadcast %420 : vector<16x1xf32> to vector<16x16xf32>
    %422 = arith.subf %418, %421 : vector<16x16xf32>
    %423 = math.exp %422 : vector<16x16xf32>
    %cst_287 = arith.constant dense<0.000000e+00> : vector<16xf32>
    %424 = vector.multi_reduction <add>, %423, %cst_287 [1] : vector<16x16xf32> to vector<16xf32>
    %425 = vector.shape_cast %424 : vector<16xf32> to vector<16x1xf32>
    %426 = tpu.reciprocal %425 {approx = true} : vector<16x1xf32> -> vector<16x1xf32>
    %427 = vector.broadcast %426 : vector<16x1xf32> to vector<16x16xf32>
    %428 = arith.mulf %423, %427 : vector<16x16xf32>
    %cst_288 = arith.constant dense<0.000000e+00> : vector<16x8xf32>
    %429 = tpu.matmul %428, %415, %cst_288 {dimension_numbers = #tpu.dot_dimension_numbers<[1], [0], [0], [1], [0, 0, 1, 1], [], []>} : vector<16x16xf32>, vector<16x8xf32>, vector<16x8xf32> -> vector<16x8xf32>
    %c1_289 = arith.constant 1 : index
    %c3_290 = arith.constant 3 : index
    %c0_291 = arith.constant 0 : index
    %c0_292 = arith.constant 0 : index
    %430 = vector.load %arg9[%c1_289, %c3_290, %c0_291, %c0_292] : memref<2x4x8x32xf32, #tpu.memory_space<vmem>>, vector<1x1x8x32xf32>
    %431 = vector.shape_cast %430 : vector<1x1x8x32xf32> to vector<8x32xf32>
    %cst_293 = arith.constant dense<0.000000e+00> : vector<16x32xf32>
    %432 = tpu.matmul %429, %431, %cst_293 {dimension_numbers = #tpu.dot_dimension_numbers<[1], [0], [0], [1], [0, 0, 1, 1], [], []>} : vector<16x8xf32>, vector<8x32xf32>, vector<16x32xf32> -> vector<16x32xf32>
    %433 = arith.addf %412, %432 : vector<16x32xf32>
    %434 = vector.extract_strided_slice %317 {offsets = [16, 0], sizes = [16, 8], strides = [1, 1]} : vector<32x8xf32> to vector<16x8xf32>
    %435 = vector.extract_strided_slice %329 {offsets = [16, 0], sizes = [16, 8], strides = [1, 1]} : vector<32x8xf32> to vector<16x8xf32>
    %436 = vector.extract_strided_slice %341 {offsets = [16, 0], sizes = [16, 8], strides = [1, 1]} : vector<32x8xf32> to vector<16x8xf32>
    %cst_294 = arith.constant dense<0.000000e+00> : vector<16x16xf32>
    %437 = tpu.matmul %434, %435, %cst_294 {dimension_numbers = #tpu.dot_dimension_numbers<[1], [1], [0], [0], [0, 0, 1, 0], [], []>} : vector<16x8xf32>, vector<16x8xf32>, vector<16x16xf32> -> vector<16x16xf32>
    %cst_295 = arith.constant 0.353553385 : f32
    %438 = vector.broadcast %cst_295 : f32 to vector<16x16xf32>
    %439 = arith.mulf %437, %438 : vector<16x16xf32>
    %cst_296 = arith.constant dense<0xFF800000> : vector<16xf32>
    %440 = vector.multi_reduction <maximumf>, %439, %cst_296 [1] : vector<16x16xf32> to vector<16xf32>
    %441 = vector.shape_cast %440 : vector<16xf32> to vector<16x1xf32>
    %442 = vector.broadcast %441 : vector<16x1xf32> to vector<16x16xf32>
    %443 = arith.subf %439, %442 : vector<16x16xf32>
    %444 = math.exp %443 : vector<16x16xf32>
    %cst_297 = arith.constant dense<0.000000e+00> : vector<16xf32>
    %445 = vector.multi_reduction <add>, %444, %cst_297 [1] : vector<16x16xf32> to vector<16xf32>
    %446 = vector.shape_cast %445 : vector<16xf32> to vector<16x1xf32>
    %447 = tpu.reciprocal %446 {approx = true} : vector<16x1xf32> -> vector<16x1xf32>
    %448 = vector.broadcast %447 : vector<16x1xf32> to vector<16x16xf32>
    %449 = arith.mulf %444, %448 : vector<16x16xf32>
    %cst_298 = arith.constant dense<0.000000e+00> : vector<16x8xf32>
    %450 = tpu.matmul %449, %436, %cst_298 {dimension_numbers = #tpu.dot_dimension_numbers<[1], [0], [0], [1], [0, 0, 1, 1], [], []>} : vector<16x16xf32>, vector<16x8xf32>, vector<16x8xf32> -> vector<16x8xf32>
    %c1_299 = arith.constant 1 : index
    %c0_300 = arith.constant 0 : index
    %c0_301 = arith.constant 0 : index
    %c0_302 = arith.constant 0 : index
    %451 = vector.load %arg9[%c1_299, %c0_300, %c0_301, %c0_302] : memref<2x4x8x32xf32, #tpu.memory_space<vmem>>, vector<1x1x8x32xf32>
    %452 = vector.shape_cast %451 : vector<1x1x8x32xf32> to vector<8x32xf32>
    %cst_303 = arith.constant dense<0.000000e+00> : vector<16x32xf32>
    %453 = tpu.matmul %450, %452, %cst_303 {dimension_numbers = #tpu.dot_dimension_numbers<[1], [0], [0], [1], [0, 0, 1, 1], [], []>} : vector<16x8xf32>, vector<8x32xf32>, vector<16x32xf32> -> vector<16x32xf32>
    %454 = vector.extract_strided_slice %320 {offsets = [16, 0], sizes = [16, 8], strides = [1, 1]} : vector<32x8xf32> to vector<16x8xf32>
    %455 = vector.extract_strided_slice %332 {offsets = [16, 0], sizes = [16, 8], strides = [1, 1]} : vector<32x8xf32> to vector<16x8xf32>
    %456 = vector.extract_strided_slice %344 {offsets = [16, 0], sizes = [16, 8], strides = [1, 1]} : vector<32x8xf32> to vector<16x8xf32>
    %cst_304 = arith.constant dense<0.000000e+00> : vector<16x16xf32>
    %457 = tpu.matmul %454, %455, %cst_304 {dimension_numbers = #tpu.dot_dimension_numbers<[1], [1], [0], [0], [0, 0, 1, 0], [], []>} : vector<16x8xf32>, vector<16x8xf32>, vector<16x16xf32> -> vector<16x16xf32>
    %cst_305 = arith.constant 0.353553385 : f32
    %458 = vector.broadcast %cst_305 : f32 to vector<16x16xf32>
    %459 = arith.mulf %457, %458 : vector<16x16xf32>
    %cst_306 = arith.constant dense<0xFF800000> : vector<16xf32>
    %460 = vector.multi_reduction <maximumf>, %459, %cst_306 [1] : vector<16x16xf32> to vector<16xf32>
    %461 = vector.shape_cast %460 : vector<16xf32> to vector<16x1xf32>
    %462 = vector.broadcast %461 : vector<16x1xf32> to vector<16x16xf32>
    %463 = arith.subf %459, %462 : vector<16x16xf32>
    %464 = math.exp %463 : vector<16x16xf32>
    %cst_307 = arith.constant dense<0.000000e+00> : vector<16xf32>
    %465 = vector.multi_reduction <add>, %464, %cst_307 [1] : vector<16x16xf32> to vector<16xf32>
    %466 = vector.shape_cast %465 : vector<16xf32> to vector<16x1xf32>
    %467 = tpu.reciprocal %466 {approx = true} : vector<16x1xf32> -> vector<16x1xf32>
    %468 = vector.broadcast %467 : vector<16x1xf32> to vector<16x16xf32>
    %469 = arith.mulf %464, %468 : vector<16x16xf32>
    %cst_308 = arith.constant dense<0.000000e+00> : vector<16x8xf32>
    %470 = tpu.matmul %469, %456, %cst_308 {dimension_numbers = #tpu.dot_dimension_numbers<[1], [0], [0], [1], [0, 0, 1, 1], [], []>} : vector<16x16xf32>, vector<16x8xf32>, vector<16x8xf32> -> vector<16x8xf32>
    %c1_309 = arith.constant 1 : index
    %c1_310 = arith.constant 1 : index
    %c0_311 = arith.constant 0 : index
    %c0_312 = arith.constant 0 : index
    %471 = vector.load %arg9[%c1_309, %c1_310, %c0_311, %c0_312] : memref<2x4x8x32xf32, #tpu.memory_space<vmem>>, vector<1x1x8x32xf32>
    %472 = vector.shape_cast %471 : vector<1x1x8x32xf32> to vector<8x32xf32>
    %cst_313 = arith.constant dense<0.000000e+00> : vector<16x32xf32>
    %473 = tpu.matmul %470, %472, %cst_313 {dimension_numbers = #tpu.dot_dimension_numbers<[1], [0], [0], [1], [0, 0, 1, 1], [], []>} : vector<16x8xf32>, vector<8x32xf32>, vector<16x32xf32> -> vector<16x32xf32>
    %474 = arith.addf %453, %473 : vector<16x32xf32>
    %475 = vector.extract_strided_slice %323 {offsets = [16, 0], sizes = [16, 8], strides = [1, 1]} : vector<32x8xf32> to vector<16x8xf32>
    %476 = vector.extract_strided_slice %335 {offsets = [16, 0], sizes = [16, 8], strides = [1, 1]} : vector<32x8xf32> to vector<16x8xf32>
    %477 = vector.extract_strided_slice %347 {offsets = [16, 0], sizes = [16, 8], strides = [1, 1]} : vector<32x8xf32> to vector<16x8xf32>
    %cst_314 = arith.constant dense<0.000000e+00> : vector<16x16xf32>
    %478 = tpu.matmul %475, %476, %cst_314 {dimension_numbers = #tpu.dot_dimension_numbers<[1], [1], [0], [0], [0, 0, 1, 0], [], []>} : vector<16x8xf32>, vector<16x8xf32>, vector<16x16xf32> -> vector<16x16xf32>
    %cst_315 = arith.constant 0.353553385 : f32
    %479 = vector.broadcast %cst_315 : f32 to vector<16x16xf32>
    %480 = arith.mulf %478, %479 : vector<16x16xf32>
    %cst_316 = arith.constant dense<0xFF800000> : vector<16xf32>
    %481 = vector.multi_reduction <maximumf>, %480, %cst_316 [1] : vector<16x16xf32> to vector<16xf32>
    %482 = vector.shape_cast %481 : vector<16xf32> to vector<16x1xf32>
    %483 = vector.broadcast %482 : vector<16x1xf32> to vector<16x16xf32>
    %484 = arith.subf %480, %483 : vector<16x16xf32>
    %485 = math.exp %484 : vector<16x16xf32>
    %cst_317 = arith.constant dense<0.000000e+00> : vector<16xf32>
    %486 = vector.multi_reduction <add>, %485, %cst_317 [1] : vector<16x16xf32> to vector<16xf32>
    %487 = vector.shape_cast %486 : vector<16xf32> to vector<16x1xf32>
    %488 = tpu.reciprocal %487 {approx = true} : vector<16x1xf32> -> vector<16x1xf32>
    %489 = vector.broadcast %488 : vector<16x1xf32> to vector<16x16xf32>
    %490 = arith.mulf %485, %489 : vector<16x16xf32>
    %cst_318 = arith.constant dense<0.000000e+00> : vector<16x8xf32>
    %491 = tpu.matmul %490, %477, %cst_318 {dimension_numbers = #tpu.dot_dimension_numbers<[1], [0], [0], [1], [0, 0, 1, 1], [], []>} : vector<16x16xf32>, vector<16x8xf32>, vector<16x8xf32> -> vector<16x8xf32>
    %c1_319 = arith.constant 1 : index
    %c2_320 = arith.constant 2 : index
    %c0_321 = arith.constant 0 : index
    %c0_322 = arith.constant 0 : index
    %492 = vector.load %arg9[%c1_319, %c2_320, %c0_321, %c0_322] : memref<2x4x8x32xf32, #tpu.memory_space<vmem>>, vector<1x1x8x32xf32>
    %493 = vector.shape_cast %492 : vector<1x1x8x32xf32> to vector<8x32xf32>
    %cst_323 = arith.constant dense<0.000000e+00> : vector<16x32xf32>
    %494 = tpu.matmul %491, %493, %cst_323 {dimension_numbers = #tpu.dot_dimension_numbers<[1], [0], [0], [1], [0, 0, 1, 1], [], []>} : vector<16x8xf32>, vector<8x32xf32>, vector<16x32xf32> -> vector<16x32xf32>
    %495 = arith.addf %474, %494 : vector<16x32xf32>
    %496 = vector.extract_strided_slice %326 {offsets = [16, 0], sizes = [16, 8], strides = [1, 1]} : vector<32x8xf32> to vector<16x8xf32>
    %497 = vector.extract_strided_slice %338 {offsets = [16, 0], sizes = [16, 8], strides = [1, 1]} : vector<32x8xf32> to vector<16x8xf32>
    %498 = vector.extract_strided_slice %350 {offsets = [16, 0], sizes = [16, 8], strides = [1, 1]} : vector<32x8xf32> to vector<16x8xf32>
    %cst_324 = arith.constant dense<0.000000e+00> : vector<16x16xf32>
    %499 = tpu.matmul %496, %497, %cst_324 {dimension_numbers = #tpu.dot_dimension_numbers<[1], [1], [0], [0], [0, 0, 1, 0], [], []>} : vector<16x8xf32>, vector<16x8xf32>, vector<16x16xf32> -> vector<16x16xf32>
    %cst_325 = arith.constant 0.353553385 : f32
    %500 = vector.broadcast %cst_325 : f32 to vector<16x16xf32>
    %501 = arith.mulf %499, %500 : vector<16x16xf32>
    %cst_326 = arith.constant dense<0xFF800000> : vector<16xf32>
    %502 = vector.multi_reduction <maximumf>, %501, %cst_326 [1] : vector<16x16xf32> to vector<16xf32>
    %503 = vector.shape_cast %502 : vector<16xf32> to vector<16x1xf32>
    %504 = vector.broadcast %503 : vector<16x1xf32> to vector<16x16xf32>
    %505 = arith.subf %501, %504 : vector<16x16xf32>
    %506 = math.exp %505 : vector<16x16xf32>
    %cst_327 = arith.constant dense<0.000000e+00> : vector<16xf32>
    %507 = vector.multi_reduction <add>, %506, %cst_327 [1] : vector<16x16xf32> to vector<16xf32>
    %508 = vector.shape_cast %507 : vector<16xf32> to vector<16x1xf32>
    %509 = tpu.reciprocal %508 {approx = true} : vector<16x1xf32> -> vector<16x1xf32>
    %510 = vector.broadcast %509 : vector<16x1xf32> to vector<16x16xf32>
    %511 = arith.mulf %506, %510 : vector<16x16xf32>
    %cst_328 = arith.constant dense<0.000000e+00> : vector<16x8xf32>
    %512 = tpu.matmul %511, %498, %cst_328 {dimension_numbers = #tpu.dot_dimension_numbers<[1], [0], [0], [1], [0, 0, 1, 1], [], []>} : vector<16x16xf32>, vector<16x8xf32>, vector<16x8xf32> -> vector<16x8xf32>
    %c1_329 = arith.constant 1 : index
    %c3_330 = arith.constant 3 : index
    %c0_331 = arith.constant 0 : index
    %c0_332 = arith.constant 0 : index
    %513 = vector.load %arg9[%c1_329, %c3_330, %c0_331, %c0_332] : memref<2x4x8x32xf32, #tpu.memory_space<vmem>>, vector<1x1x8x32xf32>
    %514 = vector.shape_cast %513 : vector<1x1x8x32xf32> to vector<8x32xf32>
    %cst_333 = arith.constant dense<0.000000e+00> : vector<16x32xf32>
    %515 = tpu.matmul %512, %514, %cst_333 {dimension_numbers = #tpu.dot_dimension_numbers<[1], [0], [0], [1], [0, 0, 1, 1], [], []>} : vector<16x8xf32>, vector<8x32xf32>, vector<16x32xf32> -> vector<16x32xf32>
    %516 = arith.addf %495, %515 : vector<16x32xf32>
    %517 = tpu.concatenate %433, %516 in 0 : vector<16x32xf32>, vector<16x32xf32> -> vector<32x32xf32>
    %c1_334 = arith.constant 1 : index
    %c0_335 = arith.constant 0 : index
    %c0_336 = arith.constant 0 : index
    %518 = vector.load %arg10[%c1_334, %c0_335, %c0_336] : memref<2x1x32xf32, #tpu.memory_space<vmem>>, vector<1x1x32xf32>
    %519 = vector.shape_cast %518 : vector<1x1x32xf32> to vector<1x32xf32>
    %520 = vector.broadcast %519 : vector<1x32xf32> to vector<32x32xf32>
    %521 = arith.addf %517, %520 : vector<32x32xf32>
    %522 = arith.addf %288, %521 : vector<32x32xf32>
    %c1_337 = arith.constant 1 : index
    %c0_338 = arith.constant 0 : index
    %c0_339 = arith.constant 0 : index
    %523 = vector.load %arg11[%c1_337, %c0_338, %c0_339] : memref<2x1x32xf32, #tpu.memory_space<vmem>>, vector<1x1x32xf32>
    %524 = vector.shape_cast %523 : vector<1x1x32xf32> to vector<1x32xf32>
    %c1_340 = arith.constant 1 : index
    %c0_341 = arith.constant 0 : index
    %c0_342 = arith.constant 0 : index
    %525 = vector.load %arg12[%c1_340, %c0_341, %c0_342] : memref<2x1x32xf32, #tpu.memory_space<vmem>>, vector<1x1x32xf32>
    %526 = vector.shape_cast %525 : vector<1x1x32xf32> to vector<1x32xf32>
    %cst_343 = arith.constant dense<0.000000e+00> : vector<32xf32>
    %527 = vector.multi_reduction <add>, %522, %cst_343 [1] : vector<32x32xf32> to vector<32xf32>
    %528 = vector.shape_cast %527 : vector<32xf32> to vector<32x1xf32>
    %cst_344 = arith.constant 3.200000e+01 : f32
    %529 = vector.broadcast %cst_344 : f32 to vector<32x1xf32>
    %530 = arith.divf %528, %529 : vector<32x1xf32>
    %531 = vector.broadcast %530 : vector<32x1xf32> to vector<32x32xf32>
    %532 = arith.subf %522, %531 : vector<32x32xf32>
    %533 = arith.mulf %532, %532 : vector<32x32xf32>
    %cst_345 = arith.constant dense<0.000000e+00> : vector<32xf32>
    %534 = vector.multi_reduction <add>, %533, %cst_345 [1] : vector<32x32xf32> to vector<32xf32>
    %535 = vector.shape_cast %534 : vector<32xf32> to vector<32x1xf32>
    %cst_346 = arith.constant 3.200000e+01 : f32
    %536 = vector.broadcast %cst_346 : f32 to vector<32x1xf32>
    %537 = arith.divf %535, %536 : vector<32x1xf32>
    %538 = vector.broadcast %530 : vector<32x1xf32> to vector<32x32xf32>
    %539 = arith.subf %522, %538 : vector<32x32xf32>
    %cst_347 = arith.constant 9.99999974E-6 : f32
    %540 = vector.broadcast %cst_347 : f32 to vector<32x1xf32>
    %541 = arith.addf %537, %540 : vector<32x1xf32>
    %542 = math.rsqrt %541 : vector<32x1xf32>
    %543 = vector.broadcast %542 : vector<32x1xf32> to vector<32x32xf32>
    %544 = arith.mulf %539, %543 : vector<32x32xf32>
    %545 = vector.broadcast %524 : vector<1x32xf32> to vector<32x32xf32>
    %546 = arith.mulf %544, %545 : vector<32x32xf32>
    %547 = vector.broadcast %526 : vector<1x32xf32> to vector<32x32xf32>
    %548 = arith.addf %546, %547 : vector<32x32xf32>
    %c1_348 = arith.constant 1 : index
    %c0_349 = arith.constant 0 : index
    %c0_350 = arith.constant 0 : index
    %549 = vector.load %arg13[%c1_348, %c0_349, %c0_350] : memref<2x32x128xf32, #tpu.memory_space<vmem>>, vector<1x32x128xf32>
    %550 = vector.shape_cast %549 : vector<1x32x128xf32> to vector<32x128xf32>
    %cst_351 = arith.constant dense<0.000000e+00> : vector<32x128xf32>
    %551 = tpu.matmul %548, %550, %cst_351 {dimension_numbers = #tpu.dot_dimension_numbers<[1], [0], [0], [1], [0, 0, 1, 1], [], []>} : vector<32x32xf32>, vector<32x128xf32>, vector<32x128xf32> -> vector<32x128xf32>
    %c1_352 = arith.constant 1 : index
    %c0_353 = arith.constant 0 : index
    %c0_354 = arith.constant 0 : index
    %552 = vector.load %arg14[%c1_352, %c0_353, %c0_354] : memref<2x1x128xf32, #tpu.memory_space<vmem>>, vector<1x1x128xf32>
    %553 = vector.shape_cast %552 : vector<1x1x128xf32> to vector<1x128xf32>
    %554 = vector.broadcast %553 : vector<1x128xf32> to vector<32x128xf32>
    %555 = arith.addf %551, %554 : vector<32x128xf32>
    %cst_355 = arith.constant 0.000000e+00 : f32
    %556 = vector.broadcast %cst_355 : f32 to vector<32x128xf32>
    %557 = arith.maximumf %555, %556 : vector<32x128xf32>
    %c1_356 = arith.constant 1 : index
    %c0_357 = arith.constant 0 : index
    %c0_358 = arith.constant 0 : index
    %558 = vector.load %arg15[%c1_356, %c0_357, %c0_358] : memref<2x128x32xf32, #tpu.memory_space<vmem>>, vector<1x128x32xf32>
    %559 = vector.shape_cast %558 : vector<1x128x32xf32> to vector<128x32xf32>
    %cst_359 = arith.constant dense<0.000000e+00> : vector<32x32xf32>
    %560 = tpu.matmul %557, %559, %cst_359 {dimension_numbers = #tpu.dot_dimension_numbers<[1], [0], [0], [1], [0, 0, 1, 1], [], []>} : vector<32x128xf32>, vector<128x32xf32>, vector<32x32xf32> -> vector<32x32xf32>
    %561 = arith.addf %548, %560 : vector<32x32xf32>
    %c1_360 = arith.constant 1 : index
    %c0_361 = arith.constant 0 : index
    %c0_362 = arith.constant 0 : index
    %562 = vector.load %arg16[%c1_360, %c0_361, %c0_362] : memref<2x1x32xf32, #tpu.memory_space<vmem>>, vector<1x1x32xf32>
    %563 = vector.shape_cast %562 : vector<1x1x32xf32> to vector<1x32xf32>
    %564 = vector.broadcast %563 : vector<1x32xf32> to vector<32x32xf32>
    %565 = arith.addf %561, %564 : vector<32x32xf32>
    %566 = vector.extract_strided_slice %565 {offsets = [0, 0], sizes = [16, 32], strides = [1, 1]} : vector<32x32xf32> to vector<16x32xf32>
    %cst_363 = arith.constant dense<0.000000e+00> : vector<32xf32>
    %567 = vector.multi_reduction <add>, %566, %cst_363 [0] : vector<16x32xf32> to vector<32xf32>
    %568 = vector.shape_cast %567 : vector<32xf32> to vector<1x32xf32>
    %569 = vector.extract_strided_slice %565 {offsets = [16, 0], sizes = [16, 32], strides = [1, 1]} : vector<32x32xf32> to vector<16x32xf32>
    %cst_364 = arith.constant dense<0.000000e+00> : vector<32xf32>
    %570 = vector.multi_reduction <add>, %569, %cst_364 [0] : vector<16x32xf32> to vector<32xf32>
    %571 = vector.shape_cast %570 : vector<32xf32> to vector<1x32xf32>
    %572 = tpu.concatenate %568, %571 in 0 : vector<1x32xf32>, vector<1x32xf32> -> vector<2x32xf32>
    %cst_365 = arith.constant 6.250000e-02 : f32
    %573 = vector.broadcast %cst_365 : f32 to vector<2x32xf32>
    %574 = arith.mulf %572, %573 : vector<2x32xf32>
    %c0_366 = arith.constant 0 : index
    %c0_367 = arith.constant 0 : index
    %575 = vector.load %arg17[%c0_366, %c0_367] : memref<32x128xf32, #tpu.memory_space<vmem>>, vector<32x128xf32>
    %cst_368 = arith.constant dense<0.000000e+00> : vector<2x128xf32>
    %576 = tpu.matmul %574, %575, %cst_368 {dimension_numbers = #tpu.dot_dimension_numbers<[1], [0], [0], [1], [0, 0, 1, 1], [], []>} : vector<2x32xf32>, vector<32x128xf32>, vector<2x128xf32> -> vector<2x128xf32>
    %c0_369 = arith.constant 0 : index
    %c0_370 = arith.constant 0 : index
    %577 = vector.load %arg18[%c0_369, %c0_370] : memref<1x128xf32, #tpu.memory_space<vmem>>, vector<1x128xf32>
    %578 = vector.broadcast %577 : vector<1x128xf32> to vector<2x128xf32>
    %579 = arith.addf %576, %578 : vector<2x128xf32>
    %cst_371 = arith.constant 0.000000e+00 : f32
    %580 = vector.broadcast %cst_371 : f32 to vector<2x128xf32>
    %581 = arith.maximumf %579, %580 : vector<2x128xf32>
    %c0_372 = arith.constant 0 : index
    %c0_373 = arith.constant 0 : index
    %582 = vector.load %arg19[%c0_372, %c0_373] : memref<128x128xf32, #tpu.memory_space<vmem>>, vector<128x128xf32>
    %cst_374 = arith.constant dense<0.000000e+00> : vector<2x128xf32>
    %583 = tpu.matmul %581, %582, %cst_374 {dimension_numbers = #tpu.dot_dimension_numbers<[1], [0], [0], [1], [0, 0, 1, 1], [], []>} : vector<2x128xf32>, vector<128x128xf32>, vector<2x128xf32> -> vector<2x128xf32>
    %c0_375 = arith.constant 0 : index
    %c0_376 = arith.constant 0 : index
    %584 = vector.load %arg20[%c0_375, %c0_376] : memref<1x128xf32, #tpu.memory_space<vmem>>, vector<1x128xf32>
    %585 = vector.broadcast %584 : vector<1x128xf32> to vector<2x128xf32>
    %586 = arith.addf %583, %585 : vector<2x128xf32>
    %587 = tpu.iota {dimensions = array<i32: 1>} : vector<2x128xi32>
    %c10_i32 = arith.constant 10 : i32
    %588 = vector.broadcast %c10_i32 : i32 to vector<2x128xi32>
    %589 = arith.cmpi slt, %587, %588 : vector<2x128xi32>
    %cst_377 = arith.constant -1.000000e+30 : f32
    %590 = vector.broadcast %cst_377 : f32 to vector<2x128xf32>
    %591 = arith.select %589, %586, %590 : vector<2x128xi1>, vector<2x128xf32>
    %cst_378 = arith.constant dense<0xFF800000> : vector<2xf32>
    %592 = vector.multi_reduction <maximumf>, %591, %cst_378 [1] : vector<2x128xf32> to vector<2xf32>
    %593 = vector.shape_cast %592 : vector<2xf32> to vector<2x1xf32>
    %594 = vector.broadcast %593 : vector<2x1xf32> to vector<2x128xf32>
    %595 = arith.subf %591, %594 : vector<2x128xf32>
    %596 = math.exp %595 : vector<2x128xf32>
    %cst_379 = arith.constant dense<0.000000e+00> : vector<2xf32>
    %597 = vector.multi_reduction <add>, %596, %cst_379 [1] : vector<2x128xf32> to vector<2xf32>
    %598 = vector.shape_cast %597 : vector<2xf32> to vector<2x1xf32>
    %599 = math.log %598 : vector<2x1xf32>
    %600 = vector.broadcast %599 : vector<2x1xf32> to vector<2x128xf32>
    %601 = arith.subf %595, %600 : vector<2x128xf32>
    %c0_380 = arith.constant 0 : index
    %c0_381 = arith.constant 0 : index
    %c0_382 = arith.constant 0 : index
    %602 = vector.load %arg21[%c0_380, %c0_381, %c0_382] : memref<1x2x128xf32, #tpu.memory_space<vmem>>, vector<1x2x128xf32>
    %603 = vector.shape_cast %602 : vector<1x2x128xf32> to vector<2x128xf32>
    %604 = vector.shape_cast %601 : vector<2x128xf32> to vector<1x2x128xf32>
    tpu.vector_store %arg21[%c0_380, %c0_381, %c0_382], %604 {strides = array<i32>} : memref<1x2x128xf32, #tpu.memory_space<vmem>>, vector<1x2x128xf32>,
    return
  }
  func.func @transform_0(%arg0: i32) -> (i32, i32, i32) {
    %c0_i32 = arith.constant 0 : i32
    %c0_i32_0 = arith.constant 0 : i32
    %c0_i32_1 = arith.constant 0 : i32
    return %arg0, %c0_i32, %c0_i32_0 : i32, i32, i32
  }
  func.func @transform_1(%arg0: i32) -> (i32, i32) {
    %c0_i32 = arith.constant 0 : i32
    %c0_i32_0 = arith.constant 0 : i32
    %c0_i32_1 = arith.constant 0 : i32
    return %c0_i32, %c0_i32_0 : i32, i32
  }
  func.func @transform_2(%arg0: i32) -> (i32, i32) {
    %c0_i32 = arith.constant 0 : i32
    %c0_i32_0 = arith.constant 0 : i32
    %c0_i32_1 = arith.constant 0 : i32
    return %c0_i32, %c0_i32_0 : i32, i32
  }
  func.func @transform_3(%arg0: i32) -> (i32, i32, i32) {
    %c0_i32 = arith.constant 0 : i32
    %c0_i32_0 = arith.constant 0 : i32
    %c0_i32_1 = arith.constant 0 : i32
    %c0_i32_2 = arith.constant 0 : i32
    return %c0_i32, %c0_i32_0, %c0_i32_1 : i32, i32, i32
  }
  func.func @transform_4(%arg0: i32) -> (i32, i32, i32) {
    %c0_i32 = arith.constant 0 : i32
    %c0_i32_0 = arith.constant 0 : i32
    %c0_i32_1 = arith.constant 0 : i32
    %c0_i32_2 = arith.constant 0 : i32
    return %c0_i32, %c0_i32_0, %c0_i32_1 : i32, i32, i32
  }
  func.func @transform_5(%arg0: i32) -> (i32, i32, i32, i32) {
    %c0_i32 = arith.constant 0 : i32
    %c0_i32_0 = arith.constant 0 : i32
    %c0_i32_1 = arith.constant 0 : i32
    %c0_i32_2 = arith.constant 0 : i32
    %c0_i32_3 = arith.constant 0 : i32
    return %c0_i32, %c0_i32_0, %c0_i32_1, %c0_i32_2 : i32, i32, i32, i32
  }
  func.func @transform_6(%arg0: i32) -> (i32, i32, i32, i32) {
    %c0_i32 = arith.constant 0 : i32
    %c0_i32_0 = arith.constant 0 : i32
    %c0_i32_1 = arith.constant 0 : i32
    %c0_i32_2 = arith.constant 0 : i32
    %c0_i32_3 = arith.constant 0 : i32
    return %c0_i32, %c0_i32_0, %c0_i32_1, %c0_i32_2 : i32, i32, i32, i32
  }
  func.func @transform_7(%arg0: i32) -> (i32, i32, i32, i32) {
    %c0_i32 = arith.constant 0 : i32
    %c0_i32_0 = arith.constant 0 : i32
    %c0_i32_1 = arith.constant 0 : i32
    %c0_i32_2 = arith.constant 0 : i32
    %c0_i32_3 = arith.constant 0 : i32
    return %c0_i32, %c0_i32_0, %c0_i32_1, %c0_i32_2 : i32, i32, i32, i32
  }
  func.func @transform_8(%arg0: i32) -> (i32, i32, i32, i32) {
    %c0_i32 = arith.constant 0 : i32
    %c0_i32_0 = arith.constant 0 : i32
    %c0_i32_1 = arith.constant 0 : i32
    %c0_i32_2 = arith.constant 0 : i32
    %c0_i32_3 = arith.constant 0 : i32
    return %c0_i32, %c0_i32_0, %c0_i32_1, %c0_i32_2 : i32, i32, i32, i32
  }
  func.func @transform_9(%arg0: i32) -> (i32, i32, i32) {
    %c0_i32 = arith.constant 0 : i32
    %c0_i32_0 = arith.constant 0 : i32
    %c0_i32_1 = arith.constant 0 : i32
    %c0_i32_2 = arith.constant 0 : i32
    return %c0_i32, %c0_i32_0, %c0_i32_1 : i32, i32, i32
  }
  func.func @transform_10(%arg0: i32) -> (i32, i32, i32) {
    %c0_i32 = arith.constant 0 : i32
    %c0_i32_0 = arith.constant 0 : i32
    %c0_i32_1 = arith.constant 0 : i32
    %c0_i32_2 = arith.constant 0 : i32
    return %c0_i32, %c0_i32_0, %c0_i32_1 : i32, i32, i32
  }
  func.func @transform_11(%arg0: i32) -> (i32, i32, i32) {
    %c0_i32 = arith.constant 0 : i32
    %c0_i32_0 = arith.constant 0 : i32
    %c0_i32_1 = arith.constant 0 : i32
    %c0_i32_2 = arith.constant 0 : i32
    return %c0_i32, %c0_i32_0, %c0_i32_1 : i32, i32, i32
  }
  func.func @transform_12(%arg0: i32) -> (i32, i32, i32) {
    %c0_i32 = arith.constant 0 : i32
    %c0_i32_0 = arith.constant 0 : i32
    %c0_i32_1 = arith.constant 0 : i32
    %c0_i32_2 = arith.constant 0 : i32
    return %c0_i32, %c0_i32_0, %c0_i32_1 : i32, i32, i32
  }
  func.func @transform_13(%arg0: i32) -> (i32, i32, i32) {
    %c0_i32 = arith.constant 0 : i32
    %c0_i32_0 = arith.constant 0 : i32
    %c0_i32_1 = arith.constant 0 : i32
    %c0_i32_2 = arith.constant 0 : i32
    return %c0_i32, %c0_i32_0, %c0_i32_1 : i32, i32, i32
  }
  func.func @transform_14(%arg0: i32) -> (i32, i32, i32) {
    %c0_i32 = arith.constant 0 : i32
    %c0_i32_0 = arith.constant 0 : i32
    %c0_i32_1 = arith.constant 0 : i32
    %c0_i32_2 = arith.constant 0 : i32
    return %c0_i32, %c0_i32_0, %c0_i32_1 : i32, i32, i32
  }
  func.func @transform_15(%arg0: i32) -> (i32, i32, i32) {
    %c0_i32 = arith.constant 0 : i32
    %c0_i32_0 = arith.constant 0 : i32
    %c0_i32_1 = arith.constant 0 : i32
    %c0_i32_2 = arith.constant 0 : i32
    return %c0_i32, %c0_i32_0, %c0_i32_1 : i32, i32, i32
  }
  func.func @transform_16(%arg0: i32) -> (i32, i32) {
    %c0_i32 = arith.constant 0 : i32
    %c0_i32_0 = arith.constant 0 : i32
    %c0_i32_1 = arith.constant 0 : i32
    return %c0_i32, %c0_i32_0 : i32, i32
  }
  func.func @transform_17(%arg0: i32) -> (i32, i32) {
    %c0_i32 = arith.constant 0 : i32
    %c0_i32_0 = arith.constant 0 : i32
    %c0_i32_1 = arith.constant 0 : i32
    return %c0_i32, %c0_i32_0 : i32, i32
  }
  func.func @transform_18(%arg0: i32) -> (i32, i32) {
    %c0_i32 = arith.constant 0 : i32
    %c0_i32_0 = arith.constant 0 : i32
    %c0_i32_1 = arith.constant 0 : i32
    return %c0_i32, %c0_i32_0 : i32, i32
  }
  func.func @transform_19(%arg0: i32) -> (i32, i32) {
    %c0_i32 = arith.constant 0 : i32
    %c0_i32_0 = arith.constant 0 : i32
    %c0_i32_1 = arith.constant 0 : i32
    return %c0_i32, %c0_i32_0 : i32, i32
  }
  func.func @transform_20(%arg0: i32) -> (i32, i32, i32) {
    %c0_i32 = arith.constant 0 : i32
    %c0_i32_0 = arith.constant 0 : i32
    %c0_i32_1 = arith.constant 0 : i32
    return %arg0, %c0_i32, %c0_i32_0 : i32, i32, i32
  }
}

</mosaic_0001>

<bundles_post_ra>
// kernel: tpu_custom_call.1
= control target key start
LH: loop header
LB: loop body
LE: loop exit
PB: predicated region body
PF: predicated region fallthrough
CT: control target
= control target key end

     0   :  { %s12582_s0 = inlined_call_operand.vmem [shape: s32[2,32,1], index: 0, kind: input, shape index: {}]   ;;  %s12583_s1 = inlined_call_operand.vmem [shape: f32[64,32], index: 1, kind: input, shape index: {}]   ;;  %s12584_s2 = inlined_call_operand.vmem [shape: f32[16,32], index: 2, kind: input, shape index: {}]   ;;  %s12585_s3 = inlined_call_operand.vmem [shape: f32[2,1,32], index: 3, kind: input, shape index: {}]   ;;  %s12586_s4 = inlined_call_operand.vmem [shape: f32[2,1,32], index: 4, kind: input, shape index: {}]   ;;  %s12587_s5 = inlined_call_operand.vmem [shape: f32[2,4,32,8], index: 5, kind: input, shape index: {}]   ;;  %s12588_s6 = inlined_call_operand.vmem [shape: f32[2,4,32,8], index: 6, kind: input, shape index: {}]   ;;  %s12589_s7 = inlined_call_operand.vmem [shape: f32[2,4,32,8], index: 7, kind: input, shape index: {}]   ;;  %s12590_s8 = inlined_call_operand.vmem [shape: f32[2,4,8,32], index: 8, kind: input, shape index: {}]   ;;  %s12591_s9 = inlined_call_operand.vmem [shape: f32[2,1,32], index: 9, kind: input, shape index: {}]   ;;  %s12592_s10 = inlined_call_operand.vmem [shape: f32[2,1,32], index: 10, kind: input, shape index: {}]   ;;  %s12593_s11 = inlined_call_operand.vmem [shape: f32[2,1,32], index: 11, kind: input, shape index: {}]   ;;  %s12594_s12 = inlined_call_operand.vmem [shape: f32[2,32,128], index: 12, kind: input, shape index: {}]   ;;  %s12595_s13 = inlined_call_operand.vmem [shape: f32[2,1,128], index: 13, kind: input, shape index: {}]   ;;  %s12596_s14 = inlined_call_operand.vmem [shape: f32[2,128,32], index: 14, kind: input, shape index: {}]   ;;  %s12597_s15 = inlined_call_operand.vmem [shape: f32[2,1,32], index: 15, kind: input, shape index: {}]   ;;  %s12598_s16 = inlined_call_operand.vmem [shape: f32[32,128], index: 16, kind: input, shape index: {}]   ;;  %s12599_s17 = inlined_call_operand.vmem [shape: f32[1,128], index: 17, kind: input, shape index: {}]   ;;  %s12600_s18 = inlined_call_operand.vmem [shape: f32[128,128], index: 18, kind: input, shape index: {}]   ;;  %s12601_s19 = inlined_call_operand.vmem [shape: f32[1,128], index: 19, kind: input, shape index: {}]   ;;  %s12602_s20 = inlined_call_operand.hbm [shape: f32[2,2,128], index: 20, kind: output, shape index: {}]  }
   0x1   :  { %12616 = sst [smem:[#allocation11_spill]] %s12582_s0 }
   0x2   :  { %12617 = sst [smem:[#allocation12_spill]] %s12583_s1 }
   0x3   :  { %12618 = sst [smem:[#allocation13_spill]] %s12584_s2 }
   0x4   :  { %12619 = sst [smem:[#allocation14_spill]] %s12585_s3 }
   0x5   :  { %12620 = sst [smem:[#allocation15_spill]] %s12586_s4 }
   0x6   :  { %12621 = sst [smem:[#allocation16_spill]] %s12587_s5 }
   0x7   :  { %12622 = sst [smem:[#allocation17_spill]] %s12602_s20 }
   0x8   :  { %25 = vsyncpa [#allocation3], 0 }
   0x9   :  { %27 = vsyncpa [#allocation3 + $0x1], 0  ;;  %s10971_s1 = smov 0   ;;  %s10973_s22 = smov 0  }
   0xa   :  { %s10975_s23 = smov 0   ;;  %s10977_s24 = smov 0  }
   0xb LB: > { %12623 = sst [smem:[#allocation5_spill]] %s10847_s1  ;;  %s10992_s2 = sadd.s32 4294967295, %s10859_s24   ;;  %s10859_s24 = sphi %s10977_s24, %s12645_s24   ;;  %s10855_s23 = sphi %s10975_s23, %s12647_s23   ;;  %s10851_s22 = sphi %s10973_s22, %s12649_s22   ;;  %s10847_s1 = sphi %s10971_s1, %s12648_s1  }
   0xc   : > { %12624 = sst [smem:[#allocation6_spill]] %s10855_s23  ;;  %s8429_s25 = sadd.s32 4294967294, %s10859_s24  }
   0xd   : > { %12625 = sst [smem:[#allocation7_spill]] %s10859_s24  ;;  %s10996_s3 = sadd.s32 1, %s10859_s24  }
   0xe   : > { %12626 = sst [smem:[#allocation8_spill]] %s10996_s3  ;;  %s465_s26 = sadd.s32 1, %s10855_s23 }
   0xf   : > { %s462_s27 = ssub.s32 %s10859_s24, %s10996_s3  ;;  %p475_p0 = scmp.ne.s32.totalorder %s10855_s23, %s10851_s22 }
  0x10   : > { %p463_p1 = scmp.eq.s32.totalorder %s462_s27, 0  ;;  %p476_p2 = scmp.eq.s32.totalorder %s10992_s2, 1 }
  0x11   : > { %p481_p3 = scmp.ne.s32.totalorder %s10851_s22, %s10847_s1  ;;  %p482_p4 = scmp.eq.s32.totalorder %s8429_s25, 1 }
  0x12   : > { %s11007_s28 = scalar_select %p463_p1, %s10855_s23, %s465_s26  }
  0x13   : > { %p11009_p5 = por %p476_p2, %p475_p0  ;;  %p11013_p6 = por %p482_p4, %p481_p3 }
  0x14   : > { %12627 = sst [smem:[#allocation9_spill]] %s11007_s28  ;;  %p8432_p7 = scmp.ge.s32.totalorder %s10859_s24, 1 }
  0x15   : > { %s12629_s29 = scalar_select %p11013_p6, 1, 0 }
  0x16   : > { %p565_p8 = scmp.lt.s32.totalorder %s10859_s24, 3 }
  0x17   : > { %12630 = sst [smem:[#allocation10_spill]] %s12629_s29 }
  0x18   : > { %p566_p9 = pnand %p8432_p7, %p565_p8 }
  0x19   : > { %p623_p10 = scmp.lt.s32.totalorder (!%p566_p9), %s10992_s2, 1  ;;  %s12631_s21 = sld [smem:[#allocation12_spill]] (!%p566_p9)  ;;  %v10861_v3 = vmov (!%p566_p9), 0   ;;  %v632_v17 = vlaneseq (!%p566_p9)  ;;  %vm668_vm0 = vcmask (!%p566_p9), 523264   ;;  %v10862_v21 = vmov (!%p566_p9), 0.0  }
  0x1a   : > { %569 = sbr.rel (%p566_p9) target bundleno = 7935 (0x1eff), region = 100  ;;  %10632 = vset.pattern.permute.xlu1 (!%p566_p9), %v10861_v3  ;;  %10631 = vset.pattern.permute.xlu0 (!%p566_p9), %v10861_v3  ;;  %s12632_s24 = sld [smem:[#allocation11_spill]] (!%p566_p9)  ;;  %vm768_vm5 = vcmask (!%p566_p9), 261120   ;;  %vm1931_vm6 = vcmask (!%p566_p9), 64512   ;;  %vm2021_vm8 = vcmask (!%p566_p9), 130048   ;;  %vm10864_vm9 = vmmov (!%p566_p9), 0  }
  0x1b   : > { %v11048_v18 = vand.u32 (!%p566_p9), 127, %v632_v17  ;;  %s12635_s5 = sld [smem:[#allocation16_spill]] (!%p566_p9)  ;;  %s12636_s30 = sld [smem:[#allocation14_spill]] (!%p566_p9)  ;;  %vm11375_vm7 = vmpackc.low (!%p566_p9), %vm1931_vm6, %vm1931_vm6  ;;  %vm8159_vm10 = vcmask (!%p566_p9), 1040384   ;;  %vm8342_vm12 = vcmask (!%p566_p9), 1041408  }
  0x1c   : > { %s12637_s1 = sld [smem:[#allocation15_spill]] (!%p566_p9) }
  0x1d   : > { %vm8340_vm11 = vcmp.lt.s32.totalorder (!%p566_p9), %v11048_v18, 10 }
  0x1f   : > { %v658_v0 = vld [vmem:[%s12631_s21] sm:$0xff] (!%p566_p9)  ;;  %v659_v1 = vld [vmem:[%s12631_s21 + $0x8] sm:$0xff] (!%p566_p9)  ;;  %v660_v2 = vld [vmem:[%s12631_s21 + $0x10] sm:$0xff] (!%p566_p9) }
  0x20   : > { %v10086_v4 = vpack.c.bf16 (!%p566_p9), %v659_v1, %v658_v0  ;;  %v661_v5 = vld [vmem:[%s12631_s21 + $0x18] sm:$0xff] (!%p566_p9)  ;;  %v662_v7 = vld [vmem:[%s12631_s21 + $0x20] sm:$0xff] (!%p566_p9)  ;;  %v663_v8 = vld [vmem:[%s12631_s21 + $0x28] sm:$0xff] (!%p566_p9) }
  0x21   : > { %s624_s29 = scalar_select %p623_p10, %s10992_s2, 1  ;;  %v10090_v6 = vpack.c.bf16 %v661_v5, %v660_v2  ;;  %v10094_v9 = vpack.c.bf16 %v663_v8, %v662_v7  ;;  %v664_v12 = vld [vmem:[%s12631_s21 + $0x30] sm:$0xff]  ;;  %v665_v13 = vld [vmem:[%s12631_s21 + $0x38] sm:$0xff]  ;;  %v842_v62 = vld [vmem:[%s12635_s5] sm:$0xff] }
  0x22   : > { %10087 = vmatprep.subr.bf16.mxu0 %v10086_v4  ;;  %v10098_v16 = vpack.c.bf16 %v665_v13, %v664_v12  ;;  %v843_v63 = vld [vmem:[%s12635_s5 + $0x8] sm:$0xff]  ;;  %v8458_v0 = vld [vmem:[%s12635_s5 + $0x40] sm:$0xff]  ;;  %v845_v5 = vld [vmem:[%s12635_s5 + $0x18] sm:$0xff]  ;;  %s12638_s25 = smov %s12637_s1 }
  0x23   : > { %s8815_s28 = sshll.u32 %s624_s29, 5  ;;  %10089 = vmatpush3.bf16.msra.mxu0 %v10086_v4  ;;  %v10102_v1 = vpack.c.bf16 %v843_v63, %v842_v62  ;;  %v8459_v2 = vld [vmem:[%s12635_s5 + $0x48] sm:$0xff]  ;;  %v844_v4 = vld [vmem:[%s12635_s5 + $0x10] sm:$0xff]  ;;  %v8461_v8 = vld [vmem:[%s12635_s5 + $0x58] sm:$0xff] }
  0x24   : > { %s627_s20 = scalar_lea.vmem %s12632_s24, %s8815_s28  ;;  %10091 = vmatprep.subr.bf16.mxu0 %v10090_v6  ;;  %s12633_s24 = sld [smem:[#allocation13_spill]]  ;;  %v10118_v3 = vpack.c.bf16 %v8459_v2, %v8458_v0  ;;  %v10106_v7 = vpack.c.bf16 %v845_v5, %v844_v4  ;;  %v1213_v12 = vld [vmem:[%s12588_s6] sm:$0xff]  ;;  %v8488_v2 = vld [vmem:[%s12588_s6 + $0x50] sm:$0xff] }
  0x25   : > { %v630_v10 = vld [vmem:[%s627_s20 + $0x10] sm:$0xff]  ;;  %v628_v11 = vld [vmem:[%s627_s20] sm:$0xff]  ;;  %v631_v14 = vld [vmem:[%s627_s20 + $0x18] sm:$0xff]  ;;  %10103 = vmatprep.subr.bf16.mxu1 %v10102_v1  ;;  %s8812_s28 = sshll.u32 %s10992_s2, 5  ;;  %s10865_s2 = smov [#allocation2]  }
  0x26   : > { %641 = vperm.xlu1 %10632, %v630_v10   ;;  %635 = vperm.xlu0 %10631, %v628_v11   ;;  %v629_v15 = vld [vmem:[%s627_s20 + $0x8] sm:$0xff]  ;;  %v8450_v10 = vld [vmem:[%s12635_s5 + $0x20] sm:$0xff]  ;;  %s12641_s20 = sld [smem:[#allocation17_spill]] }
  0x27   : > { %10093 = vmatpush3.bf16.msra.mxu0 %v10090_v6  ;;  %10105 = vmatpush3.bf16.msra.mxu1 %v10102_v1  ;;  %v8460_v6 = vld [vmem:[%s12635_s5 + $0x50] sm:$0xff]  ;;  %v8451_v11 = vld [vmem:[%s12635_s5 + $0x28] sm:$0xff]  ;;  %v8469_v1 = vld [vmem:[%s12635_s5 + $0x78] sm:$0xff] }
  0x28   : > { %10095 = vmatprep.subr.bf16.mxu0 %v10094_v9  ;;  %10107 = vmatprep.subr.bf16.mxu1 %v10106_v7  ;;  %v10110_v13 = vpack.c.bf16 %v8451_v11, %v8450_v10 }
  0x2a   : > { %644 = vperm.xlu1 %10632, %v631_v14   ;;  %638 = vperm.xlu0 %10631, %v629_v15   ;;  %s12634_s29 = smov %s12633_s24  ;;  %v667_v28 = vld [vmem:[%s12633_s24 + $0x8] sm:$0xff]  ;;  %s620_s24 = sand.u32 1, %s10851_s22  }
  0x2b   : > { %10097 = vmatpush3.bf16.msra.mxu0 %v10094_v9  ;;  %v666_v29 = vld [vmem:[%s12634_s29] sm:$0xff]  ;;  %v10122_v9 = vpack.c.bf16 %v8461_v8, %v8460_v6  ;;  %10109 = vmatpush3.bf16.msra.mxu1 %v10106_v7  ;;  %v1214_v14 = vld [vmem:[%s12588_s6 + $0x8] sm:$0xff]  ;;  %s8433_s26 = sshll.u32 %s620_s24, 1  ;;  %s8357_s29 = scalar_lea.sflag [#allocation3], %s620_s24 }
  0x2c   : > { %10099 = vmatprep.subr.bf16.mxu0 %v10098_v16  ;;  %v10134_v15 = vpack.c.bf16 %v1214_v14, %v1213_v12  ;;  %10111 = vmatprep.subr.bf16.mxu1 %v10110_v13  ;;  %v8478_v6 = vld [vmem:[%s12588_s6 + $0x20] sm:$0xff]  ;;  %v8479_v7 = vld [vmem:[%s12588_s6 + $0x28] sm:$0xff]  ;;  %v8480_v12 = vld [vmem:[%s12588_s6 + $0x30] sm:$0xff]  ;;  %s622_s27 = scalar_lea.vmem [#allocation2], %s8433_s26  ;;  %s12540_s21 = scalar_lea.hbm %s12641_s20, %s8812_s28 }
  0x2d   : > { %v1572_v8 = vld [vmem:[%s12589_s7] sm:$0xff]  ;;  %v10142_v10 = vpack.c.bf16 %v8479_v7, %v8478_v6  ;;  %v1574_v14 = vld [vmem:[%s12589_s7 + $0x10] sm:$0xff]  ;;  %s8370_s23 = sshll.u32 %s622_s27, 4  ;;  %s10801_s26 = sshll.u32 %s10865_s2, 4  ;;  %s12542_s23 = int_to_ptr.vmem [resolvable:$true] %s8370_s23  ;;  %s10802_s26 = int_to_ptr.vmem [resolvable:$false] %s10801_s26 }
  0x2e   : > { %p10804_p0 = scmp.lt.s32.totalorder %s12542_s23, %s10802_s26 }
  0x2f   : > { %10101 = vmatpush3.bf16.msra.mxu0 %v10098_v16 }
  0x30   : > { %10119 = vmatprep.subr.bf16.mxu0 %v10118_v3 }
  0xa5   : > { %v642_v19 = vpop.permute.xlu1 %641  ;;  %v636_v20 = vpop.permute.xlu0 %635 }
  0xa6   : > { %vm646_vm1 = vcmp.eq.s32.totalorder %v11048_v18, %v636_v20  ;;  %vm648_vm2 = vcmp.eq.s32.totalorder %v11048_v18, %v642_v19 }
  0xa7   : > { %v8436_v22 = vsel %vm646_vm1, 1.0, %v10862_v21  ;;  %v8438_v25 = vsel %vm648_vm2, 1.0, %v10862_v21 }
  0xa8   : > { %9290 = vmatprep.mubr.msk.f32.mxu0 %vm668_vm0, %v8436_v22 }
  0xa9   : > { %v645_v23 = vpop.permute.xlu1 %644  ;;  %v639_v24 = vpop.permute.xlu0 %638 }
  0xaa   : > { %vm647_vm3 = vcmp.eq.s32.totalorder %v11048_v18, %v639_v24  ;;  %vm649_vm4 = vcmp.eq.s32.totalorder %v11048_v18, %v645_v23 }
  0xab   : > { %v8437_v26 = vsel %vm647_vm3, 1.0, %v10862_v21  ;;  %v8439_v27 = vsel %vm649_vm4, 1.0, %v10862_v21 }
  0xac   : > { %9291 = vmatmul.mubr.msk.f32.vlgmr.msra.gmra.mrb[0].mxu0 %vm668_vm0, %v8437_v26 }
  0xad   : > { %9293 = vmatprep.mubr.msk.f32.mxu0 %vm668_vm0, %v8438_v25  ;;  %10121 = vmatpush3.bf16.msra.mxu0 %v10118_v3  ;;  %v8489_v3 = vld [vmem:[%s12588_s6 + $0x58] sm:$0xff] }
  0xae   : > { %10123 = vmatprep.subr.bf16.mxu0 %v10122_v9  ;;  %v10154_v5 = vpack.c.bf16 %v8489_v3, %v8488_v2 }
  0xb0   : > { %9294 = vmatmul.mubr.msk.f32.gmra.mrb[2].mxu0 %vm668_vm0, %v8439_v27 }
  0xb1   : > { %10125 = vmatpush3.bf16.msra.mxu0 %v10122_v9  ;;  %v1573_v9 = vld [vmem:[%s12589_s7 + $0x8] sm:$0xff] }
  0xb2   : > { %10135 = vmatprep.subr.bf16.mxu0 %v10134_v15  ;;  %v10166_v11 = vpack.c.bf16 %v1573_v9, %v1572_v8 }
 0x17f   : > { %v9292_v30 = vpop.f32.mrb[0].mxu0 }
 0x180   : > { %v11064_v31 = vadd.f32 %v9292_v30, %v667_v28  ;;  %v747_v32 = vpop.f32.mrb[1].mxu0 }
 0x181   : > { %v11066_v33 = vadd.f32 %v747_v32, %v666_v29  ;;  %v8444_v32 = vld [vmem:[%s12636_s30] ss:$0 sm:$0xff] }
 0x182   : > { %v772_v34 = vsel %vm768_vm5, %v11064_v31, 0.0 }
 0x183   : > { %773 = vadd.xlane.f32.xlu1 %v772_v34  ;;  %v9295_v35 = vpop.f32.mrb[2].mxu0  ;;  %v769_v36 = vsel %vm768_vm5, %v11066_v33, 0.0 }
 0x184   : > { %v757_v37 = vpop.f32.mrb[3].mxu0  ;;  %770 = vadd.xlane.f32.xlu0 %v769_v36  ;;  %v11074_v39 = vadd.f32 %v9295_v35, %v667_v28 }
 0x185   : > { %v11072_v38 = vadd.f32 %v757_v37, %v666_v29  ;;  %v8445_v37 = vld [vmem:[%s12637_s1] ss:$0 sm:$0xff]  ;;  %s10797_s1 = scalar_lea.vmem %s12542_s23, 32 }
 0x186   : > { %v778_v41 = vsel %vm768_vm5, %v11074_v39, 0.0  ;;  %p10798_p11 = scmp.ne.s32.totalorder %s12542_s23, %s10797_s1 }
 0x187   : > { %v775_v40 = vsel %vm768_vm5, %v11072_v38, 0.0 }
 0x188   : > { %776 = vadd.xlane.f32.xlu0 %v775_v40  ;;  %p10799_p12 = pnand %p10798_p11, %p11009_p5 }
 0x18a   : > { %p10800_p13 = pneg %p10799_p12 }
 0x18c   : > { %779 = vadd.xlane.f32.xlu0 %v778_v41  ;;  %v8452_v41 = vld [vmem:[%s12635_s5 + $0x30] sm:$0xff] }
 0x210   : > { %v774_v42 = vpop.xlane.xlu1 %773 }
 0x211   : > { %v783_v43 = vmul.f32 0.03125, %v774_v42  ;;  %v771_v44 = vpop.xlane.xlu0 %770 }
 0x212   : > { %v782_v45 = vmul.f32 0.03125, %v771_v44  ;;  %v1215_v44 = vld [vmem:[%s12588_s6 + $0x10] sm:$0xff] }
 0x213   : > { %v11081_v46 = vsub.f32 %v11064_v31, %v783_v43  ;;  %v8453_v43 = vld [vmem:[%s12635_s5 + $0x38] sm:$0xff] }
 0x214   : > { %v11084_v47 = vsub.f32 %v11066_v33, %v782_v45  ;;  %v1216_v45 = vld [vmem:[%s12588_s6 + $0x18] sm:$0xff] }
 0x215   : > { %v777_v48 = vpop.xlane.xlu0 %776  ;;  %v791_v49 = vmul.f32 %v11081_v46, %v11081_v46 }
 0x216   : > { %v784_v50 = vmul.f32 0.03125, %v777_v48  ;;  %v790_v51 = vmul.f32 %v11084_v47, %v11084_v47 }
 0x217   : > { %v797_v52 = vsel %vm768_vm5, %v791_v49, 0.0 }
 0x218   : > { %v11092_v53 = vsub.f32 %v11072_v38, %v784_v50  ;;  %798 = vadd.xlane.f32.xlu0 %v797_v52  ;;  %v794_v54 = vsel %vm768_vm5, %v790_v51, 0.0  ;;  %v10114_v50 = vpack.c.bf16 %v8453_v43, %v8452_v41  ;;  %v10138_v51 = vpack.c.bf16 %v1216_v45, %v1215_v44  ;;  %v8466_v52 = vld [vmem:[%s12635_s5 + $0x60] sm:$0xff]  ;;  %v8523_v43 = vld [vmem:[%s12589_s7 + $0x68] sm:$0xff]  ;;  %v8524_v45 = vld [vmem:[%s12589_s7 + $0x70] sm:$0xff] }
 0x219   : > { %795 = vadd.xlane.f32.xlu1 %v794_v54  ;;  %v780_v55 = vpop.xlane.xlu0 %779 }
 0x21a   : > { %v785_v56 = vmul.f32 0.03125, %v780_v55  ;;  %v792_v57 = vmul.f32 %v11092_v53, %v11092_v53  ;;  %v8467_v55 = vld [vmem:[%s12635_s5 + $0x68] sm:$0xff] }
 0x21c   : > { %v11098_v58 = vsub.f32 %v11074_v39, %v785_v56  ;;  %v800_v59 = vsel %vm768_vm5, %v792_v57, 0.0  ;;  %v8487_v56 = vld [vmem:[%s12588_s6 + $0x48] sm:$0xff] }
 0x21d   : > { %801 = vadd.xlane.f32.xlu1 %v800_v59 }
 0x21e   : > { %v793_v60 = vmul.f32 %v11098_v58, %v11098_v58 }
 0x220   : > { %v803_v61 = vsel %vm768_vm5, %v793_v60, 0.0 }
 0x221   : > { %804 = vadd.xlane.f32.xlu0 %v803_v61  ;;  %v10126_v61 = vpack.c.bf16 %v8467_v55, %v8466_v52 }
 0x2a5   : > { %v799_v16 = vpop.xlane.xlu0 %798 }
 0x2a6   : > { %v807_v17 = vmul.f32 0.03125, %v799_v16  ;;  %v796_v19 = vpop.xlane.xlu1 %795 }
 0x2a7   : > { %v806_v20 = vmul.f32 0.03125, %v796_v19  ;;  %v8494_v19 = vld [vmem:[%s12588_s6 + $0x60] sm:$0xff] }
 0x2a8   : > { %v811_v22 = vadd.f32 1e-05, %v807_v17 }
 0x2a9   : > { %v810_v23 = vadd.f32 1e-05, %v806_v20  ;;  %v8495_v20 = vld [vmem:[%s12588_s6 + $0x68] sm:$0xff] }
 0x2aa   : > { %10633 = vrsqrt.f32 %v811_v22  ;;  %v802_v24 = vpop.xlane.xlu1 %801  ;;  %v8514_v22 = vld [vmem:[%s12589_s7 + $0x40] sm:$0xff] }
 0x2ab   : > { %10635 = vrsqrt.f32 %v810_v23  ;;  %v808_v25 = vmul.f32 0.03125, %v802_v24  ;;  %v8515_v23 = vld [vmem:[%s12589_s7 + $0x48] sm:$0xff]  ;;  %v10158_v24 = vpack.c.bf16 %v8495_v20, %v8494_v19 }
 0x2ad   : > { %v812_v26 = vadd.f32 1e-05, %v808_v25  ;;  %v8496_v25 = vld [vmem:[%s12588_s6 + $0x70] sm:$0xff] }
 0x2ae   : > { %v805_v27 = vpop.xlane.xlu0 %804 }
 0x2af   : > { %10637 = vrsqrt.f32 %v812_v26  ;;  %v809_v28 = vmul.f32 0.03125, %v805_v27  ;;  %v8497_v26 = vld [vmem:[%s12588_s6 + $0x78] sm:$0xff]  ;;  %v10182_v27 = vpack.c.bf16 %v8515_v23, %v8514_v22 }
 0x2b1   : > { %v813_v29 = vadd.f32 1e-05, %v809_v28  ;;  %v8516_v28 = vld [vmem:[%s12589_s7 + $0x50] sm:$0xff] }
 0x2b3   : > { %10639 = vrsqrt.f32 %v813_v29  ;;  %v8517_v29 = vld [vmem:[%s12589_s7 + $0x58] sm:$0xff] }
 0x2b4   : > { %v10634_v30 = vpop.eup %10633 }
 0x2b5   : > { %v10636_v34 = vpop.eup %10635  ;;  %v819_v35 = vmul.f32 %v10634_v30, %v11081_v46  ;;  %v10162_v30 = vpack.c.bf16 %v8497_v26, %v8496_v25 }
 0x2b6   : > { %v818_v36 = vmul.f32 %v10636_v34, %v11084_v47  ;;  %v8507_v34 = vld [vmem:[%s12589_s7 + $0x28] sm:$0xff] }
 0x2b7   : > { %v829_v40 = vmul.f32 %v8444_v32, %v819_v35  ;;  %v10186_v35 = vpack.c.bf16 %v8517_v29, %v8516_v28 }
 0x2b8   : > { %v828_v42 = vmul.f32 %v8444_v32, %v818_v36 }
 0x2b9   : > { %v10638_v46 = vpop.eup %10637  ;;  %v11163_v49 = vadd.f32 %v8445_v37, %v829_v40  ;;  %v8509_v40 = vld [vmem:[%s12589_s7 + $0x38] sm:$0xff] }
 0x2ba   : > { %v11160_v47 = vadd.f32 %v8445_v37, %v828_v42  ;;  %v820_v48 = vmul.f32 %v10638_v46, %v11092_v53  ;;  %v8486_v53 = vld [vmem:[%s12588_s6 + $0x40] sm:$0xff]  ;;  %v8525_v46 = vld [vmem:[%s12589_s7 + $0x78] sm:$0xff] }
 0x2bb   : > { %v10150_v62 = vpack.c.bf16 %v8487_v56, %v8486_v53  ;;  %v8522_v42 = vld [vmem:[%s12589_s7 + $0x60] sm:$0xff] }
 0x2bc   : > { %v830_v54 = vmul.f32 %v8444_v32, %v820_v48  ;;  %9304 = vmatprep.mubr.msk.f32.mxu1 %vm768_vm5, %v11160_v47  ;;  %9332 = vmatprep.mubr.msk.f32.mxu0 %vm768_vm5, %v11160_v47  ;;  %v10190_v44 = vpack.c.bf16 %v8523_v43, %v8522_v42  ;;  %v10194_v48 = vpack.c.bf16 %v8525_v46, %v8524_v45 }
 0x2bd   : > { %v10640_v57 = vpop.eup %10639  ;;  %9305 = vmatmul.mubr.msk.f32.vlgmr.msra.gmra.mrb[0].mxu1 %vm768_vm5, %v11163_v49  ;;  %9333 = vmatmul.mubr.msk.f32.vlgmr.msra.gmra.mrb[4].mxu0 %vm768_vm5, %v11163_v49 }
 0x2be   : > { %v11185_v59 = vadd.f32 %v8445_v37, %v830_v54  ;;  %v821_v60 = vmul.f32 %v10640_v57, %v11098_v58  ;;  %10113 = vmatpush3.bf16.msra.mxu1 %v10110_v13  ;;  %10137 = vmatpush3.bf16.msra.mxu0 %v10134_v15  ;;  %v8468_v58 = vld [vmem:[%s12635_s5 + $0x70] sm:$0xff]  ;;  %v8481_v13 = vld [vmem:[%s12588_s6 + $0x38] sm:$0xff] }
 0x2bf   : > { %10115 = vmatprep.subr.bf16.mxu1 %v10114_v50  ;;  %10139 = vmatprep.subr.bf16.mxu0 %v10138_v51  ;;  %v10130_v4 = vpack.c.bf16 %v8469_v1, %v8468_v58  ;;  %v1575_v15 = vld [vmem:[%s12589_s7 + $0x18] sm:$0xff]  ;;  %v10146_v16 = vpack.c.bf16 %v8481_v13, %v8480_v12 }
 0x2c0   : > { %v831_v63 = vmul.f32 %v8444_v32, %v821_v60  ;;  %9307 = vmatprep.mubr.msk.f32.mxu1 %vm768_vm5, %v11185_v59  ;;  %9335 = vmatprep.mubr.msk.f32.mxu0 %vm768_vm5, %v11185_v59  ;;  %v10170_v17 = vpack.c.bf16 %v1575_v15, %v1574_v14  ;;  %v8506_v32 = vld [vmem:[%s12589_s7 + $0x20] sm:$0xff] }
 0x2c1   : > { %v10174_v36 = vpack.c.bf16 %v8507_v34, %v8506_v32 }
 0x2c2   : > { %v11192_v0 = vadd.f32 %v8445_v37, %v831_v63  ;;  %10117 = vmatpush3.bf16.msra.mxu1 %v10114_v50  ;;  %10141 = vmatpush3.bf16.msra.mxu0 %v10138_v51  ;;  %v8508_v37 = vld [vmem:[%s12589_s7 + $0x30] sm:$0xff] }
 0x2c3   : > { %10127 = vmatprep.subr.bf16.mxu1 %v10126_v61  ;;  %10151 = vmatprep.subr.bf16.mxu0 %v10150_v62  ;;  %v10178_v41 = vpack.c.bf16 %v8509_v40, %v8508_v37 }
 0x2c4   : > { %9308 = vmatmul.mubr.msk.f32.gmra.mrb[2].mxu1 %vm768_vm5, %v11192_v0  ;;  %9336 = vmatmul.mubr.msk.f32.gmra.mrb[6].mxu0 %vm768_vm5, %v11192_v0 }
 0x2c5   : > { %9318 = vmatprep.mubr.msk.f32.mxu1 %vm768_vm5, %v11160_v47  ;;  %9360 = vmatprep.mubr.msk.f32.mxu0 %vm768_vm5, %v11160_v47 }
 0x2c8   : > { %9319 = vmatmul.mubr.msk.f32.vlgmr.msra.gmra.mrb[4].mxu1 %vm768_vm5, %v11163_v49  ;;  %9361 = vmatmul.mubr.msk.f32.vlgmr.msra.gmra.mrb[8].mxu0 %vm768_vm5, %v11163_v49 }
 0x2c9   : > { %10129 = vmatpush3.bf16.msra.mxu1 %v10126_v61  ;;  %9321 = vmatprep.mubr.msk.f32.mxu1 %vm768_vm5, %v11185_v59 }
 0x2ca   : > { %9363 = vmatprep.mubr.msk.f32.mxu0 %vm768_vm5, %v11185_v59  ;;  %10153 = vmatpush3.bf16.msra.mxu0 %v10150_v62 }
 0x2cb   : > { %10131 = vmatprep.subr.bf16.mxu1 %v10130_v4  ;;  %10155 = vmatprep.subr.bf16.mxu0 %v10154_v5 }
 0x2cc   : > { %9322 = vmatmul.mubr.msk.f32.gmra.mrb[6].mxu1 %vm768_vm5, %v11192_v0  ;;  %9364 = vmatmul.mubr.msk.f32.gmra.mrb[10].mxu0 %vm768_vm5, %v11192_v0 }
 0x2cd   : > { %10133 = vmatpush3.bf16.msra.mxu1 %v10130_v4  ;;  %9346 = vmatprep.mubr.msk.f32.mxu1 %vm768_vm5, %v11160_v47 }
 0x2ce   : > { %10157 = vmatpush3.bf16.msra.mxu0 %v10154_v5  ;;  %9388 = vmatprep.mubr.msk.f32.mxu0 %vm768_vm5, %v11160_v47 }
 0x2cf   : > { %10143 = vmatprep.subr.bf16.mxu1 %v10142_v10  ;;  %10167 = vmatprep.subr.bf16.mxu0 %v10166_v11 }
 0x2d0   : > { %9347 = vmatmul.mubr.msk.f32.vlgmr.msra.gmra.mrb[8].mxu1 %vm768_vm5, %v11163_v49 }
 0x2d1   : > { %10145 = vmatpush3.bf16.msra.mxu1 %v10142_v10  ;;  %9389 = vmatmul.mubr.msk.f32.vlgmr.msra.gmra.mrb[12].mxu0 %vm768_vm5, %v11163_v49 }
 0x2d2   : > { %9349 = vmatprep.mubr.msk.f32.mxu1 %vm768_vm5, %v11185_v59  ;;  %9391 = vmatprep.mubr.msk.f32.mxu0 %vm768_vm5, %v11185_v59 }
 0x2d3   : > { %10169 = vmatpush3.bf16.msra.mxu0 %v10166_v11  ;;  %10147 = vmatprep.subr.bf16.mxu1 %v10146_v16 }
 0x2d4   : > { %9350 = vmatmul.mubr.msk.f32.gmra.mrb[10].mxu1 %vm768_vm5, %v11192_v0  ;;  %10171 = vmatprep.subr.bf16.mxu0 %v10170_v17 }
 0x2d5   : > { %10149 = vmatpush3.bf16.msra.mxu1 %v10146_v16  ;;  %9392 = vmatmul.mubr.msk.f32.gmra.mrb[14].mxu0 %vm768_vm5, %v11192_v0 }
 0x2d6   : > { %9374 = vmatprep.mubr.msk.f32.mxu1 %vm768_vm5, %v11160_v47  ;;  %9416 = vmatprep.mubr.msk.f32.mxu0 %vm768_vm5, %v11160_v47 }
 0x2d7   : > { %10173 = vmatpush3.bf16.msra.mxu0 %v10170_v17  ;;  %10159 = vmatprep.subr.bf16.mxu1 %v10158_v24 }
 0x2d8   : > { %9375 = vmatmul.mubr.msk.f32.vlgmr.msra.gmra.mrb[12].mxu1 %vm768_vm5, %v11163_v49  ;;  %10183 = vmatprep.subr.bf16.mxu0 %v10182_v27 }
 0x2d9   : > { %9377 = vmatprep.mubr.msk.f32.mxu1 %vm768_vm5, %v11185_v59  ;;  %10161 = vmatpush3.bf16.msra.mxu1 %v10158_v24 }
 0x2da   : > { %9417 = vmatmul.mubr.msk.f32.vlgmr.msra.gmra.mrb[16].mxu0 %vm768_vm5, %v11163_v49  ;;  %10163 = vmatprep.subr.bf16.mxu1 %v10162_v30 }
 0x2db   : > { %9419 = vmatprep.mubr.msk.f32.mxu0 %vm768_vm5, %v11185_v59  ;;  %10185 = vmatpush3.bf16.msra.mxu0 %v10182_v27 }
 0x2dc   : > { %9378 = vmatmul.mubr.msk.f32.gmra.mrb[14].mxu1 %vm768_vm5, %v11192_v0  ;;  %10187 = vmatprep.subr.bf16.mxu0 %v10186_v35 }
 0x2dd   : > { %10165 = vmatpush3.bf16.msra.mxu1 %v10162_v30  ;;  %9402 = vmatprep.mubr.msk.f32.mxu1 %vm768_vm5, %v11160_v47 }
 0x2de   : > { %9420 = vmatmul.mubr.msk.f32.gmra.mrb[18].mxu0 %vm768_vm5, %v11192_v0  ;;  %10175 = vmatprep.subr.bf16.mxu1 %v10174_v36 }
 0x2df   : > { %10189 = vmatpush3.bf16.msra.mxu0 %v10186_v35  ;;  %9444 = vmatprep.mubr.msk.f32.mxu0 %vm768_vm5, %v11160_v47 }
 0x2e0   : > { %9403 = vmatmul.mubr.msk.f32.vlgmr.msra.gmra.mrb[16].mxu1 %vm768_vm5, %v11163_v49 }
 0x2e1   : > { %9405 = vmatprep.mubr.msk.f32.mxu1 %vm768_vm5, %v11185_v59  ;;  %10177 = vmatpush3.bf16.msra.mxu1 %v10174_v36 }
 0x2e2   : > { %9445 = vmatmul.mubr.msk.f32.vlgmr.msra.gmra.mrb[20].mxu0 %vm768_vm5, %v11163_v49  ;;  %10179 = vmatprep.subr.bf16.mxu1 %v10178_v41 }
 0x2e3   : > { %9447 = vmatprep.mubr.msk.f32.mxu0 %vm768_vm5, %v11185_v59 }
 0x2e4   : > { %9406 = vmatmul.mubr.msk.f32.gmra.mrb[18].mxu1 %vm768_vm5, %v11192_v0 }
 0x2e5   : > { %10181 = vmatpush3.bf16.msra.mxu1 %v10178_v41  ;;  %9430 = vmatprep.mubr.msk.f32.mxu1 %vm768_vm5, %v11160_v47 }
 0x2e6   : > { %9448 = vmatmul.mubr.msk.f32.gmra.mrb[22].mxu0 %vm768_vm5, %v11192_v0  ;;  %10191 = vmatprep.subr.bf16.mxu1 %v10190_v44 }
 0x2e8   : > { %9431 = vmatmul.mubr.msk.f32.vlgmr.msra.gmra.mrb[20].mxu1 %vm768_vm5, %v11163_v49 }
 0x2e9   : > { %9433 = vmatprep.mubr.msk.f32.mxu1 %vm768_vm5, %v11185_v59  ;;  %10193 = vmatpush3.bf16.msra.mxu1 %v10190_v44 }
 0x2ea   : > { %10195 = vmatprep.subr.bf16.mxu1 %v10194_v48 }
 0x2ec   : > { %9434 = vmatmul.mubr.msk.f32.gmra.mrb[22].mxu1 %vm768_vm5, %v11192_v0 }
 0x2ed   : > { %10197 = vmatpush3.bf16.msra.mxu1 %v10194_v48  ;;  %9458 = vmatprep.mubr.msk.f32.mxu1 %vm768_vm5, %v11160_v47 }
 0x2f0   : > { %9459 = vmatmul.mubr.msk.f32.vlgmr.msra.gmra.mrb[24].mxu1 %vm768_vm5, %v11163_v49 }
 0x2f1   : > { %9461 = vmatprep.mubr.msk.f32.mxu1 %vm768_vm5, %v11185_v59 }
 0x2f4   : > { %9462 = vmatmul.mubr.msk.f32.gmra.mrb[26].mxu1 %vm768_vm5, %v11192_v0 }
 0x390   : > { %v9306_v50 = vpop.f32.mrb[0].mxu1  ;;  %v11362_v51 = vpop.f32.mrb[4].mxu0 }
 0x391   : > { %v924_v52 = vpop.f32.mrb[1].mxu1  ;;  %v1104_v54 = vpop.f32.mrb[5].mxu0 }
 0x392   : > { %9468 = vmatprep.mubr.msk.f32.mxu0 %vm1931_vm6, %v924_v52 }
 0x397   : > { %v11365_v55 = vpop.f32.mrb[2].mxu1  ;;  %v11367_v47 = vpop.f32.mrb[6].mxu0 }
 0x398   : > { %v11369_v53 = vpop.f32.mrb[3].mxu1  ;;  %v11371_v49 = vpop.f32.mrb[7].mxu0 }
 0x39b   : > { %v9320_v56 = vpop.f32.mrb[4].mxu1  ;;  %v9362_v57 = vpop.f32.mrb[8].mxu0 }
 0x39c   : > { %v1014_v59 = vpop.f32.mrb[5].mxu1  ;;  %v1283_v60 = vpop.f32.mrb[9].mxu0 }
 0x39d   : > { %v10198_v62 = vpack.c.bf16 %v9362_v57, %v1283_v60 }
 0x39f   : > { %v11379_v63 = vpop.f32.mrb[6].mxu1  ;;  %v9365_v0 = vpop.f32.mrb[10].mxu0  ;;  %10200 = vmatprep.subr.msk.bf16.mxu0 %vm11375_vm7, %v10198_v62 }
 0x3a0   : > { %v11383_v58 = vpop.f32.mrb[7].mxu1  ;;  %v1293_v1 = vpop.f32.mrb[11].mxu0  ;;  %10203 = vmatpush3.bf16.xpose.msk.msra.mxu0 %vm11375_vm7, %v10198_v62 }
 0x3a1   : > { %v11387_v2 = vpack.c.bf16 %v9365_v0, %v1293_v1 }
 0x3a3   : > { %v9348_v3 = vpop.f32.mrb[8].mxu1 }
 0x3a4   : > { %v9390_v4 = vpop.f32.mrb[12].mxu0  ;;  %v1194_v5 = vpop.f32.mrb[9].mxu1 }
 0x3a5   : > { %v1463_v6 = vpop.f32.mrb[13].mxu0 }
 0x3a6   : > { %v10218_v7 = vpack.c.bf16 %v9390_v4, %v1463_v6 }
 0x3a7   : > { %v11389_v8 = vpop.f32.mrb[10].mxu1  ;;  %9469 = vmatmul.mubr.msk.f32.vlgmr.msra.gmra.mrb[24].mxu0 %vm1931_vm6, %v9306_v50 }
 0x3a8   : > { %v9393_v9 = vpop.f32.mrb[14].mxu0  ;;  %v11392_v10 = vpop.f32.mrb[11].mxu1  ;;  %9482 = vmatprep.mubr.msk.f32.mxu0 %vm1931_vm6, %v1014_v59 }
 0x3a9   : > { %v1473_v11 = vpop.f32.mrb[15].mxu0 }
 0x3aa   : > { %v10258_v12 = vpack.c.bf16 %v9393_v9, %v1473_v11 }
 0x3ab   : > { %v9376_v13 = vpop.f32.mrb[12].mxu1 }
 0x3ac   : > { %v1373_v14 = vpop.f32.mrb[13].mxu1 }
 0x3ad   : > { %v9418_v15 = vpop.f32.mrb[16].mxu0  ;;  %v10208_v16 = vpack.c.bf16 %v9376_v13, %v1373_v14 }
 0x3ae   : > { %v1642_v17 = vpop.f32.mrb[17].mxu0 }
 0x3af   : > { %v10204_v19 = vpack.c.bf16 %v9418_v15, %v1642_v17  ;;  %v9379_v20 = vpop.f32.mrb[14].mxu1  ;;  %10210 = vmatprep.subr.msk.bf16.mxu0 %vm11375_vm7, %v10208_v16 }
 0x3b0   : > { %v1383_v22 = vpop.f32.mrb[15].mxu1  ;;  %10213 = vmatpush3.bf16.xpose.msk.msra.mxu0 %vm11375_vm7, %v10208_v16 }
 0x3b1   : > { %v9421_v23 = vpop.f32.mrb[18].mxu0  ;;  %10205 = vmatprep.subr.bf16.mxu1 %v10204_v19  ;;  %v10248_v24 = vpack.c.bf16 %v9379_v20, %v1383_v22  ;;  %10220 = vmatprep.subr.msk.bf16.mxu0 %vm11375_vm7, %v10218_v7 }
 0x3b2   : > { %v1652_v25 = vpop.f32.mrb[19].mxu0  ;;  %10207 = vmatpush3.bf16.msra.mxu1 %v10204_v19 }
 0x3b3   : > { %v11401_v26 = vpack.c.bf16 %v9421_v23, %v1652_v25  ;;  %v9404_v27 = vpop.f32.mrb[16].mxu1 }
 0x3b4   : > { %v1553_v28 = vpop.f32.mrb[17].mxu1 }
 0x3b5   : > { %v9446_v29 = vpop.f32.mrb[20].mxu0  ;;  %v10228_v30 = vpack.c.bf16 %v9404_v27, %v1553_v28 }
 0x3b6   : > { %v1822_v32 = vpop.f32.mrb[21].mxu0 }
 0x3b7   : > { %v11403_v34 = vpack.c.bf16 %v9446_v29, %v1822_v32  ;;  %v9407_v35 = vpop.f32.mrb[18].mxu1  ;;  %9483 = vmatmul.mubr.msk.f32.vlgmr.msra.gmra.mrb[26].mxu0 %vm1931_vm6, %v9320_v56 }
 0x3b8   : > { %v1563_v36 = vpop.f32.mrb[19].mxu1  ;;  %10223 = vmatpush3.bf16.xpose.msk.msra.mxu0 %vm11375_vm7, %v10218_v7  ;;  %9506 = vmatprep.mubr.msk.f32.mxu0 %vm1931_vm6, %v1104_v54 }
 0x3b9   : > { %v9449_v37 = vpop.f32.mrb[22].mxu0  ;;  %v10268_v40 = vpack.c.bf16 %v9407_v35, %v1563_v36  ;;  %10230 = vmatprep.subr.msk.bf16.mxu0 %vm11375_vm7, %v10228_v30 }
 0x3ba   : > { %v1832_v41 = vpop.f32.mrb[23].mxu0 }
 0x3bb   : > { %v11411_v42 = vpack.c.bf16 %v9449_v37, %v1832_v41  ;;  %v9432_v43 = vpop.f32.mrb[20].mxu1 }
 0x3bc   : > { %v1732_v44 = vpop.f32.mrb[21].mxu1 }
 0x3bd   : > { %v11413_v45 = vpack.c.bf16 %v9432_v43, %v1732_v44 }
 0x3bf   : > { %v9435_v46 = vpop.f32.mrb[22].mxu1  ;;  %10215 = vmatprep.subr.bf16.mxu1 %v11413_v45  ;;  %9507 = vmatmul.mubr.msk.f32.vlgmr.msra.gmra.mrb[28].mxu0 %vm1931_vm6, %v11362_v51 }
 0x3c0   : > { %v1742_v48 = vpop.f32.mrb[23].mxu1  ;;  %10233 = vmatpush3.bf16.xpose.msk.msra.mxu0 %vm11375_vm7, %v10228_v30  ;;  %9525 = vmatprep.mubr.msk.f32.mxu0 %vm1931_vm6, %v1194_v5 }
 0x3c1   : > { %v11421_v50 = vpack.c.bf16 %v9435_v46, %v1742_v48  ;;  %10240 = vmatprep.subr.msk.bf16.mxu0 %vm11375_vm7, %v11387_v2 }
 0x3c3   : > { %v9460_v52 = vpop.f32.mrb[24].mxu1 }
 0x3c4   : > { %v1912_v54 = vpop.f32.mrb[25].mxu1 }
 0x3c5   : > { %v11426_v56 = vpack.c.bf16 %v9460_v52, %v1912_v54 }
 0x3c7   : > { %v9463_v57 = vpop.f32.mrb[26].mxu1  ;;  %9526 = vmatmul.mubr.msk.f32.vlgmr.msra.gmra.mrb[30].mxu0 %vm1931_vm6, %v9348_v3 }
 0x3c8   : > { %v1922_v51 = vpop.f32.mrb[27].mxu1  ;;  %10243 = vmatpush3.bf16.xpose.msk.msra.mxu0 %vm11375_vm7, %v11387_v2  ;;  %9544 = vmatprep.mubr.msk.f32.mxu0 %vm1931_vm6, %v11369_v53 }
 0x3c9   : > { %v11434_v59 = vpack.c.bf16 %v9463_v57, %v1922_v51  ;;  %10250 = vmatprep.subr.msk.bf16.mxu0 %vm11375_vm7, %v10248_v24 }
 0x3cf   : > { %9545 = vmatmul.mubr.msk.f32.vlgmr.msra.gmra.mrb[32].mxu0 %vm1931_vm6, %v11365_v55 }
 0x3d0   : > { %10253 = vmatpush3.bf16.xpose.msk.msra.mxu0 %vm11375_vm7, %v10248_v24  ;;  %9558 = vmatprep.mubr.msk.f32.mxu0 %vm1931_vm6, %v11383_v58 }
 0x3d1   : > { %10260 = vmatprep.subr.msk.bf16.mxu0 %vm11375_vm7, %v10258_v12 }
 0x3d7   : > { %9559 = vmatmul.mubr.msk.f32.vlgmr.msra.gmra.mrb[34].mxu0 %vm1931_vm6, %v11379_v63 }
 0x3d8   : > { %10263 = vmatpush3.bf16.xpose.msk.msra.mxu0 %vm11375_vm7, %v10258_v12  ;;  %9582 = vmatprep.mubr.msk.f32.mxu0 %vm1931_vm6, %v11371_v49 }
 0x3d9   : > { %10270 = vmatprep.subr.msk.bf16.mxu0 %vm11375_vm7, %v10268_v40 }
 0x3df   : > { %9583 = vmatmul.mubr.msk.f32.vlgmr.msra.gmra.mrb[36].mxu0 %vm1931_vm6, %v11367_v47 }
 0x3e0   : > { %10273 = vmatpush3.bf16.xpose.msk.msra.mxu0 %vm11375_vm7, %v10268_v40  ;;  %9601 = vmatprep.mubr.msk.f32.mxu0 %vm1931_vm6, %v11392_v10 }
 0x3e7   : > { %9602 = vmatmul.mubr.msk.f32.vlgmr.msra.gmra.mrb[38].mxu0 %vm1931_vm6, %v11389_v8 }
 0x47a   : > { %v9470_v55 = vpop.f32.mrb[24].mxu0 }
 0x47b   : > { %v2020_v53 = vmul.f32 0.35355338, %v9470_v55  ;;  %v2010_v60 = vpop.f32.mrb[25].mxu0 }
 0x47c   : > { %v2019_v49 = vmul.f32 0.35355338, %v2010_v60 }
 0x47d   : > { %v2025_v62 = vsel %vm2021_vm8, %v2020_v53, -inf }
 0x47e   : > { %2026 = vmax.xlane.f32.xlu0 %v2025_v62  ;;  %v2022_v63 = vsel %vm2021_vm8, %v2019_v49, -inf }
 0x47f   : > { %2023 = vmax.xlane.f32.xlu1 %v2022_v63 }
 0x48a   : > { %v9484_v47 = vpop.f32.mrb[26].mxu0 }
 0x48b   : > { %v2214_v0 = vmul.f32 0.35355338, %v9484_v47  ;;  %v2204_v58 = vpop.f32.mrb[27].mxu0 }
 0x48c   : > { %v2213_v1 = vmul.f32 0.35355338, %v2204_v58 }
 0x48d   : > { %v2218_v2 = vsel %vm2021_vm8, %v2214_v0, -inf }
 0x48e   : > { %2219 = vmax.xlane.f32.xlu0 %v2218_v2  ;;  %v2215_v3 = vsel %vm2021_vm8, %v2213_v1, -inf }
 0x48f   : > { %2216 = vmax.xlane.f32.xlu1 %v2215_v3 }
 0x492   : > { %v9508_v4 = vpop.f32.mrb[28].mxu0 }
 0x493   : > { %v2560_v5 = vpop.f32.mrb[29].mxu0  ;;  %v2570_v43 = vmul.f32 0.35355338, %v9508_v4 }
 0x494   : > { %v2569_v46 = vmul.f32 0.35355338, %v2560_v5 }
 0x495   : > { %v2574_v52 = vsel %vm2021_vm8, %v2570_v43, -inf }
 0x496   : > { %v2571_v54 = vsel %vm2021_vm8, %v2569_v46, -inf }
 0x49a   : > { %v11466_v6 = vpop.f32.mrb[30].mxu0 }
 0x49b   : > { %v11468_v7 = vpop.f32.mrb[31].mxu0 }
 0x4a2   : > { %v11470_v8 = vpop.f32.mrb[32].mxu0 }
 0x4a3   : > { %v11472_v9 = vpop.f32.mrb[33].mxu0 }
 0x4aa   : > { %v11474_v10 = vpop.f32.mrb[34].mxu0 }
 0x4ab   : > { %v11476_v11 = vpop.f32.mrb[35].mxu0 }
 0x4b2   : > { %v11478_v12 = vpop.f32.mrb[36].mxu0 }
 0x4b3   : > { %v11480_v13 = vpop.f32.mrb[37].mxu0 }
 0x4ba   : > { %v11482_v14 = vpop.f32.mrb[38].mxu0 }
 0x4bb   : > { %v11484_v15 = vpop.f32.mrb[39].mxu0 }
 0x50b   : > { %v2027_v16 = vpop.xlane.xlu0 %2026 }
 0x50c   : > { %v2029_v17 = vsub.f32 %v2020_v53, %v2027_v16  ;;  %v2024_v19 = vpop.xlane.xlu1 %2023 }
 0x50d   : > { %v2028_v20 = vsub.f32 %v2019_v49, %v2024_v19 }
 0x50e   : > { %v2032_v22 = vmul.f32 1.442695, %v2029_v17 }
 0x50f   : > { %v2030_v23 = vmul.f32 1.442695, %v2028_v20  ;;  %v2847_v20 = vmul.f32 0.35355338, %v11466_v6  ;;  %v11516_v6 = vld [vmem:[%s12590_s8] sm:$0xff] }
 0x510   : > { %10641 = vpow2.f32 %v2032_v22 }
 0x511   : > { %10643 = vpow2.f32 %v2030_v23  ;;  %v2846_v23 = vmul.f32 0.35355338, %v11468_v7 }
 0x51a   : > { %v10642_v24 = vpop.eup %10641 }
 0x51b   : > { %v10644_v25 = vpop.eup %10643  ;;  %v2220_v27 = vpop.xlane.xlu0 %2219  ;;  %v2037_v28 = vsel %vm2021_vm8, %v10642_v24, 0.0 }
 0x51c   : > { %v2222_v29 = vsub.f32 %v2214_v0, %v2220_v27  ;;  %2038 = vadd.xlane.f32.xlu0 %v2037_v28  ;;  %v2217_v30 = vpop.xlane.xlu1 %2216  ;;  %v2034_v32 = vsel %vm2021_vm8, %v10644_v25, 0.0  ;;  %v2848_v27 = vsel %vm2021_vm8, %v2846_v23, -inf  ;;  %v11509_v28 = vld [vmem:[%s12590_s8 + $0x8] sm:$0xff] }
 0x51d   : > { %v2221_v35 = vsub.f32 %v2213_v1, %v2217_v30  ;;  %2035 = vadd.xlane.f32.xlu1 %v2034_v32 }
 0x51e   : > { %v2225_v36 = vmul.f32 1.442695, %v2222_v29 }
 0x51f   : > { %v2223_v37 = vmul.f32 1.442695, %v2221_v35 }
 0x520   : > { %10645 = vpow2.f32 %v2225_v36 }
 0x521   : > { %10647 = vpow2.f32 %v2223_v37 }
 0x52a   : > { %v10646_v40 = vpop.eup %10645 }
 0x52b   : > { %v10648_v41 = vpop.eup %10647  ;;  %v2230_v44 = vsel %vm2021_vm8, %v10646_v40, 0.0 }
 0x52c   : > { %2231 = vadd.xlane.f32.xlu0 %v2230_v44  ;;  %v2227_v48 = vsel %vm2021_vm8, %v10648_v41, 0.0  ;;  %v3124_v44 = vmul.f32 0.35355338, %v11470_v8 }
 0x52d   : > { %2228 = vadd.xlane.f32.xlu1 %v2227_v48  ;;  %v3123_v48 = vmul.f32 0.35355338, %v11472_v9 }
 0x530   : > { %2575 = vmax.xlane.f32.xlu0 %v2574_v52 }
 0x531   : > { %2572 = vmax.xlane.f32.xlu1 %v2571_v54  ;;  %v3316_v54 = vmul.f32 0.35355338, %v11474_v10 }
 0x533   : > { %v3320_v8 = vsel %vm2021_vm8, %v3316_v54, -inf }
 0x5a9   : > { %v2039_v57 = vpop.xlane.xlu0 %2038 }
 0x5aa   : > { %10649 = vrcp.f32 %v2039_v57  ;;  %v2036_v51 = vpop.xlane.xlu1 %2035  ;;  %v3128_v57 = vsel %vm2021_vm8, %v3124_v44, -inf }
 0x5ab   : > { %10651 = vrcp.f32 %v2036_v51  ;;  %v3315_v51 = vmul.f32 0.35355338, %v11476_v11 }
 0x5ad   : > { %v3317_v9 = vsel %vm2021_vm8, %v3315_v51, -inf }
 0x5b4   : > { %v10650_v55 = vpop.eup %10649 }
 0x5b5   : > { %v10652_v53 = vpop.eup %10651  ;;  %v2043_v49 = vmul.f32 %v10650_v55, %v10642_v24  ;;  %v3125_v55 = vsel %vm2021_vm8, %v3123_v48, -inf }
 0x5b6   : > { %v2042_v60 = vmul.f32 %v10652_v53, %v10644_v25  ;;  %v2851_v25 = vsel %vm2021_vm8, %v2847_v20, -inf }
 0x5b8   : > { %9475 = vmatprep.mubr.msk.f32.mxu1 %vm2021_vm8, %v2042_v60 }
 0x5b9   : > { %v2232_v62 = vpop.xlane.xlu0 %2231  ;;  %9476 = vmatmul.mubr.msk.f32.vlgmr.msra.gmra.mrb[28].mxu1 %vm2021_vm8, %v2043_v49 }
 0x5ba   : > { %10653 = vrcp.f32 %v2232_v62  ;;  %10217 = vmatpush3.bf16.msra.mxu1 %v11413_v45  ;;  %v2229_v63 = vpop.xlane.xlu1 %2228 }
 0x5bb   : > { %10655 = vrcp.f32 %v2229_v63  ;;  %9492 = vmatprep.subr.mxu1 %v11509_v28 }
 0x5bd   : > { %v2576_v47 = vpop.xlane.xlu0 %2575 }
 0x5be   : > { %v2578_v0 = vsub.f32 %v2570_v43, %v2576_v47  ;;  %v2573_v58 = vpop.xlane.xlu1 %2572  ;;  %v11543_v47 = vld [vmem:[%s12590_s8 + $0x10] sm:$0xff] }
 0x5bf   : > { %v2577_v1 = vsub.f32 %v2569_v46, %v2573_v58 }
 0x5c0   : > { %v2581_v2 = vmul.f32 1.442695, %v2578_v0 }
 0x5c1   : > { %v2579_v3 = vmul.f32 1.442695, %v2577_v1 }
 0x5c2   : > { %10657 = vpow2.f32 %v2581_v2 }
 0x5c3   : > { %10659 = vpow2.f32 %v2579_v3 }
 0x5c4   : > { %v10654_v4 = vpop.eup %10653 }
 0x5c5   : > { %v10656_v5 = vpop.eup %10655  ;;  %v2236_v17 = vmul.f32 %v10654_v4, %v10646_v40 }
 0x5c6   : > { %v2235_v16 = vmul.f32 %v10656_v5, %v10648_v41 }
 0x5c8   : > { %9489 = vmatprep.mubr.msk.f32.mxu1 %vm2021_vm8, %v2235_v16 }
 0x5c9   : > { %9490 = vmatmul.mubr.msk.f32.vlgmr.msra.gmra.mrb[30].mxu1 %vm2021_vm8, %v2236_v17 }
 0x5ca   : > { %9493 = vmatpush3.msra.mxu1 %v11509_v28 }
 0x5cb   : > { %9497 = vmatprep.subr.mxu1 %v11516_v6 }
 0x5cc   : > { %v11497_v19 = vpop.eup %10657 }
 0x5cd   : > { %v10660_v45 = vpop.eup %10659  ;;  %v2586_v22 = vsel %vm2021_vm8, %v11497_v19, 0.0 }
 0x5ce   : > { %2587 = vadd.xlane.f32.xlu0 %v2586_v22  ;;  %v2583_v24 = vsel %vm2021_vm8, %v10660_v45, 0.0 }
 0x5cf   : > { %2584 = vadd.xlane.f32.xlu1 %v2583_v24 }
 0x5d2   : > { %2852 = vmax.xlane.f32.xlu0 %v2851_v25 }
 0x5d3   : > { %2849 = vmax.xlane.f32.xlu1 %v2848_v27 }
 0x65b   : > { %v2588_v7 = vpop.xlane.xlu0 %2587 }
 0x65c   : > { %v2585_v29 = vpop.xlane.xlu1 %2584 }
 0x65f   : > { %v2853_v30 = vpop.xlane.xlu0 %2852 }
 0x660   : > { %v2855_v32 = vsub.f32 %v2847_v20, %v2853_v30  ;;  %v2850_v35 = vpop.xlane.xlu1 %2849 }
 0x661   : > { %v2854_v36 = vsub.f32 %v2846_v23, %v2850_v35 }
 0x662   : > { %v2858_v37 = vmul.f32 1.442695, %v2855_v32  ;;  %v3670_v32 = vmul.f32 0.35355338, %v11478_v12 }
 0x663   : > { %v2856_v40 = vmul.f32 1.442695, %v2854_v36  ;;  %v3669_v36 = vmul.f32 0.35355338, %v11480_v13 }
 0x664   : > { %10661 = vpow2.f32 %v2858_v37 }
 0x665   : > { %10663 = vpow2.f32 %v2856_v40  ;;  %v3674_v40 = vsel %vm2021_vm8, %v3670_v32, -inf }
 0x666   : > { %10665 = vrcp.f32 %v2585_v29 }
 0x667   : > { %10667 = vrcp.f32 %v2588_v7 }
 0x66e   : > { %v11519_v41 = vpop.eup %10661 }
 0x66f   : > { %v11521_v43 = vpop.eup %10663  ;;  %v2863_v46 = vsel %vm2021_vm8, %v11519_v41, 0.0 }
 0x670   : > { %2864 = vadd.xlane.f32.xlu0 %v2863_v46  ;;  %v2860_v52 = vsel %vm2021_vm8, %v11521_v43, 0.0  ;;  %v10666_v11 = vpop.eup %10665 }
 0x671   : > { %2861 = vadd.xlane.f32.xlu1 %v2860_v52  ;;  %v10668_v62 = vpop.eup %10667  ;;  %v2591_v63 = vmul.f32 %v10666_v11, %v10660_v45 }
 0x672   : > { %v2592_v0 = vmul.f32 %v10668_v62, %v11497_v19  ;;  %v3945_v62 = vmul.f32 0.35355338, %v11482_v14 }
 0x674   : > { %3129 = vmax.xlane.f32.xlu0 %v3128_v57 }
 0x675   : > { %3126 = vmax.xlane.f32.xlu1 %v3125_v55 }
 0x678   : > { %3321 = vmax.xlane.f32.xlu0 %v3320_v8 }
 0x679   : > { %3318 = vmax.xlane.f32.xlu1 %v3317_v9 }
 0x68c   : > { %v9477_v53 = vpop.f32.mrb[28].mxu1 }
 0x68d   : > { %v2116_v60 = vpop.f32.mrb[29].mxu1 }
 0x69c   : > { %v9491_v49 = vpop.f32.mrb[30].mxu1 }
 0x69d   : > { %v2309_v10 = vpop.f32.mrb[31].mxu1 }
 0x69e   : > { %9494 = vmatprep.mubr.msk.f32.mxu1 %vm1931_vm6, %v2309_v10 }
 0x69f   : > { %9495 = vmatmul.mubr.msk.f32.vlgmr.msra.gmra.mrb[32].mxu1 %vm1931_vm6, %v9491_v49 }
 0x6a0   : > { %9498 = vmatpush3.msra.mxu1 %v11516_v6  ;;  %9499 = vmatprep.mubr.msk.f32.mxu1 %vm1931_vm6, %v2116_v60 }
 0x6a1   : > { %10225 = vmatprep.subr.bf16.mxu1 %v11403_v34 }
 0x6a7   : > { %9500 = vmatmul.mubr.msk.f32.vlgmr.msra.gmra.mrb[32].mxu1 %vm1931_vm6, %v9477_v53 }
 0x6a8   : > { %10227 = vmatpush3.bf16.msra.mxu1 %v11403_v34  ;;  %9513 = vmatprep.mubr.msk.f32.mxu1 %vm2021_vm8, %v2591_v63 }
 0x6a9   : > { %9516 = vmatprep.subr.mxu1 %v11543_v47 }
 0x6ab   : > { %9514 = vmatmul.mubr.msk.f32.vlgmr.msra.gmra.mrb[34].mxu1 %vm2021_vm8, %v2592_v0  ;;  %v3944_v0 = vmul.f32 0.35355338, %v11484_v15 }
 0x6ac   : > { %9517 = vmatpush3.msra.mxu1 %v11543_v47 }
 0x6ad   : > { %10235 = vmatprep.subr.bf16.mxu1 %v11426_v56 }
 0x6fd   : > { %v2865_v58 = vpop.xlane.xlu0 %2864 }
 0x6fe   : > { %v2862_v1 = vpop.xlane.xlu1 %2861 }
 0x701   : > { %v3130_v2 = vpop.xlane.xlu0 %3129 }
 0x702   : > { %v3132_v3 = vsub.f32 %v3124_v44, %v3130_v2  ;;  %v3127_v4 = vpop.xlane.xlu1 %3126  ;;  %v3671_v44 = vsel %vm2021_vm8, %v3669_v36, -inf  ;;  %v3946_v2 = vsel %vm2021_vm8, %v3944_v0, -inf }
 0x703   : > { %v3131_v5 = vsub.f32 %v3123_v48, %v3127_v4 }
 0x704   : > { %v3135_v16 = vmul.f32 1.442695, %v3132_v3 }
 0x705   : > { %v3133_v34 = vmul.f32 1.442695, %v3131_v5  ;;  %v3322_v17 = vpop.xlane.xlu0 %3321 }
 0x706   : > { %10669 = vpow2.f32 %v3135_v16  ;;  %v3324_v45 = vsub.f32 %v3316_v54, %v3322_v17  ;;  %v3319_v19 = vpop.xlane.xlu1 %3318  ;;  %v11578_v54 = vld [vmem:[%s12590_s8 + $0x18] sm:$0xff] }
 0x707   : > { %10671 = vpow2.f32 %v3133_v34  ;;  %v3323_v20 = vsub.f32 %v3315_v51, %v3319_v19 }
 0x708   : > { %v3327_v22 = vmul.f32 1.442695, %v3324_v45 }
 0x709   : > { %v3325_v23 = vmul.f32 1.442695, %v3323_v20 }
 0x70a   : > { %10673 = vpow2.f32 %v3327_v22 }
 0x70b   : > { %10675 = vpow2.f32 %v3325_v23 }
 0x70c   : > { %10677 = vrcp.f32 %v2862_v1  ;;  %v3949_v1 = vsel %vm2021_vm8, %v3945_v62, -inf }
 0x70d   : > { %10679 = vrcp.f32 %v2865_v58 }
 0x710   : > { %v11553_v24 = vpop.eup %10669 }
 0x711   : > { %v11555_v25 = vpop.eup %10671  ;;  %v3140_v27 = vsel %vm2021_vm8, %v11553_v24, 0.0 }
 0x712   : > { %3141 = vadd.xlane.f32.xlu0 %v3140_v27  ;;  %v3137_v7 = vsel %vm2021_vm8, %v11555_v25, 0.0 }
 0x713   : > { %3138 = vadd.xlane.f32.xlu1 %v3137_v7 }
 0x714   : > { %v11561_v29 = vpop.eup %10673 }
 0x715   : > { %v11563_v30 = vpop.eup %10675  ;;  %v3332_v35 = vsel %vm2021_vm8, %v11561_v29, 0.0 }
 0x716   : > { %3333 = vadd.xlane.f32.xlu0 %v3332_v35  ;;  %v3329_v37 = vsel %vm2021_vm8, %v11563_v30, 0.0  ;;  %v10678_v46 = vpop.eup %10677 }
 0x717   : > { %3330 = vadd.xlane.f32.xlu1 %v3329_v37  ;;  %v10680_v52 = vpop.eup %10679  ;;  %v2868_v13 = vmul.f32 %v10678_v46, %v11521_v43 }
 0x718   : > { %v2869_v57 = vmul.f32 %v10680_v52, %v11519_v41 }
 0x71a   : > { %3675 = vmax.xlane.f32.xlu0 %v3674_v40 }
 0x71b   : > { %3672 = vmax.xlane.f32.xlu1 %v3671_v44 }
 0x77e   : > { %v9515_v12 = vpop.f32.mrb[34].mxu1 }
 0x77f   : > { %v2665_v48 = vpop.f32.mrb[35].mxu1 }
 0x780   : > { %9518 = vmatprep.mubr.msk.f32.mxu1 %vm1931_vm6, %v2665_v48 }
 0x781   : > { %9519 = vmatmul.mubr.msk.f32.vlgmr.msra.gmra.mrb[32].mxu1 %vm1931_vm6, %v9515_v12 }
 0x782   : > { %10237 = vmatpush3.bf16.msra.mxu1 %v11426_v56  ;;  %9532 = vmatprep.mubr.msk.f32.mxu1 %vm2021_vm8, %v2868_v13 }
 0x783   : > { %9535 = vmatprep.subr.mxu1 %v11578_v54 }
 0x785   : > { %9533 = vmatmul.mubr.msk.f32.vlgmr.msra.gmra.mrb[36].mxu1 %vm2021_vm8, %v2869_v57 }
 0x786   : > { %9536 = vmatpush3.msra.mxu1 %v11578_v54 }
 0x787   : > { %10245 = vmatprep.subr.bf16.mxu1 %v11401_v26 }
 0x79f   : > { %v3142_v43 = vpop.xlane.xlu0 %3141 }
 0x7a0   : > { %v3139_v51 = vpop.xlane.xlu1 %3138 }
 0x7a3   : > { %v3334_v55 = vpop.xlane.xlu0 %3333 }
 0x7a4   : > { %v3331_v8 = vpop.xlane.xlu1 %3330 }
 0x7a7   : > { %v3676_v9 = vpop.xlane.xlu0 %3675 }
 0x7a8   : > { %v3678_v53 = vsub.f32 %v3670_v32, %v3676_v9  ;;  %v3673_v60 = vpop.xlane.xlu1 %3672 }
 0x7a9   : > { %v3677_v56 = vsub.f32 %v3669_v36, %v3673_v60 }
 0x7aa   : > { %v3681_v49 = vmul.f32 1.442695, %v3678_v53 }
 0x7ab   : > { %v3679_v10 = vmul.f32 1.442695, %v3677_v56 }
 0x7ac   : > { %10681 = vpow2.f32 %v3681_v49 }
 0x7ad   : > { %10683 = vpow2.f32 %v3679_v10 }
 0x7ae   : > { %10685 = vrcp.f32 %v3139_v51 }
 0x7b6   : > { %v11588_v41 = vpop.eup %10681 }
 0x7b7   : > { %v11590_v11 = vpop.eup %10683  ;;  %v3686_v63 = vsel %vm2021_vm8, %v11588_v41, 0.0 }
 0x7b8   : > { %3687 = vadd.xlane.f32.xlu0 %v3686_v63  ;;  %v3683_v58 = vsel %vm2021_vm8, %v11590_v11, 0.0  ;;  %v10686_v45 = vpop.eup %10685 }
 0x7b9   : > { %3684 = vadd.xlane.f32.xlu1 %v3683_v58  ;;  %v3145_v35 = vmul.f32 %v10686_v45, %v11555_v25 }
 0x7bc   : > { %3950 = vmax.xlane.f32.xlu0 %v3949_v1 }
 0x7bd   : > { %3947 = vmax.xlane.f32.xlu1 %v3946_v2 }
 0x845   : > { %v3688_v3 = vpop.xlane.xlu0 %3687 }
 0x846   : > { %v3685_v4 = vpop.xlane.xlu1 %3684 }
 0x849   : > { %v3951_v5 = vpop.xlane.xlu0 %3950 }
 0x84a   : > { %v3953_v14 = vsub.f32 %v3945_v62, %v3951_v5  ;;  %v3948_v16 = vpop.xlane.xlu1 %3947 }
 0x84b   : > { %v3952_v34 = vsub.f32 %v3944_v0, %v3948_v16 }
 0x84c   : > { %v3956_v17 = vmul.f32 1.442695, %v3953_v14 }
 0x84d   : > { %v3954_v15 = vmul.f32 1.442695, %v3952_v34 }
 0x84e   : > { %10687 = vpow2.f32 %v3956_v17 }
 0x84f   : > { %10689 = vpow2.f32 %v3954_v15 }
 0x850   : > { %10691 = vrcp.f32 %v3142_v43 }
 0x851   : > { %10693 = vrcp.f32 %v3331_v8 }
 0x852   : > { %10695 = vrcp.f32 %v3334_v55 }
 0x853   : > { %10697 = vrcp.f32 %v3685_v4 }
 0x854   : > { %10699 = vrcp.f32 %v3688_v3 }
 0x858   : > { %v11600_v19 = vpop.eup %10687  ;;  %v9534_v20 = vpop.f32.mrb[36].mxu1 }
 0x859   : > { %v11602_v22 = vpop.eup %10689  ;;  %v2942_v23 = vpop.f32.mrb[37].mxu1  ;;  %v3961_v27 = vsel %vm2021_vm8, %v11600_v19, 0.0 }
 0x85a   : > { %v10692_v7 = vpop.eup %10691  ;;  %3962 = vadd.xlane.f32.xlu0 %v3961_v27  ;;  %9537 = vmatprep.mubr.msk.f32.mxu1 %vm1931_vm6, %v2942_v23  ;;  %v3958_v32 = vsel %vm2021_vm8, %v11602_v22, 0.0 }
 0x85b   : > { %v10694_v36 = vpop.eup %10693  ;;  %3959 = vadd.xlane.f32.xlu1 %v3958_v32  ;;  %9538 = vmatmul.mubr.msk.f32.vlgmr.msra.gmra.mrb[32].mxu1 %vm1931_vm6, %v9534_v20  ;;  %v3146_v37 = vmul.f32 %v10692_v7, %v11553_v24  ;;  %v4224_v20 = vld [vmem:[%s12594_s12 + $0x18] sm:$0xff] }
 0x85c   : > { %10247 = vmatpush3.bf16.msra.mxu1 %v11401_v26  ;;  %9551 = vmatprep.mubr.msk.f32.mxu1 %vm2021_vm8, %v3145_v35  ;;  %v10696_v40 = vpop.eup %10695  ;;  %v3337_v44 = vmul.f32 %v10694_v36, %v11563_v30  ;;  %v11627_v26 = vld [vmem:[%s12591_s9] ss:$0 sm:$0xff] }
 0x85d   : > { %10255 = vmatprep.subr.bf16.mxu1 %v11421_v50  ;;  %v3338_v25 = vmul.f32 %v10696_v40, %v11561_v29 }
 0x85f   : > { %9552 = vmatmul.mubr.msk.f32.vlgmr.msra.gmra.mrb[38].mxu1 %vm2021_vm8, %v3146_v37 }
 0x860   : > { %10257 = vmatpush3.bf16.msra.mxu1 %v11421_v50  ;;  %9565 = vmatprep.mubr.msk.f32.mxu1 %vm2021_vm8, %v3337_v44 }
 0x861   : > { %9568 = vmatprep.subr.mxu1 %v11509_v28 }
 0x863   : > { %9566 = vmatmul.mubr.msk.f32.vlgmr.msra.gmra.mrb[40].mxu1 %vm2021_vm8, %v3338_v25 }
 0x864   : > { %9569 = vmatpush3.msra.mxu1 %v11509_v28 }
 0x865   : > { %9573 = vmatprep.subr.mxu1 %v11516_v6 }
 0x8e7   : > { %v3963_v8 = vpop.xlane.xlu0 %3962 }
 0x92e   : > { %v9539_v24 = vpop.f32.mrb[32].mxu1 }
 0x92f   : > { %v4140_v50 = vadd.f32 %v9539_v24, %v11627_v26  ;;  %v3025_v30 = vpop.f32.mrb[33].mxu1 }
 0x930   : > { %v4139_v46 = vadd.f32 %v11627_v26, %v3025_v30 }
 0x931   : > { %v4144_v29 = vadd.f32 %v4140_v50, %v11064_v31  ;;  %v10698_v31 = vpop.eup %10697 }
 0x932   : > { %v9553_v12 = vpop.f32.mrb[38].mxu1  ;;  %v4143_v48 = vadd.f32 %v4139_v46, %v11066_v33  ;;  %v10700_v33 = vpop.eup %10699  ;;  %v3691_v51 = vmul.f32 %v10698_v31, %v11590_v11 }
 0x933   : > { %v3219_v28 = vpop.f32.mrb[39].mxu1  ;;  %v4152_v52 = vsel %vm768_vm5, %v4144_v29, 0.0  ;;  %v3692_v55 = vmul.f32 %v10700_v33, %v11588_v41 }
 0x934   : > { %4153 = vadd.xlane.f32.xlu0 %v4152_v52  ;;  %v4149_v13 = vsel %vm768_vm5, %v4143_v48, 0.0 }
 0x935   : > { %4150 = vadd.xlane.f32.xlu1 %v4149_v13 }
 0x936   : > { %v9567_v57 = vpop.f32.mrb[40].mxu1 }
 0x937   : > { %v3411_v43 = vpop.f32.mrb[41].mxu1 }
 0x938   : > { %9570 = vmatprep.mubr.msk.f32.mxu1 %vm1931_vm6, %v3411_v43 }
 0x939   : > { %9571 = vmatmul.mubr.msk.f32.vlgmr.msra.gmra.mrb[42].mxu1 %vm1931_vm6, %v9567_v57  ;;  %v8599_v57 = vld [vmem:[%s12593_s11] ss:$0 sm:$0xff] }
 0x93a   : > { %9574 = vmatpush3.msra.mxu1 %v11516_v6  ;;  %9575 = vmatprep.mubr.msk.f32.mxu1 %vm1931_vm6, %v3219_v28  ;;  %v3960_v6 = vpop.xlane.xlu1 %3959 }
 0x93b   : > { %10265 = vmatprep.subr.bf16.mxu1 %v11411_v42  ;;  %10701 = vrcp.f32 %v3960_v6  ;;  %v4334_v6 = vld [vmem:[%s12596_s14 + $0x8] sm:$0xff] }
 0x93c   : > { %10703 = vrcp.f32 %v3963_v8  ;;  %v4335_v8 = vld [vmem:[%s12596_s14 + $0x10] sm:$0xff] }
 0x941   : > { %9576 = vmatmul.mubr.msk.f32.vlgmr.msra.gmra.mrb[42].mxu1 %vm1931_vm6, %v9553_v12 }
 0x942   : > { %10267 = vmatpush3.bf16.msra.mxu1 %v11411_v42  ;;  %9589 = vmatprep.mubr.msk.f32.mxu1 %vm2021_vm8, %v3691_v51 }
 0x943   : > { %9592 = vmatprep.subr.mxu1 %v11543_v47 }
 0x945   : > { %9590 = vmatmul.mubr.msk.f32.vlgmr.msra.gmra.mrb[44].mxu1 %vm2021_vm8, %v3692_v55  ;;  %v10702_v9 = vpop.eup %10701  ;;  %v4333_v55 = vld [vmem:[%s12596_s14] sm:$0xff] }
 0x946   : > { %9593 = vmatpush3.msra.mxu1 %v11543_v47  ;;  %v10704_v42 = vpop.eup %10703  ;;  %v3966_v56 = vmul.f32 %v10702_v9, %v11602_v22  ;;  %v10286_v9 = vpack.c.bf16 %v4334_v6, %v4333_v55 }
 0x947   : > { %10275 = vmatprep.subr.bf16.mxu1 %v11434_v59  ;;  %v3967_v47 = vmul.f32 %v10704_v42, %v11600_v19  ;;  %v4223_v19 = vld [vmem:[%s12594_s12 + $0x10] sm:$0xff]  ;;  %v4337_v42 = vld [vmem:[%s12596_s14 + $0x20] sm:$0xff] }
 0x948   : > { %v10282_v22 = vpack.c.bf16 %v4224_v20, %v4223_v19 }
 0x9c1   : > { %v4154_v41 = vpop.xlane.xlu0 %4153 }
 0x9c2   : > { %v4151_v11 = vpop.xlane.xlu1 %4150  ;;  %v4162_v62 = vmul.f32 0.03125, %v4154_v41 }
 0x9c4   : > { %v4166_v0 = vsub.f32 %v4144_v29, %v4162_v62  ;;  %v4342_v62 = vld [vmem:[%s12596_s14 + $0x48] sm:$0xff] }
 0x9c6   : > { %v4170_v14 = vmul.f32 %v4166_v0, %v4166_v0 }
 0x9c8   : > { %v4176_v17 = vsel %vm768_vm5, %v4170_v14, 0.0 }
 0xa18   : > { %v9591_v53 = vpop.f32.mrb[44].mxu1 }
 0xa19   : > { %v3765_v60 = vpop.f32.mrb[45].mxu1 }
 0xa1a   : > { %9594 = vmatprep.mubr.msk.f32.mxu1 %vm1931_vm6, %v3765_v60 }
 0xa1b   : > { %9595 = vmatmul.mubr.msk.f32.vlgmr.msra.gmra.mrb[42].mxu1 %vm1931_vm6, %v9591_v53  ;;  %v4336_v53 = vld [vmem:[%s12596_s14 + $0x18] sm:$0xff] }
 0xa1c   : > { %10277 = vmatpush3.bf16.msra.mxu1 %v11434_v59  ;;  %9608 = vmatprep.mubr.msk.f32.mxu1 %vm2021_vm8, %v3966_v56  ;;  %v4161_v59 = vmul.f32 0.03125, %v4151_v11  ;;  %v10290_v60 = vpack.c.bf16 %v4336_v53, %v4335_v8  ;;  %v4338_v56 = vld [vmem:[%s12596_s14 + $0x28] sm:$0xff]  ;;  %v4341_v11 = vld [vmem:[%s12596_s14 + $0x40] sm:$0xff] }
 0xa1d   : > { %9611 = vmatprep.subr.mxu1 %v11578_v54 }
 0xa1e   : > { %v4165_v2 = vsub.f32 %v4143_v48, %v4161_v59  ;;  %v11693_v48 = vld [vmem:[%s12592_s10] ss:$0 sm:$0xff]  ;;  %v10302_v59 = vpack.c.bf16 %v4342_v62, %v4341_v11 }
 0xa1f   : > { %9609 = vmatmul.mubr.msk.f32.vlgmr.msra.gmra.mrb[46].mxu1 %vm2021_vm8, %v3967_v47  ;;  %v10294_v47 = vpack.c.bf16 %v4338_v56, %v4337_v42 }
 0xa20   : > { %9612 = vmatpush3.msra.mxu1 %v11578_v54  ;;  %v4169_v34 = vmul.f32 %v4165_v2, %v4165_v2 }
 0xa21   : > { %10287 = vmatprep.subr.bf16.mxu1 %v10286_v9 }
 0xa22   : > { %v4173_v15 = vsel %vm768_vm5, %v4169_v34, 0.0 }
 0xaf2   : > { %v9610_v49 = vpop.f32.mrb[46].mxu1 }
 0xaf3   : > { %v4040_v10 = vpop.f32.mrb[47].mxu1 }
 0xaf4   : > { %9613 = vmatprep.mubr.msk.f32.mxu1 %vm1931_vm6, %v4040_v10  ;;  %v4340_v10 = vld [vmem:[%s12596_s14 + $0x38] sm:$0xff] }
 0xaf5   : > { %9614 = vmatmul.mubr.msk.f32.vlgmr.msra.gmra.mrb[42].mxu1 %vm1931_vm6, %v9610_v49  ;;  %v4339_v49 = vld [vmem:[%s12596_s14 + $0x30] sm:$0xff] }
 0xaf6   : > { %10289 = vmatpush3.bf16.msra.mxu1 %v10286_v9  ;;  %v10298_v41 = vpack.c.bf16 %v4340_v10, %v4339_v49 }
 0xaf7   : > { %10291 = vmatprep.subr.bf16.mxu1 %v10290_v60 }
 0xafa   : > { %10293 = vmatpush3.bf16.msra.mxu1 %v10290_v60 }
 0xafb   : > { %10295 = vmatprep.subr.bf16.mxu1 %v10294_v47 }
 0xafe   : > { %10297 = vmatpush3.bf16.msra.mxu1 %v10294_v47 }
 0xaff   : > { %10299 = vmatprep.subr.bf16.mxu1 %v10298_v41 }
 0xb02   : > { %10301 = vmatpush3.bf16.msra.mxu1 %v10298_v41 }
 0xb03   : > { %10303 = vmatprep.subr.bf16.mxu1 %v10302_v59 }
 0xb06   : > { %10305 = vmatpush3.bf16.msra.mxu1 %v10302_v59 }
 0xbc8   : > { %v9615_v63 = vpop.f32.mrb[42].mxu1 }
 0xbc9   : > { %v4142_v58 = vadd.f32 %v9615_v63, %v11627_v26  ;;  %v4121_v1 = vpop.f32.mrb[43].mxu1  ;;  %v4343_v63 = vld [vmem:[%s12596_s14 + $0x50] sm:$0xff] }
 0xbca   : > { %v4141_v3 = vadd.f32 %v11627_v26, %v4121_v1  ;;  %v4345_v1 = vld [vmem:[%s12596_s14 + $0x60] sm:$0xff] }
 0xbcb   : > { %v4146_v54 = vadd.f32 %v4142_v58, %v11074_v39  ;;  %v4221_v39 = vld [vmem:[%s12594_s12] sm:$0xff] }
 0xbcc   : > { %v4145_v4 = vadd.f32 %v4141_v3, %v11072_v38  ;;  %v4222_v38 = vld [vmem:[%s12594_s12 + $0x8] sm:$0xff] }
 0xbcd   : > { %v4158_v5 = vsel %vm768_vm5, %v4146_v54, 0.0  ;;  %v10278_v45 = vpack.c.bf16 %v4222_v38, %v4221_v39 }
 0xbce   : > { %4159 = vadd.xlane.f32.xlu0 %v4158_v5  ;;  %v4155_v16 = vsel %vm768_vm5, %v4145_v4, 0.0 }
 0xbcf   : > { %4156 = vadd.xlane.f32.xlu1 %v4155_v16  ;;  %10279 = vmatprep.subr.bf16.mxu0 %v10278_v45 }
 0xbd0   : > { %10281 = vmatpush3.bf16.msra.mxu0 %v10278_v45 }
 0xbd1   : > { %10283 = vmatprep.subr.bf16.mxu0 %v10282_v22 }
 0xbd2   : > { %4177 = vadd.xlane.f32.xlu0 %v4176_v17 }
 0xbd3   : > { %4174 = vadd.xlane.f32.xlu1 %v4173_v15 }
 0xbd4   : > { %10285 = vmatpush3.bf16.msra.mxu0 %v10282_v22 }
 0xc5b   : > { %v4160_v23 = vpop.xlane.xlu0 %4159 }
 0xc5c   : > { %v4164_v27 = vmul.f32 0.03125, %v4160_v23  ;;  %v4157_v7 = vpop.xlane.xlu1 %4156 }
 0xc5d   : > { %v4163_v32 = vmul.f32 0.03125, %v4157_v7 }
 0xc5e   : > { %v11680_v35 = vsub.f32 %v4146_v54, %v4164_v27  ;;  %v4347_v54 = vld [vmem:[%s12596_s14 + $0x70] sm:$0xff] }
 0xc5f   : > { %v11682_v36 = vsub.f32 %v4145_v4, %v4163_v32  ;;  %v4178_v37 = vpop.xlane.xlu0 %4177  ;;  %v4348_v4 = vld [vmem:[%s12596_s14 + $0x78] sm:$0xff]  ;;  %v8600_v32 = vld [vmem:[%s12595_s13] ss:$0 sm:$0xff] }
 0xc60   : > { %v4186_v40 = vmul.f32 0.03125, %v4178_v37  ;;  %v4175_v44 = vpop.xlane.xlu1 %4174  ;;  %v4172_v25 = vmul.f32 %v11680_v35, %v11680_v35  ;;  %v10314_v5 = vpack.c.bf16 %v4348_v4, %v4347_v54  ;;  %v8643_v54 = vld [vmem:[%s12588_s6 + $0x88] sm:$0xff] }
 0xc61   : > { %v4185_v26 = vmul.f32 0.03125, %v4175_v44  ;;  %v4171_v24 = vmul.f32 %v11682_v36, %v11682_v36 }
 0xc62   : > { %v4190_v50 = vadd.f32 1e-05, %v4186_v40  ;;  %v4182_v30 = vsel %vm768_vm5, %v4172_v25, 0.0 }
 0xc63   : > { %v4189_v46 = vadd.f32 1e-05, %v4185_v26  ;;  %4183 = vadd.xlane.f32.xlu0 %v4182_v30  ;;  %v4179_v29 = vsel %vm768_vm5, %v4171_v24, 0.0 }
 0xc64   : > { %10705 = vrsqrt.f32 %v4190_v50  ;;  %4180 = vadd.xlane.f32.xlu1 %v4179_v29 }
 0xc65   : > { %10707 = vrsqrt.f32 %v4189_v46 }
 0xc6e   : > { %v10706_v12 = vpop.eup %10705 }
 0xc6f   : > { %v10708_v28 = vpop.eup %10707  ;;  %v4198_v52 = vmul.f32 %v10706_v12, %v4166_v0  ;;  %v4344_v0 = vld [vmem:[%s12596_s14 + $0x58] sm:$0xff] }
 0xc70   : > { %v4197_v13 = vmul.f32 %v10708_v28, %v4165_v2  ;;  %v10306_v58 = vpack.c.bf16 %v4344_v0, %v4343_v63  ;;  %v4346_v2 = vld [vmem:[%s12596_s14 + $0x68] sm:$0xff] }
 0xc71   : > { %v4208_v43 = vmul.f32 %v11693_v48, %v4198_v52  ;;  %v10310_v3 = vpack.c.bf16 %v4346_v2, %v4345_v1  ;;  %v8611_v1 = vld [vmem:[%s12635_s5 + $0x88] sm:$0xff]  ;;  %v8642_v2 = vld [vmem:[%s12588_s6 + $0x80] sm:$0xff] }
 0xc72   : > { %v4207_v31 = vmul.f32 %v11693_v48, %v4197_v13  ;;  %10307 = vmatprep.subr.bf16.mxu1 %v10306_v58  ;;  %v10350_v4 = vpack.c.bf16 %v8643_v54, %v8642_v2 }
 0xc73   : > { %v11702_v51 = vadd.f32 %v8599_v57, %v4208_v43  ;;  %10309 = vmatpush3.bf16.msra.mxu1 %v10306_v58  ;;  %v8610_v58 = vld [vmem:[%s12635_s5 + $0x80] sm:$0xff] }
 0xc74   : > { %v11700_v33 = vadd.f32 %v8599_v57, %v4207_v31  ;;  %10311 = vmatprep.subr.bf16.mxu1 %v10310_v3 }
 0xc76   : > { %9624 = vmatprep.mubr.msk.f32.mxu0 %vm768_vm5, %v11700_v33 }
 0xc77   : > { %9625 = vmatmul.mubr.msk.f32.vlgmr.msra.gmra.mrb[40].mxu0 %vm768_vm5, %v11702_v51  ;;  %10313 = vmatpush3.bf16.msra.mxu1 %v10310_v3  ;;  %v10318_v3 = vpack.c.bf16 %v8611_v1, %v8610_v58 }
 0xc78   : > { %10315 = vmatprep.subr.bf16.mxu1 %v10314_v5 }
 0xc79   : > { %10319 = vmatprep.subr.bf16.mxu0 %v10318_v3 }
 0xc7a   : > { %10321 = vmatpush3.bf16.msra.mxu0 %v10318_v3 }
 0xc7b   : > { %10317 = vmatpush3.bf16.msra.mxu1 %v10314_v5  ;;  %v8612_v5 = vld [vmem:[%s12635_s5 + $0x90] sm:$0xff] }
 0xc7c   : > { %10351 = vmatprep.subr.bf16.mxu1 %v10350_v4 }
 0xcf0   : > { %v4184_v14 = vpop.xlane.xlu0 %4183 }
 0xcf1   : > { %v4188_v16 = vmul.f32 0.03125, %v4184_v14  ;;  %v4181_v34 = vpop.xlane.xlu1 %4180  ;;  %v8613_v14 = vld [vmem:[%s12635_s5 + $0x98] sm:$0xff] }
 0xcf2   : > { %v4187_v17 = vmul.f32 0.03125, %v4181_v34  ;;  %v10322_v34 = vpack.c.bf16 %v8613_v14, %v8612_v5 }
 0xcf3   : > { %v4192_v15 = vadd.f32 1e-05, %v4188_v16  ;;  %v8644_v16 = vld [vmem:[%s12588_s6 + $0x90] sm:$0xff] }
 0xcf4   : > { %v4191_v39 = vadd.f32 1e-05, %v4187_v17  ;;  %v8645_v17 = vld [vmem:[%s12588_s6 + $0x98] sm:$0xff]  ;;  %10323 = vmatprep.subr.bf16.mxu0 %v10322_v34 }
 0xcf5   : > { %10709 = vrsqrt.f32 %v4192_v15  ;;  %v10354_v15 = vpack.c.bf16 %v8645_v17, %v8644_v16  ;;  %10325 = vmatpush3.bf16.msra.mxu0 %v10322_v34 }
 0xcf6   : > { %10711 = vrsqrt.f32 %v4191_v39 }
 0xcff   : > { %v10710_v38 = vpop.eup %10709 }
 0xd00   : > { %v10712_v45 = vpop.eup %10711  ;;  %v4200_v19 = vmul.f32 %v10710_v38, %v11680_v35 }
 0xd01   : > { %v4199_v20 = vmul.f32 %v10712_v45, %v11682_v36 }
 0xd02   : > { %v4210_v22 = vmul.f32 %v11693_v48, %v4200_v19 }
 0xd03   : > { %v4209_v23 = vmul.f32 %v11693_v48, %v4199_v20  ;;  %v8605_v48 = vld [vmem:[%s12597_s15] ss:$0 sm:$0xff] }
 0xd04   : > { %v4220_v7 = vadd.f32 %v8599_v57, %v4210_v22 }
 0xd05   : > { %v4219_v27 = vadd.f32 %v8599_v57, %v4209_v23 }
 0xd07   : > { %9627 = vmatprep.mubr.msk.f32.mxu0 %vm768_vm5, %v4219_v27 }
 0xd08   : > { %9628 = vmatmul.mubr.msk.f32.gmra.mrb[42].mxu0 %vm768_vm5, %v4220_v7 }
 0xd4a   : > { %v9626_v37 = vpop.f32.mrb[40].mxu0 }
 0xd4b   : > { %v4316_v40 = vadd.f32 %v9626_v37, %v8600_v32  ;;  %v4310_v44 = vpop.f32.mrb[41].mxu0 }
 0xd4c   : > { %v4311_v35 = vadd.f32 %v8600_v32, %v4310_v44 }
 0xd4d   : > { %v4330_v36 = vmax.f32 %v4316_v40, 0.0 }
 0xd4e   : > { %v4329_v25 = vmax.f32 %v4311_v35, 0.0 }
 0xd50   : > { %9662 = vmatprep.mubr.f32.mxu1 %v4329_v25 }
 0xd51   : > { %9663 = vmatmul.mubr.f32.vlgmr.msra.gmra.mrb[48].mxu1 %v4330_v36 }
 0xd52   : > { %10353 = vmatpush3.bf16.msra.mxu1 %v10350_v4 }
 0xd53   : > { %10355 = vmatprep.subr.bf16.mxu1 %v10354_v15 }
 0xd56   : > { %10357 = vmatpush3.bf16.msra.mxu1 %v10354_v15 }
 0xddb   : > { %v9629_v26 = vpop.f32.mrb[42].mxu0 }
 0xddc   : > { %v4326_v24 = vadd.f32 %v9629_v26, %v8600_v32  ;;  %v4320_v50 = vpop.f32.mrb[43].mxu0 }
 0xddd   : > { %v4321_v30 = vadd.f32 %v8600_v32, %v4320_v50 }
 0xdde   : > { %v4332_v29 = vmax.f32 %v4326_v24, 0.0  ;;  %v8608_v24 = vld [vmem:[%s12636_s30 + $0x1] ss:$0 sm:$0xff] }
 0xddf   : > { %v4331_v46 = vmax.f32 %v4321_v30, 0.0 }
 0xde1   : > { %9665 = vmatprep.mubr.f32.mxu1 %v4331_v46 }
 0xde2   : > { %9666 = vmatmul.mubr.f32.gmra.mrb[50].mxu1 %v4332_v29  ;;  %v8609_v29 = vld [vmem:[%s12638_s25 + $0x1] ss:$0 sm:$0xff] }
 0xe24   : > { %v9664_v12 = vpop.f32.mrb[48].mxu1 }
 0xe25   : > { %v4435_v28 = vadd.f32 %v9664_v12, %v11702_v51  ;;  %v4415_v52 = vpop.f32.mrb[49].mxu1 }
 0xe26   : > { %v4434_v13 = vadd.f32 %v4415_v52, %v11700_v33 }
 0xe27   : > { %v11770_v57 = vadd.f32 %v8605_v48, %v4435_v28 }
 0xe28   : > { %v11772_v43 = vadd.f32 %v8605_v48, %v4434_v13  ;;  %v8618_v13 = vld [vmem:[%s12635_s5 + $0xa0] sm:$0xff] }
 0xe29   : > { %v4456_v31 = vsel %vm768_vm5, %v11770_v57, 0.0 }
 0xe2a   : > { %4457 = vadd.xlane.f32.xlu0 %v4456_v31  ;;  %v4453_v55 = vsel %vm768_vm5, %v11772_v43, 0.0  ;;  %v8619_v31 = vld [vmem:[%s12635_s5 + $0xa8] sm:$0xff] }
 0xe2b   : > { %4454 = vadd.xlane.f32.xlu1 %v4453_v55  ;;  %v8658_v55 = vld [vmem:[%s12588_s6 + $0xc0] sm:$0xff] }
 0xeb5   : > { %v9667_v6 = vpop.f32.mrb[50].mxu1 }
 0xeb6   : > { %v4437_v8 = vadd.f32 %v9667_v6, %v4220_v7  ;;  %v4425_v9 = vpop.f32.mrb[51].mxu1  ;;  %v10326_v6 = vpack.c.bf16 %v8619_v31, %v8618_v13  ;;  %v8666_v31 = vld [vmem:[%s12588_s6 + $0xe0] sm:$0xff] }
 0xeb7   : > { %v4436_v53 = vadd.f32 %v4425_v9, %v4219_v27  ;;  %v4458_v51 = vpop.xlane.xlu0 %4457 }
 0xeb8   : > { %v11778_v60 = vadd.f32 %v8605_v48, %v4437_v8  ;;  %v4466_v33 = vmul.f32 0.03125, %v4458_v51  ;;  %v4455_v42 = vpop.xlane.xlu1 %4454  ;;  %v8659_v8 = vld [vmem:[%s12588_s6 + $0xc8] sm:$0xff]  ;;  %10327 = vmatprep.subr.bf16.mxu0 %v10326_v6  ;;  %v8621_v51 = vld [vmem:[%s12635_s5 + $0xb8] sm:$0xff] }
 0xeb9   : > { %v11780_v56 = vadd.f32 %v8605_v48, %v4436_v53  ;;  %v4465_v47 = vmul.f32 0.03125, %v4455_v42  ;;  %v10366_v9 = vpack.c.bf16 %v8659_v8, %v8658_v55  ;;  %v8620_v53 = vld [vmem:[%s12635_s5 + $0xb0] sm:$0xff]  ;;  %v8667_v55 = vld [vmem:[%s12588_s6 + $0xe8] sm:$0xff] }
 0xeba   : > { %v4470_v49 = vsub.f32 %v11770_v57, %v4466_v33  ;;  %v4462_v10 = vsel %vm768_vm5, %v11778_v60, 0.0  ;;  %v8660_v33 = vld [vmem:[%s12588_s6 + $0xd0] sm:$0xff]  ;;  %v10330_v42 = vpack.c.bf16 %v8621_v51, %v8620_v53  ;;  %v8682_v51 = vld [vmem:[%s12589_s7 + $0xa0] sm:$0xff] }
 0xebb   : > { %v4469_v41 = vsub.f32 %v11772_v43, %v4465_v47  ;;  %4463 = vadd.xlane.f32.xlu0 %v4462_v10  ;;  %v4459_v11 = vsel %vm768_vm5, %v11780_v56, 0.0  ;;  %10367 = vmatprep.subr.bf16.mxu1 %v10366_v9  ;;  %v8661_v47 = vld [vmem:[%s12588_s6 + $0xd8] sm:$0xff]  ;;  %v8626_v10 = vld [vmem:[%s12635_s5 + $0xc0] sm:$0xff]  ;;  %v8668_v8 = vld [vmem:[%s12588_s6 + $0xf0] sm:$0xff] }
 0xebc   : > { %4460 = vadd.xlane.f32.xlu1 %v4459_v11  ;;  %v4474_v62 = vmul.f32 %v4470_v49, %v4470_v49 }
 0xebd   : > { %v4473_v59 = vmul.f32 %v4469_v41, %v4469_v41 }
 0xebe   : > { %v4480_v63 = vsel %vm768_vm5, %v4474_v62, 0.0  ;;  %v8674_v62 = vld [vmem:[%s12589_s7 + $0x80] sm:$0xff] }
 0xebf   : > { %4481 = vadd.xlane.f32.xlu0 %v4480_v63  ;;  %v4477_v0 = vsel %vm768_vm5, %v4473_v59, 0.0  ;;  %v8675_v59 = vld [vmem:[%s12589_s7 + $0x88] sm:$0xff] }
 0xec0   : > { %4478 = vadd.xlane.f32.xlu1 %v4477_v0  ;;  %v10382_v63 = vpack.c.bf16 %v8675_v59, %v8674_v62  ;;  %v8700_v59 = vld [vmem:[%s12589_s7 + $0xf0] sm:$0xff] }
 0xf48   : > { %v4464_v39 = vpop.xlane.xlu0 %4463 }
 0xf49   : > { %v4468_v38 = vmul.f32 0.03125, %v4464_v39  ;;  %v4461_v45 = vpop.xlane.xlu1 %4460 }
 0xf4a   : > { %v4467_v19 = vmul.f32 0.03125, %v4461_v45  ;;  %v8629_v45 = vld [vmem:[%s12635_s5 + $0xd8] sm:$0xff] }
 0xf4b   : > { %v11815_v20 = vsub.f32 %v11778_v60, %v4468_v38  ;;  %v8628_v38 = vld [vmem:[%s12635_s5 + $0xd0] sm:$0xff] }
 0xf4c   : > { %v11818_v22 = vsub.f32 %v11780_v56, %v4467_v19  ;;  %v4482_v23 = vpop.xlane.xlu0 %4481  ;;  %v8676_v19 = vld [vmem:[%s12589_s7 + $0x90] sm:$0xff] }
 0xf4d   : > { %v4490_v27 = vmul.f32 0.03125, %v4482_v23  ;;  %v4479_v7 = vpop.xlane.xlu1 %4478  ;;  %v4476_v32 = vmul.f32 %v11815_v20, %v11815_v20 }
 0xf4e   : > { %v4489_v37 = vmul.f32 0.03125, %v4479_v7  ;;  %v4475_v40 = vmul.f32 %v11818_v22, %v11818_v22  ;;  %v8635_v7 = vld [vmem:[%s12635_s5 + $0xe8] sm:$0xff] }
 0xf4f   : > { %v4494_v44 = vadd.f32 1e-05, %v4490_v27  ;;  %v4486_v35 = vsel %vm768_vm5, %v4476_v32, 0.0  ;;  %v8634_v27 = vld [vmem:[%s12635_s5 + $0xe0] sm:$0xff] }
 0xf50   : > { %v4493_v25 = vadd.f32 1e-05, %v4489_v37  ;;  %4487 = vadd.xlane.f32.xlu0 %v4486_v35  ;;  %v4483_v36 = vsel %vm768_vm5, %v4475_v40, 0.0  ;;  %v8690_v32 = vld [vmem:[%s12589_s7 + $0xc0] sm:$0xff]  ;;  %v8691_v37 = vld [vmem:[%s12589_s7 + $0xc8] sm:$0xff]  ;;  %v10342_v40 = vpack.c.bf16 %v8635_v7, %v8634_v27  ;;  %v8636_v35 = vld [vmem:[%s12635_s5 + $0xf0] sm:$0xff] }
 0xf51   : > { %10713 = vrsqrt.f32 %v4494_v44  ;;  %4484 = vadd.xlane.f32.xlu1 %v4483_v36  ;;  %v10398_v44 = vpack.c.bf16 %v8691_v37, %v8690_v32  ;;  %v8692_v36 = vld [vmem:[%s12589_s7 + $0xd0] sm:$0xff] }
 0xf52   : > { %10715 = vrsqrt.f32 %v4493_v25  ;;  %v8637_v25 = vld [vmem:[%s12635_s5 + $0xf8] sm:$0xff] }
 0xf5b   : > { %v10714_v26 = vpop.eup %10713 }
 0xf5c   : > { %v10716_v50 = vpop.eup %10715  ;;  %v4502_v30 = vmul.f32 %v10714_v26, %v4470_v49  ;;  %v10370_v49 = vpack.c.bf16 %v8661_v47, %v8660_v33  ;;  %v8693_v26 = vld [vmem:[%s12589_s7 + $0xd8] sm:$0xff]  ;;  %v8683_v33 = vld [vmem:[%s12589_s7 + $0xa8] sm:$0xff]  ;;  %v8684_v47 = vld [vmem:[%s12589_s7 + $0xb0] sm:$0xff] }
 0xf5d   : > { %v4501_v46 = vmul.f32 %v10716_v50, %v4469_v41  ;;  %v8627_v41 = vld [vmem:[%s12635_s5 + $0xc8] sm:$0xff]  ;;  %v10402_v50 = vpack.c.bf16 %v8693_v26, %v8692_v36  ;;  %s10803_s5 = scalar_lea.vmem %s10802_s26, 64 }
 0xf5e   : > { %v4512_v12 = vmul.f32 %v8608_v24, %v4502_v30  ;;  %v10334_v11 = vpack.c.bf16 %v8627_v41, %v8626_v10  ;;  %v8650_v30 = vld [vmem:[%s12588_s6 + $0xa0] sm:$0xff]  ;;  %p10805_p1 = scmp.lt.s32.totalorder %s10803_s5, %s10797_s1 }
 0xf5f   : > { %v4511_v48 = vmul.f32 %v8608_v24, %v4501_v46  ;;  %v8651_v46 = vld [vmem:[%s12588_s6 + $0xa8] sm:$0xff]  ;;  %v8698_v41 = vld [vmem:[%s12589_s7 + $0xe0] sm:$0xff] }
 0xf60   : > { %v11834_v52 = vadd.f32 %v8609_v29, %v4512_v12  ;;  %v8652_v12 = vld [vmem:[%s12588_s6 + $0xb0] sm:$0xff]  ;;  %p10806_p2 = por %p10805_p1, %p10804_p0 }
 0xf61   : > { %v11832_v28 = vadd.f32 %v8609_v29, %v4511_v48  ;;  %v8653_v48 = vld [vmem:[%s12588_s6 + $0xb8] sm:$0xff] }
 0xf62   : > { %v10362_v13 = vpack.c.bf16 %v8653_v48, %v8652_v12  ;;  %p10807_p3 = pnand %p10806_p2, %p10800_p13 }
 0xf63   : > { %9676 = vmatprep.mubr.msk.f32.mxu0 %vm768_vm5, %v11832_v28  ;;  %9732 = vmatprep.mubr.msk.f32.mxu1 %vm768_vm5, %v11832_v28 }
 0xf64   : > { %9677 = vmatmul.mubr.msk.f32.vlgmr.msra.gmra.mrb[44].mxu0 %vm768_vm5, %v11834_v52  ;;  %9733 = vmatmul.mubr.msk.f32.vlgmr.msra.gmra.mrb[52].mxu1 %vm768_vm5, %v11834_v52 }
 0xf65   : > { %10329 = vmatpush3.bf16.msra.mxu0 %v10326_v6  ;;  %10369 = vmatpush3.bf16.msra.mxu1 %v10366_v9  ;;  %v10374_v6 = vpack.c.bf16 %v8667_v55, %v8666_v31  ;;  %v8669_v9 = vld [vmem:[%s12588_s6 + $0xf8] sm:$0xff] }
 0xf66   : > { %10331 = vmatprep.subr.bf16.mxu0 %v10330_v42  ;;  %10371 = vmatprep.subr.bf16.mxu1 %v10370_v49  ;;  %v10378_v53 = vpack.c.bf16 %v8669_v9, %v8668_v8 }
 0xf69   : > { %10333 = vmatpush3.bf16.msra.mxu0 %v10330_v42  ;;  %10373 = vmatpush3.bf16.msra.mxu1 %v10370_v49  ;;  %v10390_v42 = vpack.c.bf16 %v8683_v33, %v8682_v51  ;;  %v8685_v49 = vld [vmem:[%s12589_s7 + $0xb8] sm:$0xff] }
 0xf6a   : > { %10335 = vmatprep.subr.bf16.mxu0 %v10334_v11  ;;  %10383 = vmatprep.subr.bf16.mxu1 %v10382_v63  ;;  %v10394_v10 = vpack.c.bf16 %v8685_v49, %v8684_v47 }
 0xfdd   : > { %v4488_v0 = vpop.xlane.xlu0 %4487 }
 0xfde   : > { %v4492_v58 = vmul.f32 0.03125, %v4488_v0  ;;  %v4485_v1 = vpop.xlane.xlu1 %4484 }
 0xfdf   : > { %v4491_v2 = vmul.f32 0.03125, %v4485_v1 }
 0xfe0   : > { %v4496_v3 = vadd.f32 1e-05, %v4492_v58 }
 0xfe1   : > { %v4495_v54 = vadd.f32 1e-05, %v4491_v2 }
 0xfe2   : > { %10717 = vrsqrt.f32 %v4496_v3 }
 0xfe3   : > { %10719 = vrsqrt.f32 %v4495_v54 }
 0xfec   : > { %v10718_v4 = vpop.eup %10717 }
 0xfed   : > { %v10720_v5 = vpop.eup %10719  ;;  %v4504_v14 = vmul.f32 %v10718_v4, %v11815_v20  ;;  %v8677_v20 = vld [vmem:[%s12589_s7 + $0x98] sm:$0xff] }
 0xfee   : > { %v4503_v16 = vmul.f32 %v10720_v5, %v11818_v22  ;;  %v10338_v22 = vpack.c.bf16 %v8629_v45, %v8628_v38  ;;  %v10386_v23 = vpack.c.bf16 %v8677_v20, %v8676_v19 }
 0xfef   : > { %v4514_v34 = vmul.f32 %v8608_v24, %v4504_v14 }
 0xff0   : > { %v4513_v17 = vmul.f32 %v8608_v24, %v4503_v16  ;;  %v10346_v24 = vpack.c.bf16 %v8637_v25, %v8636_v35 }
 0xff1   : > { %v11884_v39 = vadd.f32 %v8609_v29, %v4514_v34 }
 0xff2   : > { %v11882_v15 = vadd.f32 %v8609_v29, %v4513_v17  ;;  %v10358_v29 = vpack.c.bf16 %v8651_v46, %v8650_v30 }
 0xff4   : > { %9679 = vmatprep.mubr.msk.f32.mxu0 %vm768_vm5, %v11882_v15  ;;  %9735 = vmatprep.mubr.msk.f32.mxu1 %vm768_vm5, %v11882_v15 }
 0xff5   : > { %9680 = vmatmul.mubr.msk.f32.gmra.mrb[46].mxu0 %vm768_vm5, %v11884_v39  ;;  %9736 = vmatmul.mubr.msk.f32.gmra.mrb[54].mxu1 %vm768_vm5, %v11884_v39 }
 0xff6   : > { %9690 = vmatprep.mubr.msk.f32.mxu0 %vm768_vm5, %v11832_v28  ;;  %9760 = vmatprep.mubr.msk.f32.mxu1 %vm768_vm5, %v11832_v28 }
 0xff9   : > { %9691 = vmatmul.mubr.msk.f32.vlgmr.msra.gmra.mrb[48].mxu0 %vm768_vm5, %v11834_v52  ;;  %9761 = vmatmul.mubr.msk.f32.vlgmr.msra.gmra.mrb[56].mxu1 %vm768_vm5, %v11834_v52 }
 0xffa   : > { %10337 = vmatpush3.bf16.msra.mxu0 %v10334_v11  ;;  %9693 = vmatprep.mubr.msk.f32.mxu0 %vm768_vm5, %v11882_v15  ;;  %v8699_v11 = vld [vmem:[%s12589_s7 + $0xe8] sm:$0xff] }
 0xffb   : > { %9763 = vmatprep.mubr.msk.f32.mxu1 %vm768_vm5, %v11882_v15  ;;  %10385 = vmatpush3.bf16.msra.mxu1 %v10382_v63  ;;  %v10406_v62 = vpack.c.bf16 %v8699_v11, %v8698_v41  ;;  %v8701_v63 = vld [vmem:[%s12589_s7 + $0xf8] sm:$0xff] }
 0xffc   : > { %10339 = vmatprep.subr.bf16.mxu0 %v10338_v22  ;;  %10387 = vmatprep.subr.bf16.mxu1 %v10386_v23  ;;  %v10410_v0 = vpack.c.bf16 %v8701_v63, %v8700_v59 }
 0xffd   : > { %9694 = vmatmul.mubr.msk.f32.gmra.mrb[50].mxu0 %vm768_vm5, %v11884_v39  ;;  %9764 = vmatmul.mubr.msk.f32.gmra.mrb[58].mxu1 %vm768_vm5, %v11884_v39 }
 0xffe   : > { %10341 = vmatpush3.bf16.msra.mxu0 %v10338_v22  ;;  %9704 = vmatprep.mubr.msk.f32.mxu0 %vm768_vm5, %v11832_v28 }
 0xfff   : > { %10389 = vmatpush3.bf16.msra.mxu1 %v10386_v23  ;;  %9788 = vmatprep.mubr.msk.f32.mxu1 %vm768_vm5, %v11832_v28 }
0x1000   : > { %10343 = vmatprep.subr.bf16.mxu0 %v10342_v40  ;;  %10399 = vmatprep.subr.bf16.mxu1 %v10398_v44 }
0x1001   : > { %9705 = vmatmul.mubr.msk.f32.vlgmr.msra.gmra.mrb[52].mxu0 %vm768_vm5, %v11834_v52 }
0x1002   : > { %10345 = vmatpush3.bf16.msra.mxu0 %v10342_v40  ;;  %9789 = vmatmul.mubr.msk.f32.vlgmr.msra.gmra.mrb[60].mxu1 %vm768_vm5, %v11834_v52 }
0x1003   : > { %9707 = vmatprep.mubr.msk.f32.mxu0 %vm768_vm5, %v11882_v15  ;;  %9791 = vmatprep.mubr.msk.f32.mxu1 %vm768_vm5, %v11882_v15 }
0x1004   : > { %10401 = vmatpush3.bf16.msra.mxu1 %v10398_v44  ;;  %10347 = vmatprep.subr.bf16.mxu0 %v10346_v24 }
0x1005   : > { %9708 = vmatmul.mubr.msk.f32.gmra.mrb[54].mxu0 %vm768_vm5, %v11884_v39  ;;  %10403 = vmatprep.subr.bf16.mxu1 %v10402_v50 }
0x1006   : > { %10349 = vmatpush3.bf16.msra.mxu0 %v10346_v24  ;;  %9792 = vmatmul.mubr.msk.f32.gmra.mrb[62].mxu1 %vm768_vm5, %v11884_v39 }
0x1007   : > { %9718 = vmatprep.mubr.msk.f32.mxu0 %vm768_vm5, %v11832_v28  ;;  %9816 = vmatprep.mubr.msk.f32.mxu1 %vm768_vm5, %v11832_v28 }
0x1008   : > { %10405 = vmatpush3.bf16.msra.mxu1 %v10402_v50  ;;  %10359 = vmatprep.subr.bf16.mxu0 %v10358_v29 }
0x1009   : > { %9719 = vmatmul.mubr.msk.f32.vlgmr.msra.gmra.mrb[56].mxu0 %vm768_vm5, %v11834_v52 }
0x100a   : > { %10361 = vmatpush3.bf16.msra.mxu0 %v10358_v29  ;;  %9721 = vmatprep.mubr.msk.f32.mxu0 %vm768_vm5, %v11882_v15 }
0x100b   : > { %9817 = vmatmul.mubr.msk.f32.vlgmr.msra.gmra.mrb[64].mxu1 %vm768_vm5, %v11834_v52  ;;  %10363 = vmatprep.subr.bf16.mxu0 %v10362_v13 }
0x100c   : > { %9819 = vmatprep.mubr.msk.f32.mxu1 %vm768_vm5, %v11882_v15 }
0x100d   : > { %9722 = vmatmul.mubr.msk.f32.gmra.mrb[58].mxu0 %vm768_vm5, %v11884_v39 }
0x100e   : > { %10365 = vmatpush3.bf16.msra.mxu0 %v10362_v13  ;;  %9746 = vmatprep.mubr.msk.f32.mxu0 %vm768_vm5, %v11832_v28 }
0x100f   : > { %9820 = vmatmul.mubr.msk.f32.gmra.mrb[66].mxu1 %vm768_vm5, %v11884_v39  ;;  %10375 = vmatprep.subr.bf16.mxu0 %v10374_v6 }
0x1011   : > { %9747 = vmatmul.mubr.msk.f32.vlgmr.msra.gmra.mrb[60].mxu0 %vm768_vm5, %v11834_v52 }
0x1012   : > { %9749 = vmatprep.mubr.msk.f32.mxu0 %vm768_vm5, %v11882_v15  ;;  %10377 = vmatpush3.bf16.msra.mxu0 %v10374_v6 }
0x1013   : > { %10379 = vmatprep.subr.bf16.mxu0 %v10378_v53 }
0x1015   : > { %9750 = vmatmul.mubr.msk.f32.gmra.mrb[62].mxu0 %vm768_vm5, %v11884_v39 }
0x1016   : > { %10381 = vmatpush3.bf16.msra.mxu0 %v10378_v53  ;;  %9774 = vmatprep.mubr.msk.f32.mxu0 %vm768_vm5, %v11832_v28 }
0x1017   : > { %10391 = vmatprep.subr.bf16.mxu0 %v10390_v42 }
0x1019   : > { %9775 = vmatmul.mubr.msk.f32.vlgmr.msra.gmra.mrb[64].mxu0 %vm768_vm5, %v11834_v52 }
0x101a   : > { %9777 = vmatprep.mubr.msk.f32.mxu0 %vm768_vm5, %v11882_v15  ;;  %10393 = vmatpush3.bf16.msra.mxu0 %v10390_v42 }
0x101b   : > { %10395 = vmatprep.subr.bf16.mxu0 %v10394_v10 }
0x101d   : > { %9778 = vmatmul.mubr.msk.f32.gmra.mrb[66].mxu0 %vm768_vm5, %v11884_v39 }
0x101e   : > { %10397 = vmatpush3.bf16.msra.mxu0 %v10394_v10  ;;  %9802 = vmatprep.mubr.msk.f32.mxu0 %vm768_vm5, %v11832_v28 }
0x101f   : > { %10407 = vmatprep.subr.bf16.mxu0 %v10406_v62 }
0x1021   : > { %9803 = vmatmul.mubr.msk.f32.vlgmr.msra.gmra.mrb[68].mxu0 %vm768_vm5, %v11834_v52 }
0x1022   : > { %9805 = vmatprep.mubr.msk.f32.mxu0 %vm768_vm5, %v11882_v15  ;;  %10409 = vmatpush3.bf16.msra.mxu0 %v10406_v62 }
0x1023   : > { %10411 = vmatprep.subr.bf16.mxu0 %v10410_v0 }
0x1025   : > { %9806 = vmatmul.mubr.msk.f32.gmra.mrb[70].mxu0 %vm768_vm5, %v11884_v39 }
0x1026   : > { %10413 = vmatpush3.bf16.msra.mxu0 %v10410_v0  ;;  %9830 = vmatprep.mubr.msk.f32.mxu0 %vm768_vm5, %v11832_v28 }
0x1029   : > { %9831 = vmatmul.mubr.msk.f32.vlgmr.msra.gmra.mrb[72].mxu0 %vm768_vm5, %v11834_v52 }
0x102a   : > { %9833 = vmatprep.mubr.msk.f32.mxu0 %vm768_vm5, %v11882_v15 }
0x102d   : > { %9834 = vmatmul.mubr.msk.f32.gmra.mrb[74].mxu0 %vm768_vm5, %v11884_v39 }
0x1037   : > { %v9678_v58 = vpop.f32.mrb[44].mxu0  ;;  %v9734_v1 = vpop.f32.mrb[52].mxu1 }
0x1038   : > { %v4608_v2 = vpop.f32.mrb[45].mxu0  ;;  %v4968_v3 = vpop.f32.mrb[53].mxu1 }
0x1039   : > { %v10414_v54 = vpack.c.bf16 %v9734_v1, %v4968_v3  ;;  %9840 = vmatprep.mubr.msk.f32.mxu1 %vm1931_vm6, %v4608_v2 }
0x103b   : > { %10416 = vmatprep.subr.msk.bf16.mxu1 %vm11375_vm7, %v10414_v54 }
0x103c   : > { %10419 = vmatpush3.bf16.xpose.msk.msra.mxu1 %vm11375_vm7, %v10414_v54 }
0x1043   : > { %9841 = vmatmul.mubr.msk.f32.vlgmr.msra.gmra.mrb[68].mxu1 %vm1931_vm6, %v9678_v58 }
0x10c8   : > { %v12064_v28 = vpop.f32.mrb[46].mxu0  ;;  %v9737_v52 = vpop.f32.mrb[54].mxu1 }
0x10c9   : > { %v12066_v4 = vpop.f32.mrb[47].mxu0  ;;  %v4978_v5 = vpop.f32.mrb[55].mxu1 }
0x10ca   : > { %v12068_v14 = vpack.c.bf16 %v9737_v52, %v4978_v5 }
0x10cc   : > { %v9692_v16 = vpop.f32.mrb[48].mxu0  ;;  %v9762_v34 = vpop.f32.mrb[56].mxu1 }
0x10cd   : > { %v4698_v17 = vpop.f32.mrb[49].mxu0  ;;  %v5148_v15 = vpop.f32.mrb[57].mxu1 }
0x10ce   : > { %v10434_v39 = vpack.c.bf16 %v9762_v34, %v5148_v15  ;;  %9854 = vmatprep.mubr.msk.f32.mxu1 %vm1931_vm6, %v4698_v17 }
0x10d0   : > { %v12071_v38 = vpop.f32.mrb[50].mxu0  ;;  %v9765_v45 = vpop.f32.mrb[58].mxu1 }
0x10d1   : > { %v12073_v19 = vpop.f32.mrb[51].mxu0  ;;  %v5158_v20 = vpop.f32.mrb[59].mxu1 }
0x10d2   : > { %v12075_v22 = vpack.c.bf16 %v9765_v45, %v5158_v20 }
0x10d4   : > { %v9706_v23 = vpop.f32.mrb[52].mxu0 }
0x10d5   : > { %v9790_v27 = vpop.f32.mrb[60].mxu1  ;;  %v4788_v7 = vpop.f32.mrb[53].mxu0 }
0x10d6   : > { %v5328_v32 = vpop.f32.mrb[61].mxu1 }
0x10d7   : > { %v10420_v37 = vpack.c.bf16 %v9790_v27, %v5328_v32 }
0x10d8   : > { %v12077_v40 = vpop.f32.mrb[54].mxu0 }
0x10d9   : > { %v9793_v44 = vpop.f32.mrb[62].mxu1  ;;  %10421 = vmatprep.subr.bf16.mxu0 %v10420_v37  ;;  %v4798_v35 = vpop.f32.mrb[55].mxu0 }
0x10da   : > { %v5338_v25 = vpop.f32.mrb[63].mxu1  ;;  %10423 = vmatpush3.bf16.msra.mxu0 %v10420_v37 }
0x10db   : > { %v12079_v36 = vpack.c.bf16 %v9793_v44, %v5338_v25 }
0x10dc   : > { %v9720_v26 = vpop.f32.mrb[56].mxu0 }
0x10dd   : > { %v4878_v24 = vpop.f32.mrb[57].mxu0 }
0x10de   : > { %v9818_v50 = vpop.f32.mrb[64].mxu1 }
0x10df   : > { %v5508_v30 = vpop.f32.mrb[65].mxu1 }
0x10e0   : > { %v12081_v46 = vpack.c.bf16 %v9818_v50, %v5508_v30  ;;  %v12083_v29 = vpop.f32.mrb[58].mxu0 }
0x10e1   : > { %v4888_v12 = vpop.f32.mrb[59].mxu0 }
0x10e2   : > { %v9821_v48 = vpop.f32.mrb[66].mxu1 }
0x10e3   : > { %v5518_v13 = vpop.f32.mrb[67].mxu1 }
0x10e4   : > { %v12085_v31 = vpack.c.bf16 %v9821_v48, %v5518_v13  ;;  %v9748_v55 = vpop.f32.mrb[60].mxu0 }
0x10e5   : > { %v5058_v6 = vpop.f32.mrb[61].mxu0 }
0x10e6   : > { %v10424_v8 = vpack.c.bf16 %v9748_v55, %v5058_v6 }
0x10e8   : > { %v9751_v9 = vpop.f32.mrb[62].mxu0  ;;  %10426 = vmatprep.subr.msk.bf16.mxu1 %vm11375_vm7, %v10424_v8 }
0x10e9   : > { %v5068_v53 = vpop.f32.mrb[63].mxu0  ;;  %10429 = vmatpush3.bf16.xpose.msk.msra.mxu1 %vm11375_vm7, %v10424_v8 }
0x10ea   : > { %v10464_v51 = vpack.c.bf16 %v9751_v9, %v5068_v53  ;;  %10436 = vmatprep.subr.msk.bf16.mxu1 %vm11375_vm7, %v10434_v39 }
0x10ec   : > { %v9776_v33 = vpop.f32.mrb[64].mxu0 }
0x10ed   : > { %v5238_v42 = vpop.f32.mrb[65].mxu0 }
0x10ee   : > { %v10444_v47 = vpack.c.bf16 %v9776_v33, %v5238_v42 }
0x10f0   : > { %v9779_v49 = vpop.f32.mrb[66].mxu0  ;;  %9855 = vmatmul.mubr.msk.f32.vlgmr.msra.gmra.mrb[70].mxu1 %vm1931_vm6, %v9692_v16 }
0x10f1   : > { %v5248_v10 = vpop.f32.mrb[67].mxu0  ;;  %10439 = vmatpush3.bf16.xpose.msk.msra.mxu1 %vm11375_vm7, %v10434_v39  ;;  %9878 = vmatprep.mubr.msk.f32.mxu1 %vm1931_vm6, %v4788_v7 }
0x10f2   : > { %v10484_v41 = vpack.c.bf16 %v9779_v49, %v5248_v10  ;;  %10446 = vmatprep.subr.msk.bf16.mxu1 %vm11375_vm7, %v10444_v47 }
0x10f4   : > { %v9804_v11 = vpop.f32.mrb[68].mxu0 }
0x10f5   : > { %v5418_v62 = vpop.f32.mrb[69].mxu0 }
0x10f6   : > { %v12099_v59 = vpack.c.bf16 %v9804_v11, %v5418_v62 }
0x10f8   : > { %v9807_v63 = vpop.f32.mrb[70].mxu0  ;;  %10431 = vmatprep.subr.bf16.mxu0 %v12099_v59  ;;  %9879 = vmatmul.mubr.msk.f32.vlgmr.msra.gmra.mrb[72].mxu1 %vm1931_vm6, %v9706_v23 }
0x10f9   : > { %v5428_v0 = vpop.f32.mrb[71].mxu0  ;;  %10449 = vmatpush3.bf16.xpose.msk.msra.mxu1 %vm11375_vm7, %v10444_v47  ;;  %9897 = vmatprep.mubr.msk.f32.mxu1 %vm1931_vm6, %v4878_v24 }
0x10fa   : > { %v12106_v58 = vpack.c.bf16 %v9807_v63, %v5428_v0  ;;  %10456 = vmatprep.subr.msk.bf16.mxu1 %vm11375_vm7, %v12068_v14 }
0x10fc   : > { %v9832_v1 = vpop.f32.mrb[72].mxu0 }
0x10fd   : > { %v5598_v2 = vpop.f32.mrb[73].mxu0 }
0x10fe   : > { %v12111_v3 = vpack.c.bf16 %v9832_v1, %v5598_v2 }
0x1100   : > { %v9835_v54 = vpop.f32.mrb[74].mxu0  ;;  %9898 = vmatmul.mubr.msk.f32.vlgmr.msra.gmra.mrb[74].mxu1 %vm1931_vm6, %v9720_v26 }
0x1101   : > { %v5608_v52 = vpop.f32.mrb[75].mxu0  ;;  %10459 = vmatpush3.bf16.xpose.msk.msra.mxu1 %vm11375_vm7, %v12068_v14  ;;  %9916 = vmatprep.mubr.msk.f32.mxu1 %vm1931_vm6, %v12066_v4 }
0x1102   : > { %v12119_v5 = vpack.c.bf16 %v9835_v54, %v5608_v52  ;;  %10466 = vmatprep.subr.msk.bf16.mxu1 %vm11375_vm7, %v10464_v51 }
0x1108   : > { %9917 = vmatmul.mubr.msk.f32.vlgmr.msra.gmra.mrb[76].mxu1 %vm1931_vm6, %v12064_v28 }
0x1109   : > { %10469 = vmatpush3.bf16.xpose.msk.msra.mxu1 %vm11375_vm7, %v10464_v51  ;;  %9930 = vmatprep.mubr.msk.f32.mxu1 %vm1931_vm6, %v12073_v19 }
0x110a   : > { %10476 = vmatprep.subr.msk.bf16.mxu1 %vm11375_vm7, %v12075_v22 }
0x1110   : > { %9931 = vmatmul.mubr.msk.f32.vlgmr.msra.gmra.mrb[78].mxu1 %vm1931_vm6, %v12071_v38 }
0x1111   : > { %10479 = vmatpush3.bf16.xpose.msk.msra.mxu1 %vm11375_vm7, %v12075_v22  ;;  %9954 = vmatprep.mubr.msk.f32.mxu1 %vm1931_vm6, %v4798_v35 }
0x1112   : > { %10486 = vmatprep.subr.msk.bf16.mxu1 %vm11375_vm7, %v10484_v41 }
0x1116   : > { %v9842_v28 = vpop.f32.mrb[68].mxu1 }
0x1117   : > { %v5705_v4 = vmul.f32 0.35355338, %v9842_v28  ;;  %v5695_v14 = vpop.f32.mrb[69].mxu1 }
0x1118   : > { %v5704_v16 = vmul.f32 0.35355338, %v5695_v14  ;;  %9955 = vmatmul.mubr.msk.f32.vlgmr.msra.gmra.mrb[80].mxu1 %vm1931_vm6, %v12077_v40 }
0x1119   : > { %10489 = vmatpush3.bf16.xpose.msk.msra.mxu1 %vm11375_vm7, %v10484_v41  ;;  %9973 = vmatprep.mubr.msk.f32.mxu1 %vm1931_vm6, %v4888_v12  ;;  %v5709_v34 = vsel %vm2021_vm8, %v5705_v4, -inf }
0x111a   : > { %5710 = vmax.xlane.f32.xlu0 %v5709_v34  ;;  %v5706_v17 = vsel %vm2021_vm8, %v5704_v16, -inf }
0x111b   : > { %5707 = vmax.xlane.f32.xlu1 %v5706_v17 }
0x1120   : > { %9974 = vmatmul.mubr.msk.f32.vlgmr.msra.gmra.mrb[82].mxu1 %vm1931_vm6, %v12083_v29 }
0x11a7   : > { %v5711_v15 = vpop.xlane.xlu0 %5710 }
0x11a8   : > { %v5708_v39 = vpop.xlane.xlu1 %5707  ;;  %v5713_v38 = vsub.f32 %v5705_v4, %v5711_v15 }
0x11a9   : > { %v5712_v45 = vsub.f32 %v5704_v16, %v5708_v39 }
0x11aa   : > { %v5716_v19 = vmul.f32 1.442695, %v5713_v38 }
0x11ab   : > { %v5714_v20 = vmul.f32 1.442695, %v5712_v45 }
0x11ac   : > { %10721 = vpow2.f32 %v5716_v19 }
0x11ad   : > { %10723 = vpow2.f32 %v5714_v20 }
0x11b6   : > { %v10722_v32 = vpop.eup %10721 }
0x11b7   : > { %v10724_v40 = vpop.eup %10723  ;;  %v5721_v44 = vsel %vm2021_vm8, %v10722_v32, 0.0 }
0x11b8   : > { %v5718_v25 = vsel %vm2021_vm8, %v10724_v40, 0.0 }
0x11c3   : > { %v9856_v61 = vpop.f32.mrb[70].mxu1 }
0x11c4   : > { %v5899_v22 = vmul.f32 0.35355338, %v9856_v61  ;;  %v5889_v23 = vpop.f32.mrb[71].mxu1 }
0x11c5   : > { %v5898_v27 = vmul.f32 0.35355338, %v5889_v23 }
0x11c6   : > { %v5903_v7 = vsel %vm2021_vm8, %v5899_v22, -inf }
0x11c7   : > { %5904 = vmax.xlane.f32.xlu0 %v5903_v7  ;;  %v5900_v37 = vsel %vm2021_vm8, %v5898_v27, -inf }
0x11c8   : > { %5901 = vmax.xlane.f32.xlu1 %v5900_v37 }
0x11cb   : > { %5722 = vadd.xlane.f32.xlu0 %v5721_v44  ;;  %v9880_v35 = vpop.f32.mrb[72].mxu1 }
0x11cc   : > { %v6245_v26 = vpop.f32.mrb[73].mxu1  ;;  %5719 = vadd.xlane.f32.xlu1 %v5718_v25  ;;  %v6255_v62 = vmul.f32 0.35355338, %v9880_v35  ;;  %v12188_v25 = vld [vmem:[%s12590_s8 + $0x28] sm:$0xff] }
0x11cd   : > { %v6254_v1 = vmul.f32 0.35355338, %v6245_v26 }
0x11ce   : > { %v6259_v4 = vsel %vm2021_vm8, %v6255_v62, -inf }
0x11cf   : > { %v6256_v14 = vsel %vm2021_vm8, %v6254_v1, -inf }
0x11d3   : > { %v9899_v24 = vpop.f32.mrb[74].mxu1 }
0x11d4   : > { %v6522_v50 = vpop.f32.mrb[75].mxu1  ;;  %v6532_v7 = vmul.f32 0.35355338, %v9899_v24 }
0x11d5   : > { %v6531_v37 = vmul.f32 0.35355338, %v6522_v50  ;;  %v12195_v50 = vld [vmem:[%s12590_s8 + $0x20] sm:$0xff] }
0x11d6   : > { %v6536_v44 = vsel %vm2021_vm8, %v6532_v7, -inf }
0x11d7   : > { %v6533_v35 = vsel %vm2021_vm8, %v6531_v37, -inf }
0x11db   : > { %v12153_v30 = vpop.f32.mrb[76].mxu1 }
0x11dc   : > { %v12155_v29 = vpop.f32.mrb[77].mxu1 }
0x11e3   : > { %v12157_v12 = vpop.f32.mrb[78].mxu1 }
0x11e4   : > { %v12159_v48 = vpop.f32.mrb[79].mxu1 }
0x11eb   : > { %v12161_v13 = vpop.f32.mrb[80].mxu1 }
0x11ec   : > { %v12163_v55 = vpop.f32.mrb[81].mxu1 }
0x11f3   : > { %v12165_v6 = vpop.f32.mrb[82].mxu1 }
0x11f4   : > { %v12167_v8 = vpop.f32.mrb[83].mxu1 }
0x1254   : > { %v5905_v9 = vpop.xlane.xlu0 %5904 }
0x1255   : > { %v5907_v53 = vsub.f32 %v5899_v22, %v5905_v9  ;;  %v5902_v51 = vpop.xlane.xlu1 %5901 }
0x1256   : > { %v5906_v33 = vsub.f32 %v5898_v27, %v5902_v51 }
0x1257   : > { %v5910_v42 = vmul.f32 1.442695, %v5907_v53 }
0x1258   : > { %v5908_v47 = vmul.f32 1.442695, %v5906_v33  ;;  %v5723_v49 = vpop.xlane.xlu0 %5722 }
0x1259   : > { %10725 = vpow2.f32 %v5910_v42  ;;  %v5720_v10 = vpop.xlane.xlu1 %5719 }
0x125a   : > { %10727 = vpow2.f32 %v5908_v47 }
0x125b   : > { %10729 = vrcp.f32 %v5723_v49 }
0x125c   : > { %10731 = vrcp.f32 %v5720_v10 }
0x1263   : > { %v10726_v41 = vpop.eup %10725 }
0x1264   : > { %v10728_v11 = vpop.eup %10727  ;;  %v5915_v63 = vsel %vm2021_vm8, %v10726_v41, 0.0 }
0x1265   : > { %v10730_v0 = vpop.eup %10729  ;;  %5916 = vadd.xlane.f32.xlu0 %v5915_v63  ;;  %v5912_v2 = vsel %vm2021_vm8, %v10728_v11, 0.0 }
0x1266   : > { %v10732_v54 = vpop.eup %10731  ;;  %5913 = vadd.xlane.f32.xlu1 %v5912_v2  ;;  %v5727_v28 = vmul.f32 %v10730_v0, %v10722_v32  ;;  %v6808_v0 = vmul.f32 0.35355338, %v12155_v29  ;;  %v7001_v2 = vmul.f32 0.35355338, %v12157_v12 }
0x1267   : > { %v5726_v52 = vmul.f32 %v10732_v54, %v10724_v40 }
0x1269   : > { %9847 = vmatprep.mubr.msk.f32.mxu0 %vm2021_vm8, %v5726_v52  ;;  %6260 = vmax.xlane.f32.xlu0 %v6259_v4  ;;  %v7000_v52 = vmul.f32 0.35355338, %v12159_v48 }
0x126a   : > { %9848 = vmatmul.mubr.msk.f32.vlgmr.msra.gmra.mrb[76].mxu0 %vm2021_vm8, %v5727_v28  ;;  %6257 = vmax.xlane.f32.xlu1 %v6256_v14  ;;  %v6810_v28 = vsel %vm2021_vm8, %v6808_v0, -inf }
0x126b   : > { %10433 = vmatpush3.bf16.msra.mxu0 %v12099_v59  ;;  %v7002_v29 = vsel %vm2021_vm8, %v7000_v52, -inf }
0x126c   : > { %9864 = vmatprep.subr.mxu0 %v12188_v25 }
0x12f2   : > { %v5917_v16 = vpop.xlane.xlu0 %5916 }
0x12f3   : > { %10733 = vrcp.f32 %v5917_v16  ;;  %v5914_v34 = vpop.xlane.xlu1 %5913 }
0x12f4   : > { %10735 = vrcp.f32 %v5914_v34  ;;  %v12222_v34 = vld [vmem:[%s12590_s8 + $0x30] sm:$0xff] }
0x12f6   : > { %v6261_v17 = vpop.xlane.xlu0 %6260 }
0x12f7   : > { %v6263_v15 = vsub.f32 %v6255_v62, %v6261_v17  ;;  %v6258_v39 = vpop.xlane.xlu1 %6257  ;;  %v6809_v62 = vmul.f32 0.35355338, %v12153_v30  ;;  %v7005_v30 = vsel %vm2021_vm8, %v7001_v2, -inf }
0x12f8   : > { %v6262_v38 = vsub.f32 %v6254_v1, %v6258_v39 }
0x12f9   : > { %v6266_v45 = vmul.f32 1.442695, %v6263_v15  ;;  %v6813_v54 = vsel %vm2021_vm8, %v6809_v62, -inf }
0x12fa   : > { %v6264_v19 = vmul.f32 1.442695, %v6262_v38 }
0x12fb   : > { %10737 = vpow2.f32 %v6266_v45 }
0x12fc   : > { %10739 = vpow2.f32 %v6264_v19 }
0x12fd   : > { %v10734_v20 = vpop.eup %10733 }
0x12fe   : > { %v10736_v61 = vpop.eup %10735  ;;  %v5921_v23 = vmul.f32 %v10734_v20, %v10726_v41 }
0x12ff   : > { %v5920_v22 = vmul.f32 %v10736_v61, %v10728_v11 }
0x1301   : > { %9861 = vmatprep.mubr.msk.f32.mxu0 %vm2021_vm8, %v5920_v22 }
0x1302   : > { %9862 = vmatmul.mubr.msk.f32.vlgmr.msra.gmra.mrb[78].mxu0 %vm2021_vm8, %v5921_v23 }
0x1303   : > { %9865 = vmatpush3.msra.mxu0 %v12188_v25 }
0x1304   : > { %9869 = vmatprep.subr.mxu0 %v12195_v50 }
0x1305   : > { %v12178_v59 = vpop.eup %10737 }
0x1306   : > { %v10740_v27 = vpop.eup %10739  ;;  %v6271_v32 = vsel %vm2021_vm8, %v12178_v59, 0.0 }
0x1307   : > { %6272 = vadd.xlane.f32.xlu0 %v6271_v32  ;;  %v6268_v40 = vsel %vm2021_vm8, %v10740_v27, 0.0 }
0x1308   : > { %6269 = vadd.xlane.f32.xlu1 %v6268_v40 }
0x130b   : > { %6537 = vmax.xlane.f32.xlu0 %v6536_v44 }
0x130c   : > { %6534 = vmax.xlane.f32.xlu1 %v6533_v35 }
0x133d   : > { %v9849_v26 = vpop.f32.mrb[76].mxu0 }
0x133e   : > { %v5800_v24 = vpop.f32.mrb[77].mxu0 }
0x1394   : > { %v6273_v9 = vpop.xlane.xlu0 %6272 }
0x1395   : > { %v6270_v53 = vpop.xlane.xlu1 %6269 }
0x1398   : > { %v6538_v51 = vpop.xlane.xlu0 %6537 }
0x1399   : > { %v6540_v33 = vsub.f32 %v6532_v7, %v6538_v51  ;;  %v6535_v42 = vpop.xlane.xlu1 %6534  ;;  %v7354_v51 = vmul.f32 0.35355338, %v12163_v55 }
0x139a   : > { %v6539_v47 = vsub.f32 %v6531_v37, %v6535_v42 }
0x139b   : > { %v6543_v49 = vmul.f32 1.442695, %v6540_v33 }
0x139c   : > { %v6541_v10 = vmul.f32 1.442695, %v6539_v47  ;;  %v7356_v47 = vsel %vm2021_vm8, %v7354_v51, -inf }
0x139d   : > { %10741 = vpow2.f32 %v6543_v49 }
0x139e   : > { %10743 = vpow2.f32 %v6541_v10 }
0x139f   : > { %10745 = vrcp.f32 %v6270_v53 }
0x13a0   : > { %10747 = vrcp.f32 %v6273_v9  ;;  %v7355_v9 = vmul.f32 0.35355338, %v12161_v13 }
0x13a2   : > { %v7359_v42 = vsel %vm2021_vm8, %v7355_v9, -inf }
0x13a7   : > { %v12198_v41 = vpop.eup %10741 }
0x13a8   : > { %v12200_v11 = vpop.eup %10743  ;;  %v6548_v63 = vsel %vm2021_vm8, %v12198_v41, 0.0 }
0x13a9   : > { %6549 = vadd.xlane.f32.xlu0 %v6548_v63  ;;  %v6545_v1 = vsel %vm2021_vm8, %v12200_v11, 0.0  ;;  %v10746_v12 = vpop.eup %10745  ;;  %v12257_v63 = vld [vmem:[%s12590_s8 + $0x38] sm:$0xff] }
0x13aa   : > { %6546 = vadd.xlane.f32.xlu1 %v6545_v1  ;;  %v10748_v48 = vpop.eup %10747  ;;  %v6276_v16 = vmul.f32 %v10746_v12, %v10740_v27  ;;  %v7630_v12 = vmul.f32 0.35355338, %v12165_v6 }
0x13ab   : > { %v6277_v17 = vmul.f32 %v10748_v48, %v12178_v59 }
0x13ad   : > { %6814 = vmax.xlane.f32.xlu0 %v6813_v54 }
0x13ae   : > { %6811 = vmax.xlane.f32.xlu1 %v6810_v28 }
0x13b1   : > { %7006 = vmax.xlane.f32.xlu0 %v7005_v30 }
0x13b2   : > { %7003 = vmax.xlane.f32.xlu1 %v7002_v29 }
0x13d5   : > { %v9863_v4 = vpop.f32.mrb[78].mxu0 }
0x13d6   : > { %v5994_v14 = vpop.f32.mrb[79].mxu0 }
0x13d7   : > { %9866 = vmatprep.mubr.msk.f32.mxu0 %vm1931_vm6, %v5994_v14 }
0x13d8   : > { %9867 = vmatmul.mubr.msk.f32.vlgmr.msra.gmra.mrb[80].mxu0 %vm1931_vm6, %v9863_v4 }
0x13d9   : > { %9870 = vmatpush3.msra.mxu0 %v12195_v50  ;;  %9871 = vmatprep.mubr.msk.f32.mxu0 %vm1931_vm6, %v5800_v24 }
0x13da   : > { %10441 = vmatprep.subr.bf16.mxu0 %v12081_v46 }
0x13e0   : > { %9872 = vmatmul.mubr.msk.f32.vlgmr.msra.gmra.mrb[80].mxu0 %vm1931_vm6, %v9849_v26 }
0x13e1   : > { %10443 = vmatpush3.bf16.msra.mxu0 %v12081_v46  ;;  %9885 = vmatprep.mubr.msk.f32.mxu0 %vm2021_vm8, %v6276_v16  ;;  %v7629_v16 = vmul.f32 0.35355338, %v12167_v8 }
0x13e2   : > { %9888 = vmatprep.subr.mxu0 %v12222_v34 }
0x13e4   : > { %9886 = vmatmul.mubr.msk.f32.vlgmr.msra.gmra.mrb[82].mxu0 %vm2021_vm8, %v6277_v17 }
0x13e5   : > { %9889 = vmatpush3.msra.mxu0 %v12222_v34 }
0x13e6   : > { %10451 = vmatprep.subr.bf16.mxu0 %v12111_v3 }
0x1436   : > { %v6550_v15 = vpop.xlane.xlu0 %6549 }
0x1437   : > { %v6547_v39 = vpop.xlane.xlu1 %6546 }
0x143a   : > { %v6815_v38 = vpop.xlane.xlu0 %6814 }
0x143b   : > { %v6817_v45 = vsub.f32 %v6809_v62, %v6815_v38  ;;  %v6812_v19 = vpop.xlane.xlu1 %6811 }
0x143c   : > { %v6816_v20 = vsub.f32 %v6808_v0, %v6812_v19 }
0x143d   : > { %v6820_v61 = vmul.f32 1.442695, %v6817_v45 }
0x143e   : > { %v6818_v46 = vmul.f32 1.442695, %v6816_v20  ;;  %v7007_v22 = vpop.xlane.xlu0 %7006 }
0x143f   : > { %10749 = vpow2.f32 %v6820_v61  ;;  %v7009_v23 = vsub.f32 %v7001_v2, %v7007_v22  ;;  %v7004_v59 = vpop.xlane.xlu1 %7003 }
0x1440   : > { %10751 = vpow2.f32 %v6818_v46  ;;  %v7008_v27 = vsub.f32 %v7000_v52, %v7004_v59 }
0x1441   : > { %v7012_v7 = vmul.f32 1.442695, %v7009_v23 }
0x1442   : > { %v7010_v32 = vmul.f32 1.442695, %v7008_v27 }
0x1443   : > { %10753 = vpow2.f32 %v7012_v7 }
0x1444   : > { %10755 = vpow2.f32 %v7010_v32 }
0x1445   : > { %10757 = vrcp.f32 %v6547_v39  ;;  %v7631_v39 = vsel %vm2021_vm8, %v7629_v16, -inf }
0x1446   : > { %10759 = vrcp.f32 %v6550_v15  ;;  %v7634_v15 = vsel %vm2021_vm8, %v7630_v12, -inf }
0x1449   : > { %v12232_v37 = vpop.eup %10749 }
0x144a   : > { %v12234_v40 = vpop.eup %10751  ;;  %v6825_v44 = vsel %vm2021_vm8, %v12232_v37, 0.0 }
0x144b   : > { %6826 = vadd.xlane.f32.xlu0 %v6825_v44  ;;  %v6822_v35 = vsel %vm2021_vm8, %v12234_v40, 0.0 }
0x144c   : > { %6823 = vadd.xlane.f32.xlu1 %v6822_v35 }
0x144d   : > { %v12240_v26 = vpop.eup %10753 }
0x144e   : > { %v12242_v24 = vpop.eup %10755  ;;  %v7017_v53 = vsel %vm2021_vm8, %v12240_v26, 0.0 }
0x144f   : > { %7018 = vadd.xlane.f32.xlu0 %v7017_v53  ;;  %v7014_v33 = vsel %vm2021_vm8, %v12242_v24, 0.0  ;;  %v10758_v49 = vpop.eup %10757 }
0x1450   : > { %7015 = vadd.xlane.f32.xlu1 %v7014_v33  ;;  %v10760_v62 = vpop.eup %10759  ;;  %v6553_v55 = vmul.f32 %v10758_v49, %v12200_v11 }
0x1451   : > { %v6554_v0 = vmul.f32 %v10760_v62, %v12198_v41 }
0x1453   : > { %7360 = vmax.xlane.f32.xlu0 %v7359_v42 }
0x1454   : > { %7357 = vmax.xlane.f32.xlu1 %v7356_v47 }
0x14b7   : > { %v9887_v13 = vpop.f32.mrb[82].mxu0 }
0x14b8   : > { %v6350_v10 = vpop.f32.mrb[83].mxu0 }
0x14b9   : > { %9890 = vmatprep.mubr.msk.f32.mxu0 %vm1931_vm6, %v6350_v10 }
0x14ba   : > { %9891 = vmatmul.mubr.msk.f32.vlgmr.msra.gmra.mrb[80].mxu0 %vm1931_vm6, %v9887_v13 }
0x14bb   : > { %10453 = vmatpush3.bf16.msra.mxu0 %v12111_v3  ;;  %9904 = vmatprep.mubr.msk.f32.mxu0 %vm2021_vm8, %v6553_v55 }
0x14bc   : > { %9907 = vmatprep.subr.mxu0 %v12257_v63 }
0x14be   : > { %9905 = vmatmul.mubr.msk.f32.vlgmr.msra.gmra.mrb[84].mxu0 %vm2021_vm8, %v6554_v0 }
0x14bf   : > { %9908 = vmatpush3.msra.mxu0 %v12257_v63 }
0x14c0   : > { %10461 = vmatprep.subr.bf16.mxu0 %v12079_v36 }
0x14d8   : > { %v6827_v11 = vpop.xlane.xlu0 %6826 }
0x14d9   : > { %v6824_v1 = vpop.xlane.xlu1 %6823 }
0x14dc   : > { %v7019_v2 = vpop.xlane.xlu0 %7018 }
0x14dd   : > { %v7016_v54 = vpop.xlane.xlu1 %7015 }
0x14e0   : > { %v7361_v52 = vpop.xlane.xlu0 %7360 }
0x14e1   : > { %v7363_v28 = vsub.f32 %v7355_v9, %v7361_v52  ;;  %v7358_v30 = vpop.xlane.xlu1 %7357 }
0x14e2   : > { %v7362_v3 = vsub.f32 %v7354_v51, %v7358_v30 }
0x14e3   : > { %v7366_v29 = vmul.f32 1.442695, %v7363_v28 }
0x14e4   : > { %v7364_v4 = vmul.f32 1.442695, %v7362_v3 }
0x14e5   : > { %10761 = vpow2.f32 %v7366_v29 }
0x14e6   : > { %10763 = vpow2.f32 %v7364_v4 }
0x14e7   : > { %10765 = vrcp.f32 %v6824_v1 }
0x14ef   : > { %v12267_v41 = vpop.eup %10761 }
0x14f0   : > { %v12269_v14 = vpop.eup %10763  ;;  %v7371_v48 = vsel %vm2021_vm8, %v12267_v41, 0.0 }
0x14f1   : > { %7372 = vadd.xlane.f32.xlu0 %v7371_v48  ;;  %v7368_v17 = vsel %vm2021_vm8, %v12269_v14, 0.0  ;;  %v10766_v22 = vpop.eup %10765 }
0x14f2   : > { %7369 = vadd.xlane.f32.xlu1 %v7368_v17  ;;  %v6830_v9 = vmul.f32 %v10766_v22, %v12234_v40 }
0x14f5   : > { %7635 = vmax.xlane.f32.xlu0 %v7634_v15 }
0x14f6   : > { %7632 = vmax.xlane.f32.xlu1 %v7631_v39 }
0x157e   : > { %v7373_v38 = vpop.xlane.xlu0 %7372 }
0x157f   : > { %v7370_v45 = vpop.xlane.xlu1 %7369 }
0x1582   : > { %v7636_v19 = vpop.xlane.xlu0 %7635 }
0x1583   : > { %v7638_v6 = vsub.f32 %v7630_v12, %v7636_v19  ;;  %v7633_v20 = vpop.xlane.xlu1 %7632 }
0x1584   : > { %v7637_v61 = vsub.f32 %v7629_v16, %v7633_v20 }
0x1585   : > { %v7641_v46 = vmul.f32 1.442695, %v7638_v6 }
0x1586   : > { %v7639_v8 = vmul.f32 1.442695, %v7637_v61 }
0x1587   : > { %10767 = vpow2.f32 %v7641_v46 }
0x1588   : > { %10769 = vpow2.f32 %v7639_v8  ;;  %v8782_v8 = vld [vmem:[%s12594_s12 + $0x30] sm:$0xff] }
0x1589   : > { %10771 = vrcp.f32 %v6827_v11 }
0x158a   : > { %10773 = vrcp.f32 %v7016_v54 }
0x158b   : > { %10775 = vrcp.f32 %v7019_v2 }
0x158c   : > { %10777 = vrcp.f32 %v7370_v45 }
0x158d   : > { %10779 = vrcp.f32 %v7373_v38 }
0x1591   : > { %v12279_v23 = vpop.eup %10767  ;;  %v9906_v59 = vpop.f32.mrb[84].mxu0 }
0x1592   : > { %v12281_v27 = vpop.eup %10769  ;;  %v6627_v7 = vpop.f32.mrb[85].mxu0  ;;  %v7646_v32 = vsel %vm2021_vm8, %v12279_v23, 0.0 }
0x1593   : > { %v10772_v44 = vpop.eup %10771  ;;  %7647 = vadd.xlane.f32.xlu0 %v7646_v32  ;;  %9909 = vmatprep.mubr.msk.f32.mxu0 %vm1931_vm6, %v6627_v7  ;;  %v7643_v35 = vsel %vm2021_vm8, %v12281_v27, 0.0 }
0x1594   : > { %v10774_v53 = vpop.eup %10773  ;;  %7644 = vadd.xlane.f32.xlu1 %v7643_v35  ;;  %9910 = vmatmul.mubr.msk.f32.vlgmr.msra.gmra.mrb[80].mxu0 %vm1931_vm6, %v9906_v59  ;;  %v6831_v51 = vmul.f32 %v10772_v44, %v12232_v37 }
0x1595   : > { %10463 = vmatpush3.bf16.msra.mxu0 %v12079_v36  ;;  %9923 = vmatprep.mubr.msk.f32.mxu0 %vm2021_vm8, %v6830_v9  ;;  %v10776_v33 = vpop.eup %10775  ;;  %v7022_v42 = vmul.f32 %v10774_v53, %v12242_v24  ;;  %v12306_v36 = vld [vmem:[%s12591_s9 + $0x1] ss:$0 sm:$0xff] }
0x1596   : > { %10471 = vmatprep.subr.bf16.mxu0 %v12106_v58  ;;  %v7023_v40 = vmul.f32 %v10776_v33, %v12240_v26 }
0x1598   : > { %9924 = vmatmul.mubr.msk.f32.vlgmr.msra.gmra.mrb[86].mxu0 %vm2021_vm8, %v6831_v51 }
0x1599   : > { %10473 = vmatpush3.bf16.msra.mxu0 %v12106_v58  ;;  %9937 = vmatprep.mubr.msk.f32.mxu0 %vm2021_vm8, %v7022_v42 }
0x159a   : > { %9940 = vmatprep.subr.mxu0 %v12188_v25 }
0x159c   : > { %9938 = vmatmul.mubr.msk.f32.vlgmr.msra.gmra.mrb[88].mxu0 %vm2021_vm8, %v7023_v40 }
0x159d   : > { %9941 = vmatpush3.msra.mxu0 %v12188_v25 }
0x159e   : > { %9945 = vmatprep.subr.mxu0 %v12195_v50 }
0x1620   : > { %v7648_v2 = vpop.xlane.xlu0 %7647 }
0x1667   : > { %v9911_v37 = vpop.f32.mrb[80].mxu0 }
0x1668   : > { %v7826_v58 = vadd.f32 %v9911_v37, %v12306_v36  ;;  %v6710_v24 = vpop.f32.mrb[81].mxu0 }
0x1669   : > { %v7825_v47 = vadd.f32 %v12306_v36, %v6710_v24 }
0x166a   : > { %v7830_v26 = vadd.f32 %v7826_v58, %v11770_v57  ;;  %v10778_v57 = vpop.eup %10777 }
0x166b   : > { %v9925_v49 = vpop.f32.mrb[86].mxu0  ;;  %v7829_v13 = vadd.f32 %v7825_v47, %v11772_v43  ;;  %v10780_v43 = vpop.eup %10779  ;;  %v7376_v11 = vmul.f32 %v10778_v57, %v12269_v14 }
0x166c   : > { %v6904_v25 = vpop.f32.mrb[87].mxu0  ;;  %v7840_v10 = vsel %vm768_vm5, %v7830_v26, 0.0  ;;  %v7377_v1 = vmul.f32 %v10780_v43, %v12267_v41 }
0x166d   : > { %7841 = vadd.xlane.f32.xlu0 %v7840_v10  ;;  %v7837_v62 = vsel %vm768_vm5, %v7829_v13, 0.0 }
0x166e   : > { %7838 = vadd.xlane.f32.xlu1 %v7837_v62  ;;  %v8779_v62 = vld [vmem:[%s12593_s11 + $0x1] ss:$0 sm:$0xff] }
0x166f   : > { %v9939_v55 = vpop.f32.mrb[88].mxu0 }
0x1670   : > { %v7096_v0 = vpop.f32.mrb[89].mxu0 }
0x1671   : > { %9942 = vmatprep.mubr.msk.f32.mxu0 %vm1931_vm6, %v7096_v0 }
0x1672   : > { %9943 = vmatmul.mubr.msk.f32.vlgmr.msra.gmra.mrb[90].mxu0 %vm1931_vm6, %v9939_v55 }
0x1673   : > { %9946 = vmatpush3.msra.mxu0 %v12195_v50  ;;  %9947 = vmatprep.mubr.msk.f32.mxu0 %vm1931_vm6, %v6904_v25  ;;  %v7645_v50 = vpop.xlane.xlu1 %7644 }
0x1674   : > { %10481 = vmatprep.subr.bf16.mxu0 %v12085_v31  ;;  %10781 = vrcp.f32 %v7645_v50  ;;  %v8792_v50 = vld [vmem:[%s12596_s14 + $0x90] sm:$0xff] }
0x1675   : > { %10783 = vrcp.f32 %v7648_v2 }
0x167a   : > { %9948 = vmatmul.mubr.msk.f32.vlgmr.msra.gmra.mrb[90].mxu0 %vm1931_vm6, %v9925_v49  ;;  %v12372_v49 = vld [vmem:[%s12592_s10 + $0x1] ss:$0 sm:$0xff] }
0x167b   : > { %10483 = vmatpush3.bf16.msra.mxu0 %v12085_v31  ;;  %9961 = vmatprep.mubr.msk.f32.mxu0 %vm2021_vm8, %v7376_v11  ;;  %v8790_v11 = vld [vmem:[%s12596_s14 + $0x80] sm:$0xff] }
0x167c   : > { %9964 = vmatprep.subr.mxu0 %v12222_v34 }
0x167e   : > { %9962 = vmatmul.mubr.msk.f32.vlgmr.msra.gmra.mrb[92].mxu0 %vm2021_vm8, %v7377_v1  ;;  %v10782_v54 = vpop.eup %10781  ;;  %v8791_v1 = vld [vmem:[%s12596_s14 + $0x88] sm:$0xff] }
0x167f   : > { %9965 = vmatpush3.msra.mxu0 %v12222_v34  ;;  %v10784_v31 = vpop.eup %10783  ;;  %v7651_v30 = vmul.f32 %v10782_v54, %v12281_v27  ;;  %v10502_v2 = vpack.c.bf16 %v8791_v1, %v8790_v11  ;;  %v8793_v54 = vld [vmem:[%s12596_s14 + $0x98] sm:$0xff]  ;;  %v8162_v1 = vld [vmem:[%s12598_s16] sm:$0xff] }
0x1680   : > { %10491 = vmatprep.subr.bf16.mxu0 %v12119_v5  ;;  %v7652_v34 = vmul.f32 %v10784_v31, %v12279_v23  ;;  %v8783_v23 = vld [vmem:[%s12594_s12 + $0x38] sm:$0xff]  ;;  %v8795_v31 = vld [vmem:[%s12596_s14 + $0xa8] sm:$0xff] }
0x1681   : > { %v10498_v59 = vpack.c.bf16 %v8783_v23, %v8782_v8 }
0x16fa   : > { %v7842_v4 = vpop.xlane.xlu0 %7841 }
0x16fb   : > { %v7839_v41 = vpop.xlane.xlu1 %7838  ;;  %v7850_v14 = vmul.f32 0.03125, %v7842_v4  ;;  %v8798_v4 = vld [vmem:[%s12596_s14 + $0xc0] sm:$0xff] }
0x16fd   : > { %v7854_v48 = vsub.f32 %v7830_v26, %v7850_v14 }
0x16ff   : > { %v7858_v19 = vmul.f32 %v7854_v48, %v7854_v48 }
0x1701   : > { %v7864_v61 = vsel %vm768_vm5, %v7858_v19, 0.0 }
0x1751   : > { %v9963_v52 = vpop.f32.mrb[92].mxu0 }
0x1752   : > { %v7450_v28 = vpop.f32.mrb[93].mxu0 }
0x1753   : > { %9966 = vmatprep.mubr.msk.f32.mxu0 %vm1931_vm6, %v7450_v28  ;;  %v8794_v28 = vld [vmem:[%s12596_s14 + $0xa0] sm:$0xff] }
0x1754   : > { %9967 = vmatmul.mubr.msk.f32.vlgmr.msra.gmra.mrb[90].mxu0 %vm1931_vm6, %v9963_v52  ;;  %v10506_v52 = vpack.c.bf16 %v8793_v54, %v8792_v50  ;;  %v8163_v50 = vld [vmem:[%s12598_s16 + $0x8] sm:$0xff]  ;;  %v8165_v54 = vld [vmem:[%s12598_s16 + $0x18] sm:$0xff] }
0x1755   : > { %10493 = vmatpush3.bf16.msra.mxu0 %v12119_v5  ;;  %9980 = vmatprep.mubr.msk.f32.mxu0 %vm2021_vm8, %v7651_v30  ;;  %v7849_v5 = vmul.f32 0.03125, %v7839_v41  ;;  %v10510_v30 = vpack.c.bf16 %v8795_v31, %v8794_v28  ;;  %v8799_v41 = vld [vmem:[%s12596_s14 + $0xc8] sm:$0xff] }
0x1756   : > { %9983 = vmatprep.subr.mxu0 %v12257_v63  ;;  %v10518_v14 = vpack.c.bf16 %v8799_v41, %v8798_v4 }
0x1757   : > { %v7853_v15 = vsub.f32 %v7829_v13, %v7849_v5  ;;  %v8800_v5 = vld [vmem:[%s12596_s14 + $0xd0] sm:$0xff] }
0x1758   : > { %9981 = vmatmul.mubr.msk.f32.vlgmr.msra.gmra.mrb[94].mxu0 %vm2021_vm8, %v7652_v34  ;;  %v8796_v34 = vld [vmem:[%s12596_s14 + $0xb0] sm:$0xff] }
0x1759   : > { %9984 = vmatpush3.msra.mxu0 %v12257_v63  ;;  %v7857_v20 = vmul.f32 %v7853_v15, %v7853_v15 }
0x175a   : > { %10503 = vmatprep.subr.bf16.mxu0 %v10502_v2 }
0x175b   : > { %v7861_v46 = vsel %vm768_vm5, %v7857_v20, 0.0 }
0x182b   : > { %v9982_v3 = vpop.f32.mrb[94].mxu0 }
0x182c   : > { %v7725_v29 = vpop.f32.mrb[95].mxu0 }
0x182d   : > { %9985 = vmatprep.mubr.msk.f32.mxu0 %vm1931_vm6, %v7725_v29 }
0x182e   : > { %9986 = vmatmul.mubr.msk.f32.vlgmr.msra.gmra.mrb[90].mxu0 %vm1931_vm6, %v9982_v3  ;;  %v8797_v3 = vld [vmem:[%s12596_s14 + $0xb8] sm:$0xff] }
0x182f   : > { %10505 = vmatpush3.bf16.msra.mxu0 %v10502_v2  ;;  %v10514_v29 = vpack.c.bf16 %v8797_v3, %v8796_v34  ;;  %v10535_v2 = vpack.c.bf16 %v8163_v50, %v8162_v1 }
0x1830   : > { %10507 = vmatprep.subr.bf16.mxu0 %v10506_v52 }
0x1833   : > { %10509 = vmatpush3.bf16.msra.mxu0 %v10506_v52 }
0x1834   : > { %10511 = vmatprep.subr.bf16.mxu0 %v10510_v30 }
0x1837   : > { %10513 = vmatpush3.bf16.msra.mxu0 %v10510_v30 }
0x1838   : > { %10515 = vmatprep.subr.bf16.mxu0 %v10514_v29 }
0x183b   : > { %10517 = vmatpush3.bf16.msra.mxu0 %v10514_v29 }
0x183c   : > { %10519 = vmatprep.subr.bf16.mxu0 %v10518_v14 }
0x183f   : > { %10521 = vmatpush3.bf16.msra.mxu0 %v10518_v14 }
0x1901   : > { %v9987_v12 = vpop.f32.mrb[90].mxu0 }
0x1902   : > { %v7828_v16 = vadd.f32 %v9987_v12, %v12306_v36  ;;  %v7806_v17 = vpop.f32.mrb[91].mxu0  ;;  %v8801_v12 = vld [vmem:[%s12596_s14 + $0xd8] sm:$0xff] }
0x1903   : > { %v7827_v39 = vadd.f32 %v12306_v36, %v7806_v17  ;;  %v8803_v17 = vld [vmem:[%s12596_s14 + $0xe8] sm:$0xff] }
0x1904   : > { %v7832_v63 = vadd.f32 %v7828_v16, %v11778_v60  ;;  %v8780_v60 = vld [vmem:[%s12594_s12 + $0x20] sm:$0xff] }
0x1905   : > { %v7831_v38 = vadd.f32 %v7827_v39, %v11780_v56  ;;  %v8781_v56 = vld [vmem:[%s12594_s12 + $0x28] sm:$0xff]  ;;  %v8802_v16 = vld [vmem:[%s12596_s14 + $0xe0] sm:$0xff]  ;;  %v8804_v39 = vld [vmem:[%s12596_s14 + $0xf0] sm:$0xff] }
0x1906   : > { %v7846_v45 = vsel %vm768_vm5, %v7832_v63, 0.0  ;;  %v10494_v22 = vpack.c.bf16 %v8781_v56, %v8780_v60 }
0x1907   : > { %7847 = vadd.xlane.f32.xlu0 %v7846_v45  ;;  %v7843_v6 = vsel %vm768_vm5, %v7831_v38, 0.0 }
0x1908   : > { %7844 = vadd.xlane.f32.xlu1 %v7843_v6  ;;  %10495 = vmatprep.subr.bf16.mxu1 %v10494_v22 }
0x1909   : > { %10497 = vmatpush3.bf16.msra.mxu1 %v10494_v22 }
0x190a   : > { %10499 = vmatprep.subr.bf16.mxu1 %v10498_v59 }
0x190b   : > { %7865 = vadd.xlane.f32.xlu0 %v7864_v61 }
0x190c   : > { %7862 = vadd.xlane.f32.xlu1 %v7861_v46 }
0x190d   : > { %10501 = vmatpush3.bf16.msra.mxu1 %v10498_v59 }
0x1994   : > { %v7848_v27 = vpop.xlane.xlu0 %7847 }
0x1995   : > { %v7852_v7 = vmul.f32 0.03125, %v7848_v27  ;;  %v7845_v32 = vpop.xlane.xlu1 %7844 }
0x1996   : > { %v7851_v44 = vmul.f32 0.03125, %v7845_v32  ;;  %v8785_v32 = vld [vmem:[%s12595_s13 + $0x1] ss:$0 sm:$0xff] }
0x1997   : > { %v12359_v35 = vsub.f32 %v7832_v63, %v7852_v7  ;;  %v8805_v63 = vld [vmem:[%s12596_s14 + $0xf8] sm:$0xff] }
0x1998   : > { %v12361_v9 = vsub.f32 %v7831_v38, %v7851_v44  ;;  %v7866_v53 = vpop.xlane.xlu0 %7865  ;;  %v10530_v38 = vpack.c.bf16 %v8805_v63, %v8804_v39 }
0x1999   : > { %v7874_v51 = vmul.f32 0.03125, %v7866_v53  ;;  %v7863_v33 = vpop.xlane.xlu1 %7862  ;;  %v7860_v42 = vmul.f32 %v12359_v35, %v12359_v35 }
0x199a   : > { %v7873_v40 = vmul.f32 0.03125, %v7863_v33  ;;  %v7859_v36 = vmul.f32 %v12361_v9, %v12361_v9 }
0x199b   : > { %v7878_v37 = vadd.f32 1e-05, %v7874_v51  ;;  %v7870_v58 = vsel %vm768_vm5, %v7860_v42, 0.0 }
0x199c   : > { %v7877_v24 = vadd.f32 1e-05, %v7873_v40  ;;  %7871 = vadd.xlane.f32.xlu0 %v7870_v58  ;;  %v7867_v47 = vsel %vm768_vm5, %v7859_v36, 0.0 }
0x199d   : > { %10785 = vrsqrt.f32 %v7878_v37  ;;  %7868 = vadd.xlane.f32.xlu1 %v7867_v47 }
0x199e   : > { %10787 = vrsqrt.f32 %v7877_v24 }
0x19a7   : > { %v10786_v26 = vpop.eup %10785 }
0x19a8   : > { %v10788_v13 = vpop.eup %10787  ;;  %v7886_v25 = vmul.f32 %v10786_v26, %v7854_v48  ;;  %v10522_v48 = vpack.c.bf16 %v8801_v12, %v8800_v5  ;;  %v8807_v26 = vld [vmem:[%s12597_s15 + $0x1] ss:$0 sm:$0xff] }
0x19a9   : > { %v7885_v10 = vmul.f32 %v10788_v13, %v7853_v15  ;;  %v10526_v15 = vpack.c.bf16 %v8803_v17, %v8802_v16 }
0x19aa   : > { %v7896_v55 = vmul.f32 %v12372_v49, %v7886_v25  ;;  %10523 = vmatprep.subr.bf16.mxu0 %v10522_v48 }
0x19ab   : > { %v7895_v0 = vmul.f32 %v12372_v49, %v7885_v10  ;;  %10525 = vmatpush3.bf16.msra.mxu0 %v10522_v48 }
0x19ac   : > { %v12381_v43 = vadd.f32 %v8779_v62, %v7896_v55  ;;  %10527 = vmatprep.subr.bf16.mxu0 %v10526_v15 }
0x19ad   : > { %v12379_v57 = vadd.f32 %v8779_v62, %v7895_v0 }
0x19af   : > { %9996 = vmatprep.mubr.msk.f32.mxu1 %vm768_vm5, %v12379_v57  ;;  %10529 = vmatpush3.bf16.msra.mxu0 %v10526_v15 }
0x19b0   : > { %9997 = vmatmul.mubr.msk.f32.vlgmr.msra.gmra.mrb[84].mxu1 %vm768_vm5, %v12381_v43  ;;  %10531 = vmatprep.subr.bf16.mxu0 %v10530_v38 }
0x19b3   : > { %10533 = vmatpush3.bf16.msra.mxu0 %v10530_v38 }
0x1a29   : > { %v7872_v45 = vpop.xlane.xlu0 %7871 }
0x1a2a   : > { %v7876_v19 = vmul.f32 0.03125, %v7872_v45  ;;  %v7869_v6 = vpop.xlane.xlu1 %7868 }
0x1a2b   : > { %v7875_v20 = vmul.f32 0.03125, %v7869_v6  ;;  %v8248_v6 = vld [vmem:[%s12600_s18 + $0x8] sm:$0xff] }
0x1a2c   : > { %v7880_v61 = vadd.f32 1e-05, %v7876_v19  ;;  %v8247_v19 = vld [vmem:[%s12600_s18] sm:$0xff] }
0x1a2d   : > { %v7879_v46 = vadd.f32 1e-05, %v7875_v20 }
0x1a2e   : > { %10789 = vrsqrt.f32 %v7880_v61 }
0x1a2f   : > { %10791 = vrsqrt.f32 %v7879_v46 }
0x1a38   : > { %v10790_v60 = vpop.eup %10789 }
0x1a39   : > { %v10792_v56 = vpop.eup %10791  ;;  %v7888_v8 = vmul.f32 %v10790_v60, %v12359_v35  ;;  %v10541_v60 = vpack.c.bf16 %v8248_v6, %v8247_v19 }
0x1a3a   : > { %v7887_v22 = vmul.f32 %v10792_v56, %v12361_v9 }
0x1a3b   : > { %v7898_v23 = vmul.f32 %v12372_v49, %v7888_v8  ;;  %v8249_v8 = vld [vmem:[%s12600_s18 + $0x10] sm:$0xff] }
0x1a3c   : > { %v7897_v59 = vmul.f32 %v12372_v49, %v7887_v22  ;;  %v8250_v22 = vld [vmem:[%s12600_s18 + $0x18] sm:$0xff] }
0x1a3d   : > { %v7908_v7 = vadd.f32 %v8779_v62, %v7898_v23  ;;  %v10544_v23 = vpack.c.bf16 %v8250_v22, %v8249_v8 }
0x1a3e   : > { %v7907_v27 = vadd.f32 %v8779_v62, %v7897_v59  ;;  %v8251_v59 = vld [vmem:[%s12600_s18 + $0x20] sm:$0xff] }
0x1a40   : > { %9999 = vmatprep.mubr.msk.f32.mxu1 %vm768_vm5, %v7907_v27 }
0x1a41   : > { %10000 = vmatmul.mubr.msk.f32.gmra.mrb[86].mxu1 %vm768_vm5, %v7908_v7 }
0x1a42   : > { %10048 = vmatprep.mubr.msk.f32.mxu1 %vm10864_vm9, %v10862_v21 }
0x1a83   : > { %v9998_v44 = vpop.f32.mrb[84].mxu1 }
0x1a84   : > { %v8006_v53 = vadd.f32 %v9998_v44, %v8785_v32  ;;  %v8000_v51 = vpop.f32.mrb[85].mxu1 }
0x1a85   : > { %v8001_v35 = vadd.f32 %v8785_v32, %v8000_v51  ;;  %v8256_v51 = vld [vmem:[%s12600_s18 + $0x48] sm:$0xff] }
0x1a86   : > { %v8020_v9 = vmax.f32 %v8006_v53, 0.0  ;;  %v8255_v53 = vld [vmem:[%s12600_s18 + $0x40] sm:$0xff] }
0x1a87   : > { %v8019_v33 = vmax.f32 %v8001_v35, 0.0  ;;  %v10553_v35 = vpack.c.bf16 %v8256_v51, %v8255_v53 }
0x1a89   : > { %10034 = vmatprep.mubr.f32.mxu0 %v8019_v33  ;;  %v8257_v33 = vld [vmem:[%s12600_s18 + $0x50] sm:$0xff] }
0x1a8a   : > { %10035 = vmatmul.mubr.f32.vlgmr.msra.gmra.mrb[96].mxu0 %v8020_v9  ;;  %v8258_v9 = vld [vmem:[%s12600_s18 + $0x58] sm:$0xff] }
0x1b14   : > { %v10001_v42 = vpop.f32.mrb[86].mxu1 }
0x1b15   : > { %v8016_v40 = vadd.f32 %v10001_v42, %v8785_v32  ;;  %v8010_v36 = vpop.f32.mrb[87].mxu1  ;;  %v10556_v42 = vpack.c.bf16 %v8258_v9, %v8257_v33 }
0x1b16   : > { %v8011_v37 = vadd.f32 %v8785_v32, %v8010_v36  ;;  %v8253_v32 = vld [vmem:[%s12600_s18 + $0x30] sm:$0xff]  ;;  %v8260_v36 = vld [vmem:[%s12600_s18 + $0x68] sm:$0xff] }
0x1b17   : > { %v8022_v24 = vmax.f32 %v8016_v40, 0.0  ;;  %v8259_v40 = vld [vmem:[%s12600_s18 + $0x60] sm:$0xff] }
0x1b18   : > { %v8021_v58 = vmax.f32 %v8011_v37, 0.0  ;;  %v10559_v37 = vpack.c.bf16 %v8260_v36, %v8259_v40 }
0x1b1a   : > { %10037 = vmatprep.mubr.f32.mxu0 %v8021_v58  ;;  %v8261_v58 = vld [vmem:[%s12600_s18 + $0x70] sm:$0xff] }
0x1b1b   : > { %10038 = vmatmul.mubr.f32.gmra.mrb[98].mxu0 %v8022_v24  ;;  %v8262_v24 = vld [vmem:[%s12600_s18 + $0x78] sm:$0xff] }
0x1b5d   : > { %v10036_v47 = vpop.f32.mrb[96].mxu0 }
0x1b5e   : > { %v8126_v49 = vadd.f32 %v10036_v47, %v12381_v43  ;;  %v8106_v13 = vpop.f32.mrb[97].mxu0  ;;  %v10863_v43 = vmov 0.0|0.0   ;;  %v10562_v47 = vpack.c.bf16 %v8262_v24, %v8261_v58 }
0x1b5f   : > { %v8125_v25 = vadd.f32 %v8106_v13, %v12379_v57  ;;  %10534 = vmatprep.subr.bf16.mxu1 %v10863_v43  ;;  %v8164_v57 = vld [vmem:[%s12598_s16 + $0x10] sm:$0xff] }
0x1b60   : > { %v8138_v10 = vadd.f32 %v8807_v26, %v8126_v49  ;;  %10536 = vmatpush3.bf16.msra.mxu1 %v10535_v2  ;;  %v10538_v52 = vpack.c.bf16 %v8165_v54, %v8164_v57 }
0x1b61   : > { %v8137_v62 = vadd.f32 %v8807_v26, %v8125_v25  ;;  %10537 = vmatprep.subr.bf16.mxu1 %v10863_v43 }
0x1b62   : > { %v8142_v55 = vsel %vm768_vm5, %v8138_v10, 0.0 }
0x1b63   : > { %v8141_v0 = vsel %vm768_vm5, %v8137_v62, 0.0  ;;  %v8810_v62 = vld [vmem:[%s12601_s19] ss:$0 sm:$0xff] }
0x1b64   : > { %v8143_v11 = vadd.f32 %v8142_v55, %v8141_v0  ;;  %10539 = vmatpush3.bf16.msra.mxu1 %v10538_v52 }
0x1b65   : > { %10540 = vmatprep.subr.bf16.mxu1 %v10863_v43 }
0x1b66   : > { %v8144_v28 = vrot.slane %v8143_v11, 4 }
0x1b68   : > { %v8145_v29 = vadd.f32 %v8144_v28, %v8143_v11 }
0x1b6a   : > { %v8146_v12 = vrot.slane %v8145_v29, 2 }
0x1b6c   : > { %v8147_v17 = vadd.f32 %v8146_v12, %v8145_v29 }
0x1b6e   : > { %v8148_v63 = vrot.slane %v8147_v17, 1 }
0x1b70   : > { %v8149_v20 = vadd.f32 %v8148_v63, %v8147_v17 }
0x1bee   : > { %v10039_v31 = vpop.f32.mrb[98].mxu0 }
0x1bef   : > { %v8128_v30 = vadd.f32 %v10039_v31, %v7908_v7  ;;  %v8116_v34 = vpop.f32.mrb[99].mxu0 }
0x1bf0   : > { %v8127_v3 = vadd.f32 %v8116_v34, %v7907_v27  ;;  %v8252_v27 = vld [vmem:[%s12600_s18 + $0x28] sm:$0xff] }
0x1bf1   : > { %v8140_v4 = vadd.f32 %v8807_v26, %v8128_v30  ;;  %v10547_v7 = vpack.c.bf16 %v8252_v27, %v8251_v59 }
0x1bf2   : > { %v8139_v41 = vadd.f32 %v8807_v26, %v8127_v3  ;;  %v8808_v26 = vld [vmem:[%s12599_s17] ss:$0 sm:$0xff] }
0x1bf3   : > { %v8151_v14 = vsel %vm768_vm5, %v8140_v4, 0.0 }
0x1bf4   : > { %v8150_v5 = vsel %vm768_vm5, %v8139_v41, 0.0 }
0x1bf5   : > { %v8152_v48 = vadd.f32 %v8151_v14, %v8150_v5 }
0x1bf7   : > { %v8153_v16 = vrot.slane %v8152_v48, 4 }
0x1bf9   : > { %v8154_v15 = vadd.f32 %v8153_v16, %v8152_v48 }
0x1bfb   : > { %v8155_v39 = vrot.slane %v8154_v15, 2 }
0x1bfd   : > { %v8156_v38 = vadd.f32 %v8155_v39, %v8154_v15 }
0x1bff   : > { %v8157_v45 = vrot.slane %v8156_v38, 1 }
0x1c01   : > { %v8158_v61 = vadd.f32 %v8157_v45, %v8156_v38 }
0x1c03   : > { %v8160_v46 = vsel %vm8159_vm10, %v8149_v20, %v8158_v61 }
0x1c04   : > { %v8161_v56 = vmul.f32 0.0625, %v8160_v46 }
0x1c06   : > { %10049 = vmatmul.mubr.msk.f32.vlgmr.msra.gmra.mrb[88].mxu1 %vm768_vm5, %v8161_v56 }
0x1c07   : > { %10542 = vmatpush3.bf16.msra.mxu1 %v10541_v60  ;;  %10083 = vmatprep.mubr.msk.f32.mxu1 %vm10864_vm9, %v10862_v21  ;;  %v8254_v21 = vld [vmem:[%s12600_s18 + $0x38] sm:$0xff] }
0x1c08   : > { %10543 = vmatprep.subr.bf16.mxu1 %v10863_v43  ;;  %v10550_v44 = vpack.c.bf16 %v8254_v21, %v8253_v32 }
0x1c0b   : > { %10545 = vmatpush3.bf16.msra.mxu1 %v10544_v23 }
0x1c0c   : > { %10546 = vmatprep.subr.bf16.mxu1 %v10863_v43 }
0x1c0f   : > { %10548 = vmatpush3.bf16.msra.mxu1 %v10547_v7 }
0x1c10   : > { %10549 = vmatprep.subr.bf16.mxu1 %v10863_v43 }
0x1c13   : > { %10551 = vmatpush3.bf16.msra.mxu1 %v10550_v44 }
0x1c14   : > { %10552 = vmatprep.subr.bf16.mxu1 %v10863_v43 }
0x1c17   : > { %10554 = vmatpush3.bf16.msra.mxu1 %v10553_v35 }
0x1c18   : > { %10555 = vmatprep.subr.bf16.mxu1 %v10863_v43 }
0x1c1b   : > { %10557 = vmatpush3.bf16.msra.mxu1 %v10556_v42 }
0x1c1c   : > { %10558 = vmatprep.subr.bf16.mxu1 %v10863_v43 }
0x1c1f   : > { %10560 = vmatpush3.bf16.msra.mxu1 %v10559_v37 }
0x1c20   : > { %10561 = vmatprep.subr.bf16.mxu1 %v10863_v43 }
0x1c23   : > { %10563 = vmatpush3.bf16.msra.mxu1 %v10562_v47 }
0x1cd9   : > { %v8242_v49 = vpop.f32.mrb[88].mxu1 }
0x1cda   : > { %v8243_v13 = vadd.f32 %v8808_v26, %v8242_v49  ;;  %v10050_v25 = vpop.f32.mrb[89].mxu1 }
0x1cdc   : > { %v8246_v10 = vmax.f32 %v8243_v13, 0.0 }
0x1cde   : > { %10084 = vmatmul.mubr.f32.vlgmr.msra.gmra.mrb[90].mxu1 %v8246_v10 }
0x1db1   : > { %v8336_v55 = vpop.f32.mrb[90].mxu1 }
0x1db2   : > { %v8337_v0 = vadd.f32 %v8810_v62, %v8336_v55  ;;  %v10085_v11 = vpop.f32.mrb[91].mxu1 }
0x1db4   : > { %v8341_v1 = vsel %vm8340_vm11, %v8337_v0, -1e+30 }
0x1db5   : > { %v8343_v50 = vsel %vm8342_vm12, %v8341_v1, -inf }
0x1db6   : > { %8344 = vmax.xlane.f32.xlu1 %v8343_v50 }
0x1e43   : > { %v8345_v2 = vpop.xlane.xlu1 %8344 }
0x1e44   : > { %v8346_v43 = vsub.f32 %v8341_v1, %v8345_v2 }
0x1e46   : > { %v8347_v57 = vmul.f32 1.442695, %v8346_v43 }
0x1e48   : > { %10793 = vpow2.f32 %v8347_v57 }
0x1e52   : > { %v10794_v54 = vpop.eup %10793 }
0x1e53   : > { %v8349_v52 = vsel %vm8342_vm12, %v10794_v54, 0.0 }
0x1e54   : > { %8350 = vadd.xlane.f32.xlu0 %v8349_v52 }
0x1ee1   : > { %v8351_v28 = vpop.xlane.xlu0 %8350 }
0x1ee2   : > { %10795 = vlog2.f32 %v8351_v28 }
0x1eec   : > { %v10796_v18 = vpop.eup %10795 }
0x1eed   : > { %v8353_v31 = vmul.f32 0.6931472, %v10796_v18 }
0x1eef   : > { %v8354_v30 = vsub.f32 %v8346_v43, %v8353_v31 }
0x1ef1   : > { %8355 = vst [vmem:[%s622_s27] sm:$0x3] %v8354_v30 }
0x1ef2   : > { %10810 = shalt.err (!%p10807_p3)
}
0x1ef3   : > { %s10811_s24 = scalar_lea.hbm %s12540_s21, 32  ;;  %s10815_s3 = scalar_lea.hbm %s12641_s20, 64 }
0x1ef4   : > { %p10812_p4 = scmp.ne.s32.totalorder %s12540_s21, %s10811_s24  ;;  %p10816_p9 = scmp.lt.u32.totalorder %s12540_s21, %s12641_s20 }
0x1ef5   : > { %p10817_p10 = scmp.lt.u32.totalorder %s10815_s3, %s10811_s24  ;;  %p10819_p12 = scmp.lt.u32.totalorder %s10811_s24, %s12540_s21 }
0x1ef6   : > { %p10813_p7 = pnand %p10812_p4, %p11009_p5 }
0x1ef7   : > { %p10818_p11 = por %p10817_p10, %p10816_p9 }
0x1ef8   : > { %p10814_p8 = pneg %p10813_p7 }
0x1ef9   : > { %p10820_p13 = por %p10819_p12, %p10818_p11 }
0x1efb   : > { %p10821_p0 = pnand %p10820_p13, %p10814_p8 }
0x1efd   : > { %10824 = shalt.err (!%p10821_p0)
}
0x1efe   : > { %10588 = dma.vmem_to_hbm [thread:$0]  (%p11009_p5), %s12542_s23, 32, %s12540_s21, %s8357_s29  }
0x1eff PF: > { %s12642_s5 = sld [smem:[#allocation7_spill]]  ;;  %s12643_s1 = sld [smem:[#allocation5_spill]] }
0x1f05   : > { %p10594_p1 = scmp.ge.s32.totalorder %s12642_s5, 2  ;;  %s8382_s28 = sand.u32 1, %s12643_s1  }
0x1f06   : > { %s8383_s27 = scalar_lea.sflag [#allocation3], %s8382_s28 }
0x1f07   : > { %p10591_p2 = pnand %p10594_p1, %p11013_p6 }
0x1f09   : > { %10842 = dma.done.wait (!%p10591_p2), %s8383_s27, 32  }
0x1f0a   : > { %10844 = vsyncadd (!%p10591_p2), %s8383_s27, 4294967264  ;;  %s12645_s24 = sld [smem:[#allocation8_spill]]  ;;  %s12646_s3 = sld [smem:[#allocation6_spill]] }
0x1f0b   : > { %s12647_s23 = sld [smem:[#allocation9_spill]]  ;;  %s12648_s1 = smov %s10851_s22 }
0x1f10   : > { %p30_p3 = scmp.ge.s32.totalorder %s12645_s24, 4   ;;  %s12649_s22 = smov %s12646_s3 }
0x1f12   :  { %32 = sbr.rel (!%p30_p3) target bundleno = 11 (0xb), region = 172 }
0x1f19   :  { %8388 = vsyncpa [#allocation3], 1 }
0x1f1a   :  { %8390 = vsyncpa [#allocation3 + $0x1], 1 }

</bundles_post_ra>
